<compile_context>
chip_gen: v5e
topology: v5e:2x2
jax: 0.10.0
libtpu: 0.0.40
codegen_flags: <defaults>
</compile_context>

<pallas_src>
import functools
import math

import jax
import jax.numpy as jnp
from jax.experimental import pallas as pl
from jax.experimental.pallas import tpu as pltpu


# ----------------------------------------------------------------------------
# Fused forward kernel (one grid step == Bb batch elements)
# ----------------------------------------------------------------------------
def _fused_forward_kernel(
        shifts_ref,                                   # SMEM (heads,) scalar prefetch
        x_ref, adj_ref, mq_ref, mk_ref, lig_ref,
        in1_w_ref, in1_b_ref, in2_w_ref, in2_b_ref,
        wqkv_ref, wo_ref,
        out1_w_ref, out1_b_ref, out2_w_ref, out2_b_ref,
        lig_w_ref, lig_b_ref,
        o_ref, *, heads, depth, bb, n_nodes):
    f32 = jnp.float32
    D = in1_w_ref.shape[1]
    dh = D // heads
    rows = bb * n_nodes

    # ---- self.input : Linear -> Linear over all Bb*N rows (2-D matmuls) -----
    x = x_ref[...].reshape(rows, x_ref.shape[2])
    h = jnp.dot(x, in1_w_ref[...], preferred_element_type=f32) + in1_b_ref[...]
    h = jnp.dot(h, in2_w_ref[...], preferred_element_type=f32) + in2_b_ref[...]   # (rows, D)

    mq = mq_ref[...].reshape(rows, 1)                 # query-node mask (rows, 1)
    adj = adj_ref[...]                                # (bb, N, N)
    mk = mk_ref[...]                                  # (bb, 1, N)

    # ---- layer/head-invariant focus + additive key-mask bias (ONCE) ---------
    bias = jnp.where(mk > 0.0, 0.0, -1e30)            # (bb, 1, N)
    base = bias - adj * adj                           # (bb, N, N)
    focus = []
    for hh in range(heads):
        sh = shifts_ref[hh]                           # traced scalar from SMEM
        # -(adj - sh)^2 + bias  ==  base + 2*sh*adj - sh^2
        focus.append(base + (2.0 * sh) * adj - sh * sh)

    # ---- MoireLayer stack (static unroll over depth & heads) ----------------
    for l in range(depth):
        # one fused (rows, D) @ (D, 3D) projection; Q columns pre-scaled.
        qkv = jnp.dot(h, wqkv_ref[l], preferred_element_type=f32)    # (rows, 3D)
        qkv3 = qkv.reshape(bb, n_nodes, 3 * D)
        wo_l = wo_ref[l]                                             # (D, D)
        acc = None
        for hh in range(heads):
            lo = hh * dh
            qh = qkv3[:, :, lo:lo + dh]                              # (bb, N, dh)
            kh = qkv3[:, :, D + lo:D + lo + dh]
            vh = qkv3[:, :, 2 * D + lo:2 * D + lo + dh]
            # scores: batched 'bqd,bkd->bqk'
            s = jax.lax.dot_general(
                qh, kh, (((2,), (2,)), ((0,), (0,))),
                preferred_element_type=f32)                          # (bb, N, N)
            logits = s + focus[hh]
            # manual softmax; reciprocal on the EUP (approx=True ok at prod N)
            m = jnp.max(logits, axis=-1, keepdims=True)
            e = jnp.exp(logits - m)
            p = e * pl.reciprocal(jnp.sum(e, axis=-1, keepdims=True), approx=False)
            pv = jax.lax.dot_general(
                p, vh, (((2,), (1,)), ((0,), (0,))),
                preferred_element_type=f32)                          # (bb, N, dh)
            # fold the head's slice of the O-projection: no lane concat needed
            contrib = jnp.dot(pv.reshape(rows, dh), wo_l[lo:lo + dh, :],
                              preferred_element_type=f32)            # (rows, D)
            acc = contrib if acc is None else acc + contrib
        h = (acc + h) * mq                                           # residual + query mask

    # ---- folded output head:  relu( h @ vD + scalar ) -----------------------
    lig = lig_ref[...].reshape(bb, lig_ref.shape[2])                 # (bb, F_lig)
    lig_p = jnp.dot(lig, lig_w_ref[...], preferred_element_type=f32) + lig_b_ref[...]   # (bb, 48)
    v192 = jax.lax.dot_general(lig_p, out2_w_ref[...], (((1,), (1,)), ((), ())),
                               preferred_element_type=f32)           # (bb, 192) = lig_p @ out2_w^T
    vD = jax.lax.dot_general(v192, out1_w_ref[...], (((1,), (1,)), ((), ())),
                             preferred_element_type=f32)             # (bb, D)   = v192 @ out1_w^T
    scal = (jax.lax.dot_general(v192, out1_b_ref[...], (((1,), (1,)), ((), ())),
                                preferred_element_type=f32)
            + jax.lax.dot_general(lig_p, out2_b_ref[...], (((1,), (1,)), ((), ())),
                                  preferred_element_type=f32))       # (bb, 1)
    h3 = h.reshape(bb, n_nodes, D)
    score = jax.lax.dot_general(vD[:, None, :], h3, (((2,), (2,)), ((0,), (0,))),
                                preferred_element_type=f32)          # (bb, 1, N)
    score = score.reshape(bb, n_nodes) + scal
    o_ref[0] = jnp.maximum(score, 0.0)


# ----------------------------------------------------------------------------
# Wrapper
# ----------------------------------------------------------------------------
def my_model_forward(params, config, x, adj, mask, ligand, block_b=None):
    B, N, F = x.shape
    heads = config["HEADS"]
    depth = config["DEPTH"]
    F_lig = ligand.shape[-1]
    D = params["in1_w"].shape[1]
    dh = D // heads

    if block_b is None:
        block_b = min(B, 4)
    assert B % block_b == 0, "batch must be divisible by block_b"
    G = B // block_b

    mask_q = mask.reshape(B, N, 1).astype(jnp.float32)
    mask_k = mask.reshape(B, 1, N).astype(jnp.float32)
    lig3 = ligand.reshape(B, 1, F_lig)

    # host-side weight packing: fused QKV with the 1/sqrt(dh) scale folded
    # into the Q columns (algebraically identical to scaling the scores).
    scale = 1.0 / math.sqrt(dh)
    wqkv = jnp.concatenate(
        [params["wq"] * scale, params["wk"], params["wv"]], axis=-1)   # (depth, D, 3D)
    shifts = jnp.asarray(params["shifts"], jnp.float32).reshape(heads)

    kernel = functools.partial(_fused_forward_kernel, heads=heads, depth=depth,
                               bb=block_b, n_nodes=N)

    def _const_spec(arr):
        zeros = (0,) * arr.ndim
        return pl.BlockSpec(arr.shape, lambda g, s, _z=zeros: _z)

    in_specs = [
        pl.BlockSpec((block_b, N, F), lambda g, s: (g, 0, 0)),        # x
        pl.BlockSpec((block_b, N, N), lambda g, s: (g, 0, 0)),        # adj
        pl.BlockSpec((block_b, N, 1), lambda g, s: (g, 0, 0)),        # mask_q
        pl.BlockSpec((block_b, 1, N), lambda g, s: (g, 0, 0)),        # mask_k
        pl.BlockSpec((block_b, 1, F_lig), lambda g, s: (g, 0, 0)),    # ligand
        _const_spec(params["in1_w"]), _const_spec(params["in1_b"]),
        _const_spec(params["in2_w"]), _const_spec(params["in2_b"]),
        _const_spec(wqkv), _const_spec(params["wo"]),
        _const_spec(params["out1_w"]), _const_spec(params["out1_b"]),
        _const_spec(params["out2_w"]), _const_spec(params["out2_b"]),
        _const_spec(params["lig_w"]), _const_spec(params["lig_b"]),
    ]

    out = pl.pallas_call(
        kernel,
        out_shape=jax.ShapeDtypeStruct((G, block_b, N), jnp.float32),
        grid_spec=pltpu.PrefetchScalarGridSpec(
            num_scalar_prefetch=1,                     # shifts -> SMEM
            grid=(G,),
            in_specs=in_specs,
            out_specs=pl.BlockSpec((1, block_b, N), lambda g, s: (g, 0, 0)),
        ),
        compiler_params=pltpu.CompilerParams(
            dimension_semantics=("parallel",),         # v7x: grid steps split over TCs
            vmem_limit_bytes=32 * 1024 * 1024),
    )(shifts, x, adj, mask_q, mask_k, lig3,
      params["in1_w"], params["in1_b"], params["in2_w"], params["in2_b"],
      wqkv, params["wo"],
      params["out1_w"], params["out1_b"], params["out2_w"], params["out2_b"],
      params["lig_w"], params["lig_b"])
    return out.reshape(B, N)


# ----------------------------------------------------------------------------
# Parameter init (deterministic, in-script)
# ----------------------------------------------------------------------------
def _linear_init(key, din, dout):
    kw, kb = jax.random.split(key)
    bound = 1.0 / math.sqrt(din)
    w = jax.random.uniform(kw, (din, dout), jnp.float32, -bound, bound)
    b = jax.random.uniform(kb, (1, dout), jnp.float32, -bound, bound)
    return w, b


def init_params(key, node_feat, ligand_feat, config):
    dims = config["MLP_DIM"]
    heads = config["HEADS"]
    depth = config["DEPTH"]
    dh = dims // heads
    keys = jax.random.split(key, 5 + depth)
    p = {}
    p["in1_w"], p["in1_b"] = _linear_init(keys[0], node_feat, dims)
    p["in2_w"], p["in2_b"] = _linear_init(keys[1], dims, dims)
    p["out1_w"], p["out1_b"] = _linear_init(keys[2], dims, 192)
    p["out2_w"], p["out2_b"] = _linear_init(keys[3], 192, 48)
    # TODO(synk): LigandProjection source not provided; single Linear(F_lig->48)
    p["lig_w"], p["lig_b"] = _linear_init(keys[4], ligand_feat, 48)

    wq, wk, wv, wo = [], [], [], []
    for d in range(depth):
        lk = jax.random.split(keys[5 + d], 4)
        sc = 1.0 / math.sqrt(dims)
        wq.append(jax.random.normal(lk[0], (dims, dims), jnp.float32) * sc)
        wk.append(jax.random.normal(lk[1], (dims, dims), jnp.float32) * sc)
        wv.append(jax.random.normal(lk[2], (dims, dims), jnp.float32) * sc)
        wo.append(jax.random.normal(lk[3], (dims, dims), jnp.float32)
                  * (1.0 / math.sqrt(dh)))
    p["wq"], p["wk"] = jnp.stack(wq), jnp.stack(wk)
    p["wv"], p["wo"] = jnp.stack(wv), jnp.stack(wo)

    # per-head focus shifts in [SCALE_MIN, SCALE_MAX] (traced/learnable array)
    if heads > 1:
        shifts = [config["SCALE_MIN"]
                  + i * (config["SCALE_MAX"] - config["SCALE_MIN"]) / (heads - 1)
                  for i in range(heads)]
    else:
        shifts = [config["SCALE_MIN"]]
    p["shifts"] = jnp.asarray(shifts, jnp.float32)
    return p


# ----------------------------------------------------------------------------
# Pure-JAX reference (unfused math) to validate the Pallas kernel
# ----------------------------------------------------------------------------
def _reference_forward(params, config, x, adj, mask, ligand):
    heads = config["HEADS"]
    depth = config["DEPTH"]
    D = params["in1_w"].shape[1]
    dh = D // heads
    hp = jax.lax.Precision.HIGHEST
    dot = functools.partial(jnp.matmul, precision=hp)
    shifts = params["shifts"]

    h = dot(x, params["in1_w"]) + params["in1_b"]
    h = dot(h, params["in2_w"]) + params["in2_b"]
    mq = mask[:, :, None]
    mk = mask[:, None, :]
    for l in range(depth):
        q = dot(h, params["wq"][l])
        k = dot(h, params["wk"][l])
        v = dot(h, params["wv"][l])
        outs = []
        for hh in range(heads):
            sl = slice(hh * dh, (hh + 1) * dh)
            s = jnp.einsum("bnd,bmd->bnm", q[..., sl], k[..., sl],
                           precision=hp) / math.sqrt(dh)
            logits = s - (adj - shifts[hh]) ** 2
            logits = jnp.where(mk > 0.0, logits, -1e30)
            p = jax.nn.softmax(logits, axis=-1)
            outs.append(jnp.einsum("bnm,bmd->bnd", p, v[..., sl], precision=hp))
        attn = jnp.concatenate(outs, axis=-1)
        h = (dot(attn, params["wo"][l]) + h) * mq

    h1 = dot(h, params["out1_w"]) + params["out1_b"]
    h2 = dot(h1, params["out2_w"]) + params["out2_b"]          # (B, N, 48)
    lig_p = dot(ligand, params["lig_w"]) + params["lig_b"]     # (B, 48)
    inter = jnp.sum(h2 * lig_p[:, None, :], axis=-1)
    return jax.nn.relu(inter)


if __name__ == "__main__":
    config = dict(MLP_DIM=32, HEADS=4, SCALE_MIN=1.0, SCALE_MAX=4.0,
                  DROPOUT=0.0, FOCUS="gaussian", DEPTH=2)
    B, N, F, F_LIG = 16, 16, 8, 16

    key = jax.random.PRNGKey(0)
    ks = jax.random.split(key, 6)
    x = jax.random.normal(ks[0], (B, N, F), jnp.float32)
    adj = jax.random.uniform(ks[1], (B, N, N), jnp.float32) * 4.0
    adj = 0.5 * (adj + jnp.transpose(adj, (0, 2, 1)))          # distance-like
    mask = (jax.random.uniform(ks[2], (B, N)) > 0.2).astype(jnp.float32)
    ligand = jax.random.normal(ks[3], (B, F_LIG), jnp.float32)

    params = init_params(ks[4], F, F_LIG, config)

    out = my_model_forward(params, config, x, adj, mask, ligand, block_b=4)
    out = jax.block_until_ready(out)
    assert out.shape == (B, N) and out.dtype == jnp.float32
    assert bool(jnp.all(out >= 0.0))  # relu output

    ref = _reference_forward(params, config, x, adj, mask, ligand)
    assert bool(jnp.allclose(out, ref, rtol=5e-3, atol=5e-3)), (
        "max abs diff vs reference: "
        + str(float(jnp.max(jnp.abs(out - ref)))))
    print("KERNEL_OK")
</pallas_src>

<mosaic_0001>
module attributes {stable_mosaic.version = 11 : i64} {
  func.func @_fused_forward_kernel(%arg0: i32, %arg1: memref<4xf32, #tpu.memory_space<smem>>, %arg2: memref<4x16x8xf32, #tpu.memory_space<vmem>>, %arg3: memref<4x16x16xf32, #tpu.memory_space<vmem>>, %arg4: memref<4x16x1xf32, #tpu.memory_space<vmem>>, %arg5: memref<4x1x16xf32, #tpu.memory_space<vmem>>, %arg6: memref<4x1x16xf32, #tpu.memory_space<vmem>>, %arg7: memref<8x32xf32, #tpu.memory_space<vmem>>, %arg8: memref<1x32xf32, #tpu.memory_space<vmem>>, %arg9: memref<32x32xf32, #tpu.memory_space<vmem>>, %arg10: memref<1x32xf32, #tpu.memory_space<vmem>>, %arg11: memref<2x32x96xf32, #tpu.memory_space<vmem>>, %arg12: memref<2x32x32xf32, #tpu.memory_space<vmem>>, %arg13: memref<32x192xf32, #tpu.memory_space<vmem>>, %arg14: memref<1x192xf32, #tpu.memory_space<vmem>>, %arg15: memref<192x48xf32, #tpu.memory_space<vmem>>, %arg16: memref<1x48xf32, #tpu.memory_space<vmem>>, %arg17: memref<16x48xf32, #tpu.memory_space<vmem>>, %arg18: memref<1x48xf32, #tpu.memory_space<vmem>>, %arg19: memref<1x4x16xf32, #tpu.memory_space<vmem>>) attributes {dimension_semantics = [#tpu.dimension_semantics<parallel>], iteration_bounds = array<i64: 4>, scalar_prefetch = 1 : i64, scratch_operands = 0 : i64, tpu.core_type = #tpu.core_type<tc>, window_params = [{transform_indices = @transform_0, window_bounds = array<i64: 4, 16, 8>}, {transform_indices = @transform_1, window_bounds = array<i64: 4, 16, 16>}, {transform_indices = @transform_2, window_bounds = array<i64: 4, 16, 1>}, {transform_indices = @transform_3, window_bounds = array<i64: 4, 1, 16>}, {transform_indices = @transform_4, window_bounds = array<i64: 4, 1, 16>}, {pipeline_mode = #tpu.pipeline_mode<synchronous>, transform_indices = @transform_5, window_bounds = array<i64: 8, 32>}, {pipeline_mode = #tpu.pipeline_mode<synchronous>, transform_indices = @transform_6, window_bounds = array<i64: 1, 32>}, {pipeline_mode = #tpu.pipeline_mode<synchronous>, transform_indices = @transform_7, window_bounds = array<i64: 32, 32>}, {pipeline_mode = #tpu.pipeline_mode<synchronous>, transform_indices = @transform_8, window_bounds = array<i64: 1, 32>}, {pipeline_mode = #tpu.pipeline_mode<synchronous>, transform_indices = @transform_9, window_bounds = array<i64: 2, 32, 96>}, {pipeline_mode = #tpu.pipeline_mode<synchronous>, transform_indices = @transform_10, window_bounds = array<i64: 2, 32, 32>}, {pipeline_mode = #tpu.pipeline_mode<synchronous>, transform_indices = @transform_11, window_bounds = array<i64: 32, 192>}, {pipeline_mode = #tpu.pipeline_mode<synchronous>, transform_indices = @transform_12, window_bounds = array<i64: 1, 192>}, {pipeline_mode = #tpu.pipeline_mode<synchronous>, transform_indices = @transform_13, window_bounds = array<i64: 192, 48>}, {pipeline_mode = #tpu.pipeline_mode<synchronous>, transform_indices = @transform_14, window_bounds = array<i64: 1, 48>}, {pipeline_mode = #tpu.pipeline_mode<synchronous>, transform_indices = @transform_15, window_bounds = array<i64: 16, 48>}, {pipeline_mode = #tpu.pipeline_mode<synchronous>, transform_indices = @transform_16, window_bounds = array<i64: 1, 48>}, {transform_indices = @transform_17, window_bounds = array<i64: 1, 4, 16>}]} {
    %c0 = arith.constant 0 : index
    %c0_0 = arith.constant 0 : index
    %c0_1 = arith.constant 0 : index
    %0 = vector.load %arg2[%c0, %c0_0, %c0_1] : memref<4x16x8xf32, #tpu.memory_space<vmem>>, vector<4x16x8xf32>
    %1 = vector.shape_cast %0 : vector<4x16x8xf32> to vector<64x8xf32>
    %c0_2 = arith.constant 0 : index
    %c0_3 = arith.constant 0 : index
    %2 = vector.load %arg7[%c0_2, %c0_3] : memref<8x32xf32, #tpu.memory_space<vmem>>, vector<8x32xf32>
    %cst = arith.constant dense<0.000000e+00> : vector<64x32xf32>
    %3 = tpu.matmul %1, %2, %cst {dimension_numbers = #tpu.dot_dimension_numbers<[1], [0], [0], [1], [0, 0, 1, 1], [], []>} : vector<64x8xf32>, vector<8x32xf32>, vector<64x32xf32> -> vector<64x32xf32>
    %c0_4 = arith.constant 0 : index
    %c0_5 = arith.constant 0 : index
    %4 = vector.load %arg8[%c0_4, %c0_5] : memref<1x32xf32, #tpu.memory_space<vmem>>, vector<1x32xf32>
    %5 = vector.broadcast %4 : vector<1x32xf32> to vector<64x32xf32>
    %6 = arith.addf %3, %5 : vector<64x32xf32>
    %c0_6 = arith.constant 0 : index
    %c0_7 = arith.constant 0 : index
    %7 = vector.load %arg9[%c0_6, %c0_7] : memref<32x32xf32, #tpu.memory_space<vmem>>, vector<32x32xf32>
    %cst_8 = arith.constant dense<0.000000e+00> : vector<64x32xf32>
    %8 = tpu.matmul %6, %7, %cst_8 {dimension_numbers = #tpu.dot_dimension_numbers<[1], [0], [0], [1], [0, 0, 1, 1], [], []>} : vector<64x32xf32>, vector<32x32xf32>, vector<64x32xf32> -> vector<64x32xf32>
    %c0_9 = arith.constant 0 : index
    %c0_10 = arith.constant 0 : index
    %9 = vector.load %arg10[%c0_9, %c0_10] : memref<1x32xf32, #tpu.memory_space<vmem>>, vector<1x32xf32>
    %10 = vector.broadcast %9 : vector<1x32xf32> to vector<64x32xf32>
    %11 = arith.addf %8, %10 : vector<64x32xf32>
    %c0_11 = arith.constant 0 : index
    %c0_12 = arith.constant 0 : index
    %c0_13 = arith.constant 0 : index
    %12 = vector.load %arg4[%c0_11, %c0_12, %c0_13] : memref<4x16x1xf32, #tpu.memory_space<vmem>>, vector<4x16x1xf32>
    %13 = vector.shape_cast %12 : vector<4x16x1xf32> to vector<64x1xf32>
    %c0_14 = arith.constant 0 : index
    %c0_15 = arith.constant 0 : index
    %c0_16 = arith.constant 0 : index
    %14 = vector.load %arg3[%c0_14, %c0_15, %c0_16] : memref<4x16x16xf32, #tpu.memory_space<vmem>>, vector<4x16x16xf32>
    %c0_17 = arith.constant 0 : index
    %c0_18 = arith.constant 0 : index
    %c0_19 = arith.constant 0 : index
    %15 = vector.load %arg5[%c0_17, %c0_18, %c0_19] : memref<4x1x16xf32, #tpu.memory_space<vmem>>, vector<4x1x16xf32>
    %cst_20 = arith.constant 0.000000e+00 : f32
    %16 = vector.broadcast %cst_20 : f32 to vector<4x1x16xf32>
    %17 = arith.cmpf ogt, %15, %16 : vector<4x1x16xf32>
    %cst_21 = arith.constant 0.000000e+00 : f32
    %cst_22 = arith.constant -1.000000e+30 : f32
    %18 = vector.broadcast %cst_21 : f32 to vector<4x1x16xf32>
    %19 = vector.broadcast %cst_22 : f32 to vector<4x1x16xf32>
    %20 = arith.select %17, %18, %19 : vector<4x1x16xi1>, vector<4x1x16xf32>
    %21 = arith.mulf %14, %14 : vector<4x16x16xf32>
    %22 = vector.broadcast %20 : vector<4x1x16xf32> to vector<4x16x16xf32>
    %23 = arith.subf %22, %21 : vector<4x16x16xf32>
    %c0_23 = arith.constant 0 : index
    %24 = memref.load %arg1[%c0_23] : memref<4xf32, #tpu.memory_space<smem>>
    %cst_24 = arith.constant 2.000000e+00 : f32
    %25 = arith.mulf %cst_24, %24 : f32
    %26 = vector.broadcast %25 : f32 to vector<4x16x16xf32>
    %27 = arith.mulf %26, %14 : vector<4x16x16xf32>
    %28 = arith.addf %23, %27 : vector<4x16x16xf32>
    %29 = arith.mulf %24, %24 : f32
    %30 = vector.broadcast %29 : f32 to vector<4x16x16xf32>
    %31 = arith.subf %28, %30 : vector<4x16x16xf32>
    %c1 = arith.constant 1 : index
    %32 = memref.load %arg1[%c1] : memref<4xf32, #tpu.memory_space<smem>>
    %cst_25 = arith.constant 2.000000e+00 : f32
    %33 = arith.mulf %cst_25, %32 : f32
    %34 = vector.broadcast %33 : f32 to vector<4x16x16xf32>
    %35 = arith.mulf %34, %14 : vector<4x16x16xf32>
    %36 = arith.addf %23, %35 : vector<4x16x16xf32>
    %37 = arith.mulf %32, %32 : f32
    %38 = vector.broadcast %37 : f32 to vector<4x16x16xf32>
    %39 = arith.subf %36, %38 : vector<4x16x16xf32>
    %c2 = arith.constant 2 : index
    %40 = memref.load %arg1[%c2] : memref<4xf32, #tpu.memory_space<smem>>
    %cst_26 = arith.constant 2.000000e+00 : f32
    %41 = arith.mulf %cst_26, %40 : f32
    %42 = vector.broadcast %41 : f32 to vector<4x16x16xf32>
    %43 = arith.mulf %42, %14 : vector<4x16x16xf32>
    %44 = arith.addf %23, %43 : vector<4x16x16xf32>
    %45 = arith.mulf %40, %40 : f32
    %46 = vector.broadcast %45 : f32 to vector<4x16x16xf32>
    %47 = arith.subf %44, %46 : vector<4x16x16xf32>
    %c3 = arith.constant 3 : index
    %48 = memref.load %arg1[%c3] : memref<4xf32, #tpu.memory_space<smem>>
    %cst_27 = arith.constant 2.000000e+00 : f32
    %49 = arith.mulf %cst_27, %48 : f32
    %50 = vector.broadcast %49 : f32 to vector<4x16x16xf32>
    %51 = arith.mulf %50, %14 : vector<4x16x16xf32>
    %52 = arith.addf %23, %51 : vector<4x16x16xf32>
    %53 = arith.mulf %48, %48 : f32
    %54 = vector.broadcast %53 : f32 to vector<4x16x16xf32>
    %55 = arith.subf %52, %54 : vector<4x16x16xf32>
    %c0_28 = arith.constant 0 : index
    %c0_29 = arith.constant 0 : index
    %c0_30 = arith.constant 0 : index
    %56 = vector.load %arg11[%c0_28, %c0_29, %c0_30] : memref<2x32x96xf32, #tpu.memory_space<vmem>>, vector<1x32x96xf32>
    %57 = vector.shape_cast %56 : vector<1x32x96xf32> to vector<32x96xf32>
    %cst_31 = arith.constant dense<0.000000e+00> : vector<64x96xf32>
    %58 = tpu.matmul %11, %57, %cst_31 {dimension_numbers = #tpu.dot_dimension_numbers<[1], [0], [0], [1], [0, 0, 1, 1], [], []>} : vector<64x32xf32>, vector<32x96xf32>, vector<64x96xf32> -> vector<64x96xf32>
    %59 = vector.shape_cast %58 : vector<64x96xf32> to vector<4x16x96xf32>
    %c0_32 = arith.constant 0 : index
    %c0_33 = arith.constant 0 : index
    %c0_34 = arith.constant 0 : index
    %60 = vector.load %arg12[%c0_32, %c0_33, %c0_34] : memref<2x32x32xf32, #tpu.memory_space<vmem>>, vector<1x32x32xf32>
    %61 = vector.shape_cast %60 : vector<1x32x32xf32> to vector<32x32xf32>
    %62 = vector.extract_strided_slice %59 {offsets = [0, 0, 0], sizes = [4, 16, 8], strides = [1, 1, 1]} : vector<4x16x96xf32> to vector<4x16x8xf32>
    %63 = vector.extract_strided_slice %59 {offsets = [0, 0, 32], sizes = [4, 16, 8], strides = [1, 1, 1]} : vector<4x16x96xf32> to vector<4x16x8xf32>
    %64 = vector.extract_strided_slice %59 {offsets = [0, 0, 64], sizes = [4, 16, 8], strides = [1, 1, 1]} : vector<4x16x96xf32> to vector<4x16x8xf32>
    %cst_35 = arith.constant dense<0.000000e+00> : vector<4x16x16xf32>
    %65 = tpu.matmul %62, %63, %cst_35 {dimension_numbers = #tpu.dot_dimension_numbers<[2], [2], [1], [1], [0, 0, 0, 1, 1, 1], [0], [0]>} : vector<4x16x8xf32>, vector<4x16x8xf32>, vector<4x16x16xf32> -> vector<4x16x16xf32>
    %66 = arith.addf %65, %31 : vector<4x16x16xf32>
    %cst_36 = arith.constant dense<0xFF800000> : vector<4x16xf32>
    %67 = vector.multi_reduction <maximumf>, %66, %cst_36 [2] : vector<4x16x16xf32> to vector<4x16xf32>
    %68 = vector.shape_cast %67 : vector<4x16xf32> to vector<4x16x1xf32>
    %69 = vector.broadcast %68 : vector<4x16x1xf32> to vector<4x16x16xf32>
    %70 = arith.subf %66, %69 : vector<4x16x16xf32>
    %71 = math.exp %70 : vector<4x16x16xf32>
    %cst_37 = arith.constant dense<0.000000e+00> : vector<4x16xf32>
    %72 = vector.multi_reduction <add>, %71, %cst_37 [2] : vector<4x16x16xf32> to vector<4x16xf32>
    %73 = vector.shape_cast %72 : vector<4x16xf32> to vector<4x16x1xf32>
    %74 = tpu.reciprocal %73 : vector<4x16x1xf32> -> vector<4x16x1xf32>
    %75 = vector.broadcast %74 : vector<4x16x1xf32> to vector<4x16x16xf32>
    %76 = arith.mulf %71, %75 : vector<4x16x16xf32>
    %cst_38 = arith.constant dense<0.000000e+00> : vector<4x16x8xf32>
    %77 = tpu.matmul %76, %64, %cst_38 {dimension_numbers = #tpu.dot_dimension_numbers<[2], [1], [1], [2], [0, 0, 0, 1, 1, 2], [0], [0]>} : vector<4x16x16xf32>, vector<4x16x8xf32>, vector<4x16x8xf32> -> vector<4x16x8xf32>
    %78 = vector.shape_cast %77 : vector<4x16x8xf32> to vector<64x8xf32>
    %79 = vector.extract_strided_slice %61 {offsets = [0, 0], sizes = [8, 32], strides = [1, 1]} : vector<32x32xf32> to vector<8x32xf32>
    %cst_39 = arith.constant dense<0.000000e+00> : vector<64x32xf32>
    %80 = tpu.matmul %78, %79, %cst_39 {dimension_numbers = #tpu.dot_dimension_numbers<[1], [0], [0], [1], [0, 0, 1, 1], [], []>} : vector<64x8xf32>, vector<8x32xf32>, vector<64x32xf32> -> vector<64x32xf32>
    %81 = vector.extract_strided_slice %59 {offsets = [0, 0, 8], sizes = [4, 16, 8], strides = [1, 1, 1]} : vector<4x16x96xf32> to vector<4x16x8xf32>
    %82 = vector.extract_strided_slice %59 {offsets = [0, 0, 40], sizes = [4, 16, 8], strides = [1, 1, 1]} : vector<4x16x96xf32> to vector<4x16x8xf32>
    %83 = vector.extract_strided_slice %59 {offsets = [0, 0, 72], sizes = [4, 16, 8], strides = [1, 1, 1]} : vector<4x16x96xf32> to vector<4x16x8xf32>
    %cst_40 = arith.constant dense<0.000000e+00> : vector<4x16x16xf32>
    %84 = tpu.matmul %81, %82, %cst_40 {dimension_numbers = #tpu.dot_dimension_numbers<[2], [2], [1], [1], [0, 0, 0, 1, 1, 1], [0], [0]>} : vector<4x16x8xf32>, vector<4x16x8xf32>, vector<4x16x16xf32> -> vector<4x16x16xf32>
    %85 = arith.addf %84, %39 : vector<4x16x16xf32>
    %cst_41 = arith.constant dense<0xFF800000> : vector<4x16xf32>
    %86 = vector.multi_reduction <maximumf>, %85, %cst_41 [2] : vector<4x16x16xf32> to vector<4x16xf32>
    %87 = vector.shape_cast %86 : vector<4x16xf32> to vector<4x16x1xf32>
    %88 = vector.broadcast %87 : vector<4x16x1xf32> to vector<4x16x16xf32>
    %89 = arith.subf %85, %88 : vector<4x16x16xf32>
    %90 = math.exp %89 : vector<4x16x16xf32>
    %cst_42 = arith.constant dense<0.000000e+00> : vector<4x16xf32>
    %91 = vector.multi_reduction <add>, %90, %cst_42 [2] : vector<4x16x16xf32> to vector<4x16xf32>
    %92 = vector.shape_cast %91 : vector<4x16xf32> to vector<4x16x1xf32>
    %93 = tpu.reciprocal %92 : vector<4x16x1xf32> -> vector<4x16x1xf32>
    %94 = vector.broadcast %93 : vector<4x16x1xf32> to vector<4x16x16xf32>
    %95 = arith.mulf %90, %94 : vector<4x16x16xf32>
    %cst_43 = arith.constant dense<0.000000e+00> : vector<4x16x8xf32>
    %96 = tpu.matmul %95, %83, %cst_43 {dimension_numbers = #tpu.dot_dimension_numbers<[2], [1], [1], [2], [0, 0, 0, 1, 1, 2], [0], [0]>} : vector<4x16x16xf32>, vector<4x16x8xf32>, vector<4x16x8xf32> -> vector<4x16x8xf32>
    %97 = vector.shape_cast %96 : vector<4x16x8xf32> to vector<64x8xf32>
    %98 = vector.extract_strided_slice %61 {offsets = [8, 0], sizes = [8, 32], strides = [1, 1]} : vector<32x32xf32> to vector<8x32xf32>
    %cst_44 = arith.constant dense<0.000000e+00> : vector<64x32xf32>
    %99 = tpu.matmul %97, %98, %cst_44 {dimension_numbers = #tpu.dot_dimension_numbers<[1], [0], [0], [1], [0, 0, 1, 1], [], []>} : vector<64x8xf32>, vector<8x32xf32>, vector<64x32xf32> -> vector<64x32xf32>
    %100 = arith.addf %80, %99 : vector<64x32xf32>
    %101 = vector.extract_strided_slice %59 {offsets = [0, 0, 16], sizes = [4, 16, 8], strides = [1, 1, 1]} : vector<4x16x96xf32> to vector<4x16x8xf32>
    %102 = vector.extract_strided_slice %59 {offsets = [0, 0, 48], sizes = [4, 16, 8], strides = [1, 1, 1]} : vector<4x16x96xf32> to vector<4x16x8xf32>
    %103 = vector.extract_strided_slice %59 {offsets = [0, 0, 80], sizes = [4, 16, 8], strides = [1, 1, 1]} : vector<4x16x96xf32> to vector<4x16x8xf32>
    %cst_45 = arith.constant dense<0.000000e+00> : vector<4x16x16xf32>
    %104 = tpu.matmul %101, %102, %cst_45 {dimension_numbers = #tpu.dot_dimension_numbers<[2], [2], [1], [1], [0, 0, 0, 1, 1, 1], [0], [0]>} : vector<4x16x8xf32>, vector<4x16x8xf32>, vector<4x16x16xf32> -> vector<4x16x16xf32>
    %105 = arith.addf %104, %47 : vector<4x16x16xf32>
    %cst_46 = arith.constant dense<0xFF800000> : vector<4x16xf32>
    %106 = vector.multi_reduction <maximumf>, %105, %cst_46 [2] : vector<4x16x16xf32> to vector<4x16xf32>
    %107 = vector.shape_cast %106 : vector<4x16xf32> to vector<4x16x1xf32>
    %108 = vector.broadcast %107 : vector<4x16x1xf32> to vector<4x16x16xf32>
    %109 = arith.subf %105, %108 : vector<4x16x16xf32>
    %110 = math.exp %109 : vector<4x16x16xf32>
    %cst_47 = arith.constant dense<0.000000e+00> : vector<4x16xf32>
    %111 = vector.multi_reduction <add>, %110, %cst_47 [2] : vector<4x16x16xf32> to vector<4x16xf32>
    %112 = vector.shape_cast %111 : vector<4x16xf32> to vector<4x16x1xf32>
    %113 = tpu.reciprocal %112 : vector<4x16x1xf32> -> vector<4x16x1xf32>
    %114 = vector.broadcast %113 : vector<4x16x1xf32> to vector<4x16x16xf32>
    %115 = arith.mulf %110, %114 : vector<4x16x16xf32>
    %cst_48 = arith.constant dense<0.000000e+00> : vector<4x16x8xf32>
    %116 = tpu.matmul %115, %103, %cst_48 {dimension_numbers = #tpu.dot_dimension_numbers<[2], [1], [1], [2], [0, 0, 0, 1, 1, 2], [0], [0]>} : vector<4x16x16xf32>, vector<4x16x8xf32>, vector<4x16x8xf32> -> vector<4x16x8xf32>
    %117 = vector.shape_cast %116 : vector<4x16x8xf32> to vector<64x8xf32>
    %118 = vector.extract_strided_slice %61 {offsets = [16, 0], sizes = [8, 32], strides = [1, 1]} : vector<32x32xf32> to vector<8x32xf32>
    %cst_49 = arith.constant dense<0.000000e+00> : vector<64x32xf32>
    %119 = tpu.matmul %117, %118, %cst_49 {dimension_numbers = #tpu.dot_dimension_numbers<[1], [0], [0], [1], [0, 0, 1, 1], [], []>} : vector<64x8xf32>, vector<8x32xf32>, vector<64x32xf32> -> vector<64x32xf32>
    %120 = arith.addf %100, %119 : vector<64x32xf32>
    %121 = vector.extract_strided_slice %59 {offsets = [0, 0, 24], sizes = [4, 16, 8], strides = [1, 1, 1]} : vector<4x16x96xf32> to vector<4x16x8xf32>
    %122 = vector.extract_strided_slice %59 {offsets = [0, 0, 56], sizes = [4, 16, 8], strides = [1, 1, 1]} : vector<4x16x96xf32> to vector<4x16x8xf32>
    %123 = vector.extract_strided_slice %59 {offsets = [0, 0, 88], sizes = [4, 16, 8], strides = [1, 1, 1]} : vector<4x16x96xf32> to vector<4x16x8xf32>
    %cst_50 = arith.constant dense<0.000000e+00> : vector<4x16x16xf32>
    %124 = tpu.matmul %121, %122, %cst_50 {dimension_numbers = #tpu.dot_dimension_numbers<[2], [2], [1], [1], [0, 0, 0, 1, 1, 1], [0], [0]>} : vector<4x16x8xf32>, vector<4x16x8xf32>, vector<4x16x16xf32> -> vector<4x16x16xf32>
    %125 = arith.addf %124, %55 : vector<4x16x16xf32>
    %cst_51 = arith.constant dense<0xFF800000> : vector<4x16xf32>
    %126 = vector.multi_reduction <maximumf>, %125, %cst_51 [2] : vector<4x16x16xf32> to vector<4x16xf32>
    %127 = vector.shape_cast %126 : vector<4x16xf32> to vector<4x16x1xf32>
    %128 = vector.broadcast %127 : vector<4x16x1xf32> to vector<4x16x16xf32>
    %129 = arith.subf %125, %128 : vector<4x16x16xf32>
    %130 = math.exp %129 : vector<4x16x16xf32>
    %cst_52 = arith.constant dense<0.000000e+00> : vector<4x16xf32>
    %131 = vector.multi_reduction <add>, %130, %cst_52 [2] : vector<4x16x16xf32> to vector<4x16xf32>
    %132 = vector.shape_cast %131 : vector<4x16xf32> to vector<4x16x1xf32>
    %133 = tpu.reciprocal %132 : vector<4x16x1xf32> -> vector<4x16x1xf32>
    %134 = vector.broadcast %133 : vector<4x16x1xf32> to vector<4x16x16xf32>
    %135 = arith.mulf %130, %134 : vector<4x16x16xf32>
    %cst_53 = arith.constant dense<0.000000e+00> : vector<4x16x8xf32>
    %136 = tpu.matmul %135, %123, %cst_53 {dimension_numbers = #tpu.dot_dimension_numbers<[2], [1], [1], [2], [0, 0, 0, 1, 1, 2], [0], [0]>} : vector<4x16x16xf32>, vector<4x16x8xf32>, vector<4x16x8xf32> -> vector<4x16x8xf32>
    %137 = vector.shape_cast %136 : vector<4x16x8xf32> to vector<64x8xf32>
    %138 = vector.extract_strided_slice %61 {offsets = [24, 0], sizes = [8, 32], strides = [1, 1]} : vector<32x32xf32> to vector<8x32xf32>
    %cst_54 = arith.constant dense<0.000000e+00> : vector<64x32xf32>
    %139 = tpu.matmul %137, %138, %cst_54 {dimension_numbers = #tpu.dot_dimension_numbers<[1], [0], [0], [1], [0, 0, 1, 1], [], []>} : vector<64x8xf32>, vector<8x32xf32>, vector<64x32xf32> -> vector<64x32xf32>
    %140 = arith.addf %120, %139 : vector<64x32xf32>
    %141 = arith.addf %140, %11 : vector<64x32xf32>
    %142 = vector.broadcast %13 : vector<64x1xf32> to vector<64x32xf32>
    %143 = arith.mulf %141, %142 : vector<64x32xf32>
    %c1_55 = arith.constant 1 : index
    %c0_56 = arith.constant 0 : index
    %c0_57 = arith.constant 0 : index
    %144 = vector.load %arg11[%c1_55, %c0_56, %c0_57] : memref<2x32x96xf32, #tpu.memory_space<vmem>>, vector<1x32x96xf32>
    %145 = vector.shape_cast %144 : vector<1x32x96xf32> to vector<32x96xf32>
    %cst_58 = arith.constant dense<0.000000e+00> : vector<64x96xf32>
    %146 = tpu.matmul %143, %145, %cst_58 {dimension_numbers = #tpu.dot_dimension_numbers<[1], [0], [0], [1], [0, 0, 1, 1], [], []>} : vector<64x32xf32>, vector<32x96xf32>, vector<64x96xf32> -> vector<64x96xf32>
    %147 = vector.shape_cast %146 : vector<64x96xf32> to vector<4x16x96xf32>
    %c1_59 = arith.constant 1 : index
    %c0_60 = arith.constant 0 : index
    %c0_61 = arith.constant 0 : index
    %148 = vector.load %arg12[%c1_59, %c0_60, %c0_61] : memref<2x32x32xf32, #tpu.memory_space<vmem>>, vector<1x32x32xf32>
    %149 = vector.shape_cast %148 : vector<1x32x32xf32> to vector<32x32xf32>
    %150 = vector.extract_strided_slice %147 {offsets = [0, 0, 0], sizes = [4, 16, 8], strides = [1, 1, 1]} : vector<4x16x96xf32> to vector<4x16x8xf32>
    %151 = vector.extract_strided_slice %147 {offsets = [0, 0, 32], sizes = [4, 16, 8], strides = [1, 1, 1]} : vector<4x16x96xf32> to vector<4x16x8xf32>
    %152 = vector.extract_strided_slice %147 {offsets = [0, 0, 64], sizes = [4, 16, 8], strides = [1, 1, 1]} : vector<4x16x96xf32> to vector<4x16x8xf32>
    %cst_62 = arith.constant dense<0.000000e+00> : vector<4x16x16xf32>
    %153 = tpu.matmul %150, %151, %cst_62 {dimension_numbers = #tpu.dot_dimension_numbers<[2], [2], [1], [1], [0, 0, 0, 1, 1, 1], [0], [0]>} : vector<4x16x8xf32>, vector<4x16x8xf32>, vector<4x16x16xf32> -> vector<4x16x16xf32>
    %154 = arith.addf %153, %31 : vector<4x16x16xf32>
    %cst_63 = arith.constant dense<0xFF800000> : vector<4x16xf32>
    %155 = vector.multi_reduction <maximumf>, %154, %cst_63 [2] : vector<4x16x16xf32> to vector<4x16xf32>
    %156 = vector.shape_cast %155 : vector<4x16xf32> to vector<4x16x1xf32>
    %157 = vector.broadcast %156 : vector<4x16x1xf32> to vector<4x16x16xf32>
    %158 = arith.subf %154, %157 : vector<4x16x16xf32>
    %159 = math.exp %158 : vector<4x16x16xf32>
    %cst_64 = arith.constant dense<0.000000e+00> : vector<4x16xf32>
    %160 = vector.multi_reduction <add>, %159, %cst_64 [2] : vector<4x16x16xf32> to vector<4x16xf32>
    %161 = vector.shape_cast %160 : vector<4x16xf32> to vector<4x16x1xf32>
    %162 = tpu.reciprocal %161 : vector<4x16x1xf32> -> vector<4x16x1xf32>
    %163 = vector.broadcast %162 : vector<4x16x1xf32> to vector<4x16x16xf32>
    %164 = arith.mulf %159, %163 : vector<4x16x16xf32>
    %cst_65 = arith.constant dense<0.000000e+00> : vector<4x16x8xf32>
    %165 = tpu.matmul %164, %152, %cst_65 {dimension_numbers = #tpu.dot_dimension_numbers<[2], [1], [1], [2], [0, 0, 0, 1, 1, 2], [0], [0]>} : vector<4x16x16xf32>, vector<4x16x8xf32>, vector<4x16x8xf32> -> vector<4x16x8xf32>
    %166 = vector.shape_cast %165 : vector<4x16x8xf32> to vector<64x8xf32>
    %167 = vector.extract_strided_slice %149 {offsets = [0, 0], sizes = [8, 32], strides = [1, 1]} : vector<32x32xf32> to vector<8x32xf32>
    %cst_66 = arith.constant dense<0.000000e+00> : vector<64x32xf32>
    %168 = tpu.matmul %166, %167, %cst_66 {dimension_numbers = #tpu.dot_dimension_numbers<[1], [0], [0], [1], [0, 0, 1, 1], [], []>} : vector<64x8xf32>, vector<8x32xf32>, vector<64x32xf32> -> vector<64x32xf32>
    %169 = vector.extract_strided_slice %147 {offsets = [0, 0, 8], sizes = [4, 16, 8], strides = [1, 1, 1]} : vector<4x16x96xf32> to vector<4x16x8xf32>
    %170 = vector.extract_strided_slice %147 {offsets = [0, 0, 40], sizes = [4, 16, 8], strides = [1, 1, 1]} : vector<4x16x96xf32> to vector<4x16x8xf32>
    %171 = vector.extract_strided_slice %147 {offsets = [0, 0, 72], sizes = [4, 16, 8], strides = [1, 1, 1]} : vector<4x16x96xf32> to vector<4x16x8xf32>
    %cst_67 = arith.constant dense<0.000000e+00> : vector<4x16x16xf32>
    %172 = tpu.matmul %169, %170, %cst_67 {dimension_numbers = #tpu.dot_dimension_numbers<[2], [2], [1], [1], [0, 0, 0, 1, 1, 1], [0], [0]>} : vector<4x16x8xf32>, vector<4x16x8xf32>, vector<4x16x16xf32> -> vector<4x16x16xf32>
    %173 = arith.addf %172, %39 : vector<4x16x16xf32>
    %cst_68 = arith.constant dense<0xFF800000> : vector<4x16xf32>
    %174 = vector.multi_reduction <maximumf>, %173, %cst_68 [2] : vector<4x16x16xf32> to vector<4x16xf32>
    %175 = vector.shape_cast %174 : vector<4x16xf32> to vector<4x16x1xf32>
    %176 = vector.broadcast %175 : vector<4x16x1xf32> to vector<4x16x16xf32>
    %177 = arith.subf %173, %176 : vector<4x16x16xf32>
    %178 = math.exp %177 : vector<4x16x16xf32>
    %cst_69 = arith.constant dense<0.000000e+00> : vector<4x16xf32>
    %179 = vector.multi_reduction <add>, %178, %cst_69 [2] : vector<4x16x16xf32> to vector<4x16xf32>
    %180 = vector.shape_cast %179 : vector<4x16xf32> to vector<4x16x1xf32>
    %181 = tpu.reciprocal %180 : vector<4x16x1xf32> -> vector<4x16x1xf32>
    %182 = vector.broadcast %181 : vector<4x16x1xf32> to vector<4x16x16xf32>
    %183 = arith.mulf %178, %182 : vector<4x16x16xf32>
    %cst_70 = arith.constant dense<0.000000e+00> : vector<4x16x8xf32>
    %184 = tpu.matmul %183, %171, %cst_70 {dimension_numbers = #tpu.dot_dimension_numbers<[2], [1], [1], [2], [0, 0, 0, 1, 1, 2], [0], [0]>} : vector<4x16x16xf32>, vector<4x16x8xf32>, vector<4x16x8xf32> -> vector<4x16x8xf32>
    %185 = vector.shape_cast %184 : vector<4x16x8xf32> to vector<64x8xf32>
    %186 = vector.extract_strided_slice %149 {offsets = [8, 0], sizes = [8, 32], strides = [1, 1]} : vector<32x32xf32> to vector<8x32xf32>
    %cst_71 = arith.constant dense<0.000000e+00> : vector<64x32xf32>
    %187 = tpu.matmul %185, %186, %cst_71 {dimension_numbers = #tpu.dot_dimension_numbers<[1], [0], [0], [1], [0, 0, 1, 1], [], []>} : vector<64x8xf32>, vector<8x32xf32>, vector<64x32xf32> -> vector<64x32xf32>
    %188 = arith.addf %168, %187 : vector<64x32xf32>
    %189 = vector.extract_strided_slice %147 {offsets = [0, 0, 16], sizes = [4, 16, 8], strides = [1, 1, 1]} : vector<4x16x96xf32> to vector<4x16x8xf32>
    %190 = vector.extract_strided_slice %147 {offsets = [0, 0, 48], sizes = [4, 16, 8], strides = [1, 1, 1]} : vector<4x16x96xf32> to vector<4x16x8xf32>
    %191 = vector.extract_strided_slice %147 {offsets = [0, 0, 80], sizes = [4, 16, 8], strides = [1, 1, 1]} : vector<4x16x96xf32> to vector<4x16x8xf32>
    %cst_72 = arith.constant dense<0.000000e+00> : vector<4x16x16xf32>
    %192 = tpu.matmul %189, %190, %cst_72 {dimension_numbers = #tpu.dot_dimension_numbers<[2], [2], [1], [1], [0, 0, 0, 1, 1, 1], [0], [0]>} : vector<4x16x8xf32>, vector<4x16x8xf32>, vector<4x16x16xf32> -> vector<4x16x16xf32>
    %193 = arith.addf %192, %47 : vector<4x16x16xf32>
    %cst_73 = arith.constant dense<0xFF800000> : vector<4x16xf32>
    %194 = vector.multi_reduction <maximumf>, %193, %cst_73 [2] : vector<4x16x16xf32> to vector<4x16xf32>
    %195 = vector.shape_cast %194 : vector<4x16xf32> to vector<4x16x1xf32>
    %196 = vector.broadcast %195 : vector<4x16x1xf32> to vector<4x16x16xf32>
    %197 = arith.subf %193, %196 : vector<4x16x16xf32>
    %198 = math.exp %197 : vector<4x16x16xf32>
    %cst_74 = arith.constant dense<0.000000e+00> : vector<4x16xf32>
    %199 = vector.multi_reduction <add>, %198, %cst_74 [2] : vector<4x16x16xf32> to vector<4x16xf32>
    %200 = vector.shape_cast %199 : vector<4x16xf32> to vector<4x16x1xf32>
    %201 = tpu.reciprocal %200 : vector<4x16x1xf32> -> vector<4x16x1xf32>
    %202 = vector.broadcast %201 : vector<4x16x1xf32> to vector<4x16x16xf32>
    %203 = arith.mulf %198, %202 : vector<4x16x16xf32>
    %cst_75 = arith.constant dense<0.000000e+00> : vector<4x16x8xf32>
    %204 = tpu.matmul %203, %191, %cst_75 {dimension_numbers = #tpu.dot_dimension_numbers<[2], [1], [1], [2], [0, 0, 0, 1, 1, 2], [0], [0]>} : vector<4x16x16xf32>, vector<4x16x8xf32>, vector<4x16x8xf32> -> vector<4x16x8xf32>
    %205 = vector.shape_cast %204 : vector<4x16x8xf32> to vector<64x8xf32>
    %206 = vector.extract_strided_slice %149 {offsets = [16, 0], sizes = [8, 32], strides = [1, 1]} : vector<32x32xf32> to vector<8x32xf32>
    %cst_76 = arith.constant dense<0.000000e+00> : vector<64x32xf32>
    %207 = tpu.matmul %205, %206, %cst_76 {dimension_numbers = #tpu.dot_dimension_numbers<[1], [0], [0], [1], [0, 0, 1, 1], [], []>} : vector<64x8xf32>, vector<8x32xf32>, vector<64x32xf32> -> vector<64x32xf32>
    %208 = arith.addf %188, %207 : vector<64x32xf32>
    %209 = vector.extract_strided_slice %147 {offsets = [0, 0, 24], sizes = [4, 16, 8], strides = [1, 1, 1]} : vector<4x16x96xf32> to vector<4x16x8xf32>
    %210 = vector.extract_strided_slice %147 {offsets = [0, 0, 56], sizes = [4, 16, 8], strides = [1, 1, 1]} : vector<4x16x96xf32> to vector<4x16x8xf32>
    %211 = vector.extract_strided_slice %147 {offsets = [0, 0, 88], sizes = [4, 16, 8], strides = [1, 1, 1]} : vector<4x16x96xf32> to vector<4x16x8xf32>
    %cst_77 = arith.constant dense<0.000000e+00> : vector<4x16x16xf32>
    %212 = tpu.matmul %209, %210, %cst_77 {dimension_numbers = #tpu.dot_dimension_numbers<[2], [2], [1], [1], [0, 0, 0, 1, 1, 1], [0], [0]>} : vector<4x16x8xf32>, vector<4x16x8xf32>, vector<4x16x16xf32> -> vector<4x16x16xf32>
    %213 = arith.addf %212, %55 : vector<4x16x16xf32>
    %cst_78 = arith.constant dense<0xFF800000> : vector<4x16xf32>
    %214 = vector.multi_reduction <maximumf>, %213, %cst_78 [2] : vector<4x16x16xf32> to vector<4x16xf32>
    %215 = vector.shape_cast %214 : vector<4x16xf32> to vector<4x16x1xf32>
    %216 = vector.broadcast %215 : vector<4x16x1xf32> to vector<4x16x16xf32>
    %217 = arith.subf %213, %216 : vector<4x16x16xf32>
    %218 = math.exp %217 : vector<4x16x16xf32>
    %cst_79 = arith.constant dense<0.000000e+00> : vector<4x16xf32>
    %219 = vector.multi_reduction <add>, %218, %cst_79 [2] : vector<4x16x16xf32> to vector<4x16xf32>
    %220 = vector.shape_cast %219 : vector<4x16xf32> to vector<4x16x1xf32>
    %221 = tpu.reciprocal %220 : vector<4x16x1xf32> -> vector<4x16x1xf32>
    %222 = vector.broadcast %221 : vector<4x16x1xf32> to vector<4x16x16xf32>
    %223 = arith.mulf %218, %222 : vector<4x16x16xf32>
    %cst_80 = arith.constant dense<0.000000e+00> : vector<4x16x8xf32>
    %224 = tpu.matmul %223, %211, %cst_80 {dimension_numbers = #tpu.dot_dimension_numbers<[2], [1], [1], [2], [0, 0, 0, 1, 1, 2], [0], [0]>} : vector<4x16x16xf32>, vector<4x16x8xf32>, vector<4x16x8xf32> -> vector<4x16x8xf32>
    %225 = vector.shape_cast %224 : vector<4x16x8xf32> to vector<64x8xf32>
    %226 = vector.extract_strided_slice %149 {offsets = [24, 0], sizes = [8, 32], strides = [1, 1]} : vector<32x32xf32> to vector<8x32xf32>
    %cst_81 = arith.constant dense<0.000000e+00> : vector<64x32xf32>
    %227 = tpu.matmul %225, %226, %cst_81 {dimension_numbers = #tpu.dot_dimension_numbers<[1], [0], [0], [1], [0, 0, 1, 1], [], []>} : vector<64x8xf32>, vector<8x32xf32>, vector<64x32xf32> -> vector<64x32xf32>
    %228 = arith.addf %208, %227 : vector<64x32xf32>
    %229 = arith.addf %228, %143 : vector<64x32xf32>
    %230 = vector.broadcast %13 : vector<64x1xf32> to vector<64x32xf32>
    %231 = arith.mulf %229, %230 : vector<64x32xf32>
    %c0_82 = arith.constant 0 : index
    %c0_83 = arith.constant 0 : index
    %c0_84 = arith.constant 0 : index
    %232 = vector.load %arg6[%c0_82, %c0_83, %c0_84] : memref<4x1x16xf32, #tpu.memory_space<vmem>>, vector<4x1x16xf32>
    %233 = vector.shape_cast %232 : vector<4x1x16xf32> to vector<4x16xf32>
    %c0_85 = arith.constant 0 : index
    %c0_86 = arith.constant 0 : index
    %234 = vector.load %arg17[%c0_85, %c0_86] : memref<16x48xf32, #tpu.memory_space<vmem>>, vector<16x48xf32>
    %cst_87 = arith.constant dense<0.000000e+00> : vector<4x48xf32>
    %235 = tpu.matmul %233, %234, %cst_87 {dimension_numbers = #tpu.dot_dimension_numbers<[1], [0], [0], [1], [0, 0, 1, 1], [], []>} : vector<4x16xf32>, vector<16x48xf32>, vector<4x48xf32> -> vector<4x48xf32>
    %c0_88 = arith.constant 0 : index
    %c0_89 = arith.constant 0 : index
    %236 = vector.load %arg18[%c0_88, %c0_89] : memref<1x48xf32, #tpu.memory_space<vmem>>, vector<1x48xf32>
    %237 = vector.broadcast %236 : vector<1x48xf32> to vector<4x48xf32>
    %238 = arith.addf %235, %237 : vector<4x48xf32>
    %c0_90 = arith.constant 0 : index
    %c0_91 = arith.constant 0 : index
    %239 = vector.load %arg15[%c0_90, %c0_91] : memref<192x48xf32, #tpu.memory_space<vmem>>, vector<192x48xf32>
    %cst_92 = arith.constant dense<0.000000e+00> : vector<4x192xf32>
    %240 = tpu.matmul %238, %239, %cst_92 {dimension_numbers = #tpu.dot_dimension_numbers<[1], [1], [0], [0], [0, 0, 1, 0], [], []>} : vector<4x48xf32>, vector<192x48xf32>, vector<4x192xf32> -> vector<4x192xf32>
    %c0_93 = arith.constant 0 : index
    %c0_94 = arith.constant 0 : index
    %241 = vector.load %arg13[%c0_93, %c0_94] : memref<32x192xf32, #tpu.memory_space<vmem>>, vector<32x192xf32>
    %cst_95 = arith.constant dense<0.000000e+00> : vector<4x32xf32>
    %242 = tpu.matmul %240, %241, %cst_95 {dimension_numbers = #tpu.dot_dimension_numbers<[1], [1], [0], [0], [0, 0, 1, 0], [], []>} : vector<4x192xf32>, vector<32x192xf32>, vector<4x32xf32> -> vector<4x32xf32>
    %c0_96 = arith.constant 0 : index
    %c0_97 = arith.constant 0 : index
    %243 = vector.load %arg14[%c0_96, %c0_97] : memref<1x192xf32, #tpu.memory_space<vmem>>, vector<1x192xf32>
    %cst_98 = arith.constant dense<0.000000e+00> : vector<4x1xf32>
    %244 = tpu.matmul %240, %243, %cst_98 {dimension_numbers = #tpu.dot_dimension_numbers<[1], [1], [0], [0], [0, 0, 1, 0], [], []>} : vector<4x192xf32>, vector<1x192xf32>, vector<4x1xf32> -> vector<4x1xf32>
    %c0_99 = arith.constant 0 : index
    %c0_100 = arith.constant 0 : index
    %245 = vector.load %arg16[%c0_99, %c0_100] : memref<1x48xf32, #tpu.memory_space<vmem>>, vector<1x48xf32>
    %cst_101 = arith.constant dense<0.000000e+00> : vector<4x1xf32>
    %246 = tpu.matmul %238, %245, %cst_101 {dimension_numbers = #tpu.dot_dimension_numbers<[1], [1], [0], [0], [0, 0, 1, 0], [], []>} : vector<4x48xf32>, vector<1x48xf32>, vector<4x1xf32> -> vector<4x1xf32>
    %247 = arith.addf %244, %246 : vector<4x1xf32>
    %248 = vector.shape_cast %231 : vector<64x32xf32> to vector<4x16x32xf32>
    %249 = vector.shape_cast %242 : vector<4x32xf32> to vector<4x1x32xf32>
    %cst_102 = arith.constant dense<0.000000e+00> : vector<4x1x16xf32>
    %250 = tpu.matmul %249, %248, %cst_102 {dimension_numbers = #tpu.dot_dimension_numbers<[2], [2], [1], [1], [0, 0, 0, 1, 1, 1], [0], [0]>} : vector<4x1x32xf32>, vector<4x16x32xf32>, vector<4x1x16xf32> -> vector<4x1x16xf32>
    %251 = vector.shape_cast %250 : vector<4x1x16xf32> to vector<4x16xf32>
    %252 = vector.broadcast %247 : vector<4x1xf32> to vector<4x16xf32>
    %253 = arith.addf %251, %252 : vector<4x16xf32>
    %cst_103 = arith.constant 0.000000e+00 : f32
    %254 = vector.broadcast %cst_103 : f32 to vector<4x16xf32>
    %255 = arith.maximumf %253, %254 : vector<4x16xf32>
    %c0_104 = arith.constant 0 : index
    %c0_105 = arith.constant 0 : index
    %c0_106 = arith.constant 0 : index
    %256 = vector.load %arg19[%c0_104, %c0_105, %c0_106] : memref<1x4x16xf32, #tpu.memory_space<vmem>>, vector<1x4x16xf32>
    %257 = vector.shape_cast %256 : vector<1x4x16xf32> to vector<4x16xf32>
    %258 = vector.shape_cast %255 : vector<4x16xf32> to vector<1x4x16xf32>
    tpu.vector_store %arg19[%c0_104, %c0_105, %c0_106], %258 {strides = array<i32>} : memref<1x4x16xf32, #tpu.memory_space<vmem>>, vector<1x4x16xf32>,
    return
  }
  func.func @transform_0(%arg0: i32, %arg1: memref<4xf32, #tpu.memory_space<smem>>) -> (i32, i32, i32) {
    %c0_i32 = arith.constant 0 : i32
    %c0_i32_0 = arith.constant 0 : i32
    %c0_i32_1 = arith.constant 0 : i32
    return %arg0, %c0_i32, %c0_i32_0 : i32, i32, i32
  }
  func.func @transform_1(%arg0: i32, %arg1: memref<4xf32, #tpu.memory_space<smem>>) -> (i32, i32, i32) {
    %c0_i32 = arith.constant 0 : i32
    %c0_i32_0 = arith.constant 0 : i32
    %c0_i32_1 = arith.constant 0 : i32
    return %arg0, %c0_i32, %c0_i32_0 : i32, i32, i32
  }
  func.func @transform_2(%arg0: i32, %arg1: memref<4xf32, #tpu.memory_space<smem>>) -> (i32, i32, i32) {
    %c0_i32 = arith.constant 0 : i32
    %c0_i32_0 = arith.constant 0 : i32
    %c0_i32_1 = arith.constant 0 : i32
    return %arg0, %c0_i32, %c0_i32_0 : i32, i32, i32
  }
  func.func @transform_3(%arg0: i32, %arg1: memref<4xf32, #tpu.memory_space<smem>>) -> (i32, i32, i32) {
    %c0_i32 = arith.constant 0 : i32
    %c0_i32_0 = arith.constant 0 : i32
    %c0_i32_1 = arith.constant 0 : i32
    return %arg0, %c0_i32, %c0_i32_0 : i32, i32, i32
  }
  func.func @transform_4(%arg0: i32, %arg1: memref<4xf32, #tpu.memory_space<smem>>) -> (i32, i32, i32) {
    %c0_i32 = arith.constant 0 : i32
    %c0_i32_0 = arith.constant 0 : i32
    %c0_i32_1 = arith.constant 0 : i32
    return %arg0, %c0_i32, %c0_i32_0 : i32, i32, i32
  }
  func.func @transform_5(%arg0: i32, %arg1: memref<4xf32, #tpu.memory_space<smem>>) -> (i32, i32) {
    %c0_i32 = arith.constant 0 : i32
    %c0_i32_0 = arith.constant 0 : i32
    %c0_i32_1 = arith.constant 0 : i32
    return %c0_i32, %c0_i32_0 : i32, i32
  }
  func.func @transform_6(%arg0: i32, %arg1: memref<4xf32, #tpu.memory_space<smem>>) -> (i32, i32) {
    %c0_i32 = arith.constant 0 : i32
    %c0_i32_0 = arith.constant 0 : i32
    %c0_i32_1 = arith.constant 0 : i32
    return %c0_i32, %c0_i32_0 : i32, i32
  }
  func.func @transform_7(%arg0: i32, %arg1: memref<4xf32, #tpu.memory_space<smem>>) -> (i32, i32) {
    %c0_i32 = arith.constant 0 : i32
    %c0_i32_0 = arith.constant 0 : i32
    %c0_i32_1 = arith.constant 0 : i32
    return %c0_i32, %c0_i32_0 : i32, i32
  }
  func.func @transform_8(%arg0: i32, %arg1: memref<4xf32, #tpu.memory_space<smem>>) -> (i32, i32) {
    %c0_i32 = arith.constant 0 : i32
    %c0_i32_0 = arith.constant 0 : i32
    %c0_i32_1 = arith.constant 0 : i32
    return %c0_i32, %c0_i32_0 : i32, i32
  }
  func.func @transform_9(%arg0: i32, %arg1: memref<4xf32, #tpu.memory_space<smem>>) -> (i32, i32, i32) {
    %c0_i32 = arith.constant 0 : i32
    %c0_i32_0 = arith.constant 0 : i32
    %c0_i32_1 = arith.constant 0 : i32
    %c0_i32_2 = arith.constant 0 : i32
    return %c0_i32, %c0_i32_0, %c0_i32_1 : i32, i32, i32
  }
  func.func @transform_10(%arg0: i32, %arg1: memref<4xf32, #tpu.memory_space<smem>>) -> (i32, i32, i32) {
    %c0_i32 = arith.constant 0 : i32
    %c0_i32_0 = arith.constant 0 : i32
    %c0_i32_1 = arith.constant 0 : i32
    %c0_i32_2 = arith.constant 0 : i32
    return %c0_i32, %c0_i32_0, %c0_i32_1 : i32, i32, i32
  }
  func.func @transform_11(%arg0: i32, %arg1: memref<4xf32, #tpu.memory_space<smem>>) -> (i32, i32) {
    %c0_i32 = arith.constant 0 : i32
    %c0_i32_0 = arith.constant 0 : i32
    %c0_i32_1 = arith.constant 0 : i32
    return %c0_i32, %c0_i32_0 : i32, i32
  }
  func.func @transform_12(%arg0: i32, %arg1: memref<4xf32, #tpu.memory_space<smem>>) -> (i32, i32) {
    %c0_i32 = arith.constant 0 : i32
    %c0_i32_0 = arith.constant 0 : i32
    %c0_i32_1 = arith.constant 0 : i32
    return %c0_i32, %c0_i32_0 : i32, i32
  }
  func.func @transform_13(%arg0: i32, %arg1: memref<4xf32, #tpu.memory_space<smem>>) -> (i32, i32) {
    %c0_i32 = arith.constant 0 : i32
    %c0_i32_0 = arith.constant 0 : i32
    %c0_i32_1 = arith.constant 0 : i32
    return %c0_i32, %c0_i32_0 : i32, i32
  }
  func.func @transform_14(%arg0: i32, %arg1: memref<4xf32, #tpu.memory_space<smem>>) -> (i32, i32) {
    %c0_i32 = arith.constant 0 : i32
    %c0_i32_0 = arith.constant 0 : i32
    %c0_i32_1 = arith.constant 0 : i32
    return %c0_i32, %c0_i32_0 : i32, i32
  }
  func.func @transform_15(%arg0: i32, %arg1: memref<4xf32, #tpu.memory_space<smem>>) -> (i32, i32) {
    %c0_i32 = arith.constant 0 : i32
    %c0_i32_0 = arith.constant 0 : i32
    %c0_i32_1 = arith.constant 0 : i32
    return %c0_i32, %c0_i32_0 : i32, i32
  }
  func.func @transform_16(%arg0: i32, %arg1: memref<4xf32, #tpu.memory_space<smem>>) -> (i32, i32) {
    %c0_i32 = arith.constant 0 : i32
    %c0_i32_0 = arith.constant 0 : i32
    %c0_i32_1 = arith.constant 0 : i32
    return %c0_i32, %c0_i32_0 : i32, i32
  }
  func.func @transform_17(%arg0: i32, %arg1: memref<4xf32, #tpu.memory_space<smem>>) -> (i32, i32, i32) {
    %c0_i32 = arith.constant 0 : i32
    %c0_i32_0 = arith.constant 0 : i32
    %c0_i32_1 = arith.constant 0 : i32
    return %arg0, %c0_i32, %c0_i32_0 : i32, i32, i32
  }
}

</mosaic_0001>

<bundles_post_ra>
// kernel: tpu_custom_call.1
= control target key start
LH: loop header
LB: loop body
LE: loop exit
PB: predicated region body
PF: predicated region fallthrough
CT: control target
= control target key end

     0   :  { %s7103_s30 = smov [#allocation3]   ;;  %s9676_s0 = inlined_call_operand.vmem [shape: f32[4], index: 0, kind: input, shape index: {}]   ;;  %s9677_s1 = inlined_call_operand.vmem [shape: f32[16,16,8], index: 1, kind: input, shape index: {}]   ;;  %s9678_s2 = inlined_call_operand.vmem [shape: f32[16,16,16], index: 2, kind: input, shape index: {}]   ;;  %s9679_s3 = inlined_call_operand.vmem [shape: f32[16,16,1], index: 3, kind: input, shape index: {}]   ;;  %s9680_s4 = inlined_call_operand.vmem [shape: f32[16,1,16], index: 4, kind: input, shape index: {}]   ;;  %s9681_s5 = inlined_call_operand.vmem [shape: f32[16,1,16], index: 5, kind: input, shape index: {}]   ;;  %s9682_s6 = inlined_call_operand.vmem [shape: f32[8,32], index: 6, kind: input, shape index: {}]   ;;  %s9683_s7 = inlined_call_operand.vmem [shape: f32[1,32], index: 7, kind: input, shape index: {}]   ;;  %s9684_s8 = inlined_call_operand.vmem [shape: f32[32,32], index: 8, kind: input, shape index: {}]   ;;  %s9685_s9 = inlined_call_operand.vmem [shape: f32[1,32], index: 9, kind: input, shape index: {}]   ;;  %s9686_s10 = inlined_call_operand.vmem [shape: f32[2,32,96], index: 10, kind: input, shape index: {}]   ;;  %s9687_s11 = inlined_call_operand.vmem [shape: f32[2,32,32], index: 11, kind: input, shape index: {}]   ;;  %s9688_s12 = inlined_call_operand.vmem [shape: f32[32,192], index: 12, kind: input, shape index: {}]   ;;  %s9689_s13 = inlined_call_operand.vmem [shape: f32[1,192], index: 13, kind: input, shape index: {}]   ;;  %s9690_s14 = inlined_call_operand.vmem [shape: f32[192,48], index: 14, kind: input, shape index: {}]   ;;  %s9691_s15 = inlined_call_operand.vmem [shape: f32[1,48], index: 15, kind: input, shape index: {}]   ;;  %s9692_s16 = inlined_call_operand.vmem [shape: f32[16,48], index: 16, kind: input, shape index: {}]   ;;  %s9693_s17 = inlined_call_operand.vmem [shape: f32[1,48], index: 17, kind: input, shape index: {}]   ;;  %s9694_s18 = inlined_call_operand.hbm [shape: f32[4,4,16], index: 18, kind: output, shape index: {}]  }
   0x1   :  { %9770 = sst [smem:[#allocation51_spill]] %s9676_s0 }
   0x2   :  { %9771 = sst [smem:[#allocation52_spill]] %s9677_s1 }
   0x3   :  { %9772 = sst [smem:[#allocation53_spill]] %s9678_s2 }
   0x4   :  { %9773 = sst [smem:[#allocation54_spill]] %s9679_s3 }
   0x5   :  { %9774 = sst [smem:[#allocation55_spill]] %s9681_s5 }
   0x6   :  { %9775 = sst [smem:[#allocation56_spill]] %s9682_s6 }
   0x7   :  { %9776 = sst [smem:[#allocation57_spill]] %s9688_s12 }
   0x8   :  { %s9777_s29 = sld [smem:[#allocation51_spill]] }
   0xe   :  { %s24_s12 = sshll.u32 %s9777_s29, 4  ;;  %s25_s12 = int_to_ptr.vmem [resolvable:$true] %s24_s12 }
   0xf   :  { %27 = dma.vmem_to_smem %s25_s12, 16, %s7103_s30, [#allocation2] }
  0x10   :  { %7081 = dma.done.wait [#allocation2], 16 }
  0x11   :  { %7082 = vsyncadd [#allocation2], 4294967280 }
  0x12   :  { %30 = sfence }
  0x13   :  { %31 = vsyncpa [#allocation5], 0 }
  0x14   :  { %33 = vsyncpa [#allocation5 + $0x1], 0  ;;  %s7215_s0 = smov 0   ;;  %s7217_s19 = smov 0  }
  0x15   :  { %s7219_s1 = smov 0   ;;  %s7221_s20 = smov 0  }
  0x16 LB: > { %s6172_s12 = sadd.s32 4294967295, %s7101_s20   ;;  %s6173_s21 = sadd.s32 4294967294, %s7101_s20   ;;  %s7101_s20 = sphi %s7221_s20, %s9909_s20   ;;  %s7097_s1 = sphi %s7219_s1, %s9908_s1   ;;  %s7093_s19 = sphi %s7217_s19, %s9907_s19   ;;  %s7089_s0 = sphi %s7215_s0, %s9906_s0  }
  0x17   : > { %s7238_s22 = sadd.s32 1, %s7101_s20   ;;  %s428_s2 = sadd.s32 1, %s7097_s1 }
  0x18   : > { %s425_s23 = ssub.s32 %s7101_s20, %s7238_s22  ;;  %p438_p0 = scmp.ne.s32.totalorder %s7097_s1, %s7093_s19 }
  0x19   : > { %p426_p1 = scmp.eq.s32.totalorder %s425_s23, 0  ;;  %p439_p2 = scmp.eq.s32.totalorder %s6172_s12, 3 }
  0x1a   : > { %p444_p3 = scmp.ne.s32.totalorder %s7093_s19, %s7089_s0  ;;  %p445_p4 = scmp.eq.s32.totalorder %s6173_s21, 3 }
  0x1b   : > { %s7248_s24 = scalar_select %p426_p1, %s7097_s1, %s428_s2  }
  0x1c   : > { %p7250_p5 = por %p439_p2, %p438_p0  ;;  %p7254_p6 = por %p445_p4, %p444_p3 }
  0x1d   : > { %9778 = sst [smem:[#allocation8_spill]] %s7248_s24  ;;  %p6176_p7 = scmp.ge.s32.totalorder %s7101_s20, 1 }
  0x1e   : > { %p545_p8 = scmp.lt.s32.totalorder %s7101_s20, 5 }
  0x20   : > { %p546_p9 = pnand %p6176_p7, %p545_p8 }
  0x22   : > { %549 = sbr.rel (%p546_p9) target bundleno = 5673 (0x1629), region = 88 }
  0x27   : > { %s9781_s6 = sld [smem:[#allocation56_spill]]  ;;  %s7263_s29 = sshll.u32 %s6172_s12, 2  ;;  %vm662_vm0 = vcmask 64512   ;;  %v731_v9 = vld [vmem:[%s9684_s8 + $0x18] sm:$0xff]  ;;  %v730_v10 = vld [vmem:[%s9684_s8 + $0x10] sm:$0xff]  ;;  %v729_v15 = vld [vmem:[%s9684_s8 + $0x8] sm:$0xff] }
  0x28   : > { %p619_p10 = scmp.lt.s32.totalorder %s7263_s29, 15  ;;  %s9782_s5 = sld [smem:[#allocation55_spill]]  ;;  %773 = vmatpush.msra.mxu1 %v731_v9  ;;  %v728_v16 = vld [vmem:[%s9684_s8] sm:$0xff]  ;;  %vm736_vm1 = vcmask 261120   ;;  %v977_v26 = vld [vmem:[%s9686_s10 + $0x18] sm:$0xff]  ;;  %v976_v27 = vld [vmem:[%s9686_s10 + $0x10] sm:$0xff] }
  0x29   : > { %s9783_s12 = sld [smem:[#allocation52_spill]]  ;;  %v6757_v17 = vld [vmem:[%s9683_s7] ss:$0 sm:$0xff]  ;;  %1014 = vmatpush.msra.mxu2 %v977_v26  ;;  %v975_v36 = vld [vmem:[%s9686_s10 + $0x8] sm:$0xff]  ;;  %s9696_s2 = smov 96   ;;  %vm1195_vm4 = vcmask 130048  }
  0x2a   : > { %s7267_s30 = scalar_select %p619_p10, %s7263_s29, 15  ;;  %774 = vmatpush.msra.mxu1 %v730_v10  ;;  %v974_v37 = vld [vmem:[%s9686_s10] sm:$0xff]  ;;  %v9698_v10 = vmov -1e+30  }
  0x2b   : > { %1015 = vmatpush.msra.mxu2 %v976_v27  ;;  %v6758_v38 = vld [vmem:[%s9685_s9] ss:$0 sm:$0xff]  ;;  %s9705_s23 = smov 88   ;;  %s9724_s28 = smov 80  }
  0x2c   : > { %s7270_s21 = sshll.u32 %s7267_s30, 4  ;;  %775 = vmatpush.msra.mxu1 %v729_v15  ;;  %s7420_s27 = scalar_lea.vmem %s9680_s4, %s7267_s30 }
  0x2d   : > { %v657_v0 = vld [vmem:[%s9781_s6] sm:$0xff]  ;;  %1016 = vmatpush.msra.mxu2 %v975_v36  ;;  %s9824_s3 = sld [smem:[#allocation54_spill]] }
  0x2e   : > { %702 = vmatpush.msra.mxu0 %v657_v0  ;;  %s647_s24 = scalar_lea.vmem %s9782_s5, %s7267_s30  ;;  %776 = vmatpush.msra.mxu1 %v728_v16 }
  0x2f   : > { %s623_s6 = scalar_lea.vmem %s9783_s12, %s7270_s21  ;;  %v5635_v1 = vld [vmem:[%s647_s24] sm:$0x1]  ;;  %v5636_v2 = vld [vmem:[%s647_s24 + $0x1] sm:$0x1]  ;;  %v5637_v3 = vld [vmem:[%s647_s24 + $0x2] sm:$0x1]  ;;  %1017 = vmatpush.msra.mxu2 %v974_v37 }
  0x30   : > { %v649_v4 = vld [vmem:[%s623_s6] sm:$0xff]  ;;  %5649 = vst [vmem:[#allocation1] ss:$9 sm:$0xff] %v5635_v1  ;;  %v650_v6 = vld [vmem:[%s623_s6 + $0x8] sm:$0xff]  ;;  %v651_v7 = vld [vmem:[%s623_s6 + $0x10] sm:$0xff]  ;;  %s9752_s12 = smov 56  }
  0x31   : > { %v5638_v5 = vld [vmem:[%s647_s24 + $0x3] sm:$0x1]  ;;  %6189 = vmatmul.msk.f32.vlgmr.msra.gmra.mxu0 %vm662_vm0, %v649_v4  ;;  %5651 = vst [vmem:[#allocation1 + $0x1] ss:$9 sm:$0xff] %v5636_v2  ;;  %v652_v8 = vld [vmem:[%s623_s6 + $0x18] sm:$0xff]  ;;  %v654_v12 = vld [vmem:[%s623_s6 + $0x28] sm:$0xff] }
  0x32   : > { %5653 = vst [vmem:[#allocation1 + $0x2] ss:$9 sm:$0xff] %v5637_v3  ;;  %v653_v11 = vld [vmem:[%s623_s6 + $0x20] sm:$0xff]  ;;  %v655_v13 = vld [vmem:[%s623_s6 + $0x30] sm:$0xff]  ;;  %v656_v14 = vld [vmem:[%s623_s6 + $0x38] sm:$0xff]  ;;  %s858_s6 = sld [smem:[#allocation3]] }
  0x33   : > { %5655 = vst [vmem:[#allocation1 + $0x3] ss:$9 sm:$0xff] %v5638_v5  ;;  %s9726_s24 = smov 64  }
  0x38   : > { %s859_s30 = smul.f32 2.0, %s858_s6 }
  0x39   : > { %6190 = vmatmul.msk.f32.gmra.mxu0 %vm662_vm0, %v650_v6 }
  0x3a   : > { %v7439_v15 = vstv %s859_s30  ;;  %s9722_s30 = smov 112  }
  0x41   : > { %6191 = vmatmul.msk.f32.gmra.mxu0 %vm662_vm0, %v651_v7 }
  0x49   : > { %6192 = vmatmul.msk.f32.gmra.mxu0 %vm662_vm0, %v652_v8  ;;  %v820_v8 = vld [vmem:[%s7420_s27 + $0x2] sm:$0x1] }
  0x4a   : > { %vm824_vm2 = vcmp.gt.f32.partialorder %v820_v8, 0.0 }
  0x51   : > { %6193 = vmatmul.msk.f32.gmra.mxu0 %vm662_vm0, %v653_v11  ;;  %v828_v11 = vsel %vm824_vm2, 0.0, %v9698_v10 }
  0x59   : > { %6194 = vmatmul.msk.f32.gmra.mxu0 %vm662_vm0, %v654_v12 }
  0x61   : > { %6195 = vmatmul.msk.f32.gmra.mxu0 %vm662_vm0, %v655_v13 }
  0x69   : > { %6196 = vmatmul.msk.f32.gmra.mxu0 %vm662_vm0, %v656_v14  ;;  %v844_v14 = vperm.slane %v828_v11, 0 }
  0xae   : > { %v704_v18 = vpop.f32.mrf.mxu0 }
  0xaf   : > { %v705_v19 = vadd.f32 %v6757_v17, %v704_v18 }
  0xb1   : > { %6197 = vmatmul.msk.f32.vlgmr.msra.gmra.mxu1 %vm736_vm1, %v705_v19 }
  0xb6   : > { %v707_v20 = vpop.f32.mrf.mxu0 }
  0xb7   : > { %v708_v21 = vadd.f32 %v6757_v17, %v707_v20  ;;  %v821_v20 = vld [vmem:[%s7420_s27 + $0x3] sm:$0x1] }
  0xb8   : > { %vm825_vm3 = vcmp.gt.f32.partialorder %v821_v20, 0.0 }
  0xb9   : > { %6198 = vmatmul.msk.f32.gmra.mxu1 %vm736_vm1, %v708_v21 }
  0xbe   : > { %v710_v22 = vpop.f32.mrf.mxu0 }
  0xbf   : > { %v711_v23 = vadd.f32 %v6757_v17, %v710_v22 }
  0xc1   : > { %6199 = vmatmul.msk.f32.gmra.mxu1 %vm736_vm1, %v711_v23 }
  0xc6   : > { %v713_v24 = vpop.f32.mrf.mxu0 }
  0xc7   : > { %v714_v25 = vadd.f32 %v6757_v17, %v713_v24 }
  0xc9   : > { %6200 = vmatmul.msk.f32.gmra.mxu1 %vm736_vm1, %v714_v25 }
  0xce   : > { %v716_v28 = vpop.f32.mrf.mxu0 }
  0xcf   : > { %v717_v29 = vadd.f32 %v6757_v17, %v716_v28  ;;  %v829_v28 = vsel %vm825_vm3, 0.0, %v9698_v10 }
  0xd1   : > { %6201 = vmatmul.msk.f32.gmra.mxu1 %vm736_vm1, %v717_v29 }
  0xd6   : > { %v719_v30 = vpop.f32.mrf.mxu0 }
  0xd7   : > { %v720_v31 = vadd.f32 %v6757_v17, %v719_v30 }
  0xd9   : > { %6202 = vmatmul.msk.f32.gmra.mxu1 %vm736_vm1, %v720_v31 }
  0xde   : > { %v722_v32 = vpop.f32.mrf.mxu0 }
  0xdf   : > { %v723_v33 = vadd.f32 %v6757_v17, %v722_v32 }
  0xe1   : > { %6203 = vmatmul.msk.f32.gmra.mxu1 %vm736_vm1, %v723_v33  ;;  %v845_v33 = vperm.slane %v829_v28, 0 }
  0xe6   : > { %v725_v34 = vpop.f32.mrf.mxu0 }
  0xe7   : > { %v726_v35 = vadd.f32 %v6757_v17, %v725_v34 }
  0xe9   : > { %6204 = vmatmul.msk.f32.gmra.mxu1 %vm736_vm1, %v726_v35 }
 0x12e   : > { %v778_v39 = vpop.f32.mrf.mxu1 }
 0x12f   : > { %v7326_v40 = vadd.f32 %v6758_v38, %v778_v39 }
 0x131   : > { %9784 = vst [vmem:[#allocation9_spill] sm:$0xff] %v7326_v40  ;;  %6208 = vmatmul.msk.f32.vlgmr.msra.gmra.mxu2 %vm736_vm1, %v7326_v40 }
 0x136   : > { %v781_v41 = vpop.f32.mrf.mxu1 }
 0x137   : > { %v7330_v42 = vadd.f32 %v6758_v38, %v781_v41 }
 0x139   : > { %9785 = vst [vmem:[#allocation10_spill] sm:$0xff] %v7330_v42  ;;  %6209 = vmatmul.msk.f32.gmra.mxu2 %vm736_vm1, %v7330_v42 }
 0x13e   : > { %v784_v43 = vpop.f32.mrf.mxu1 }
 0x13f   : > { %v7334_v44 = vadd.f32 %v6758_v38, %v784_v43 }
 0x141   : > { %9786 = vst [vmem:[#allocation11_spill] sm:$0xff] %v7334_v44  ;;  %6210 = vmatmul.msk.f32.gmra.mxu2 %vm736_vm1, %v7334_v44 }
 0x146   : > { %v787_v45 = vpop.f32.mrf.mxu1 }
 0x147   : > { %v7338_v46 = vadd.f32 %v6758_v38, %v787_v45 }
 0x149   : > { %9787 = vst [vmem:[#allocation12_spill] sm:$0xff] %v7338_v46  ;;  %6211 = vmatmul.msk.f32.gmra.mxu2 %vm736_vm1, %v7338_v46 }
 0x14e   : > { %v790_v47 = vpop.f32.mrf.mxu1 }
 0x14f   : > { %v7342_v48 = vadd.f32 %v6758_v38, %v790_v47 }
 0x151   : > { %9788 = vst [vmem:[#allocation13_spill] sm:$0xff] %v7342_v48  ;;  %6212 = vmatmul.msk.f32.gmra.mxu2 %vm736_vm1, %v7342_v48 }
 0x156   : > { %v793_v49 = vpop.f32.mrf.mxu1 }
 0x157   : > { %v7346_v50 = vadd.f32 %v6758_v38, %v793_v49 }
 0x159   : > { %9789 = vst [vmem:[#allocation14_spill] sm:$0xff] %v7346_v50  ;;  %6213 = vmatmul.msk.f32.gmra.mxu2 %vm736_vm1, %v7346_v50 }
 0x15e   : > { %v796_v51 = vpop.f32.mrf.mxu1 }
 0x15f   : > { %v7350_v52 = vadd.f32 %v6758_v38, %v796_v51 }
 0x161   : > { %9790 = vst [vmem:[#allocation15_spill] sm:$0xff] %v7350_v52  ;;  %6214 = vmatmul.msk.f32.gmra.mxu2 %vm736_vm1, %v7350_v52 }
 0x166   : > { %v799_v53 = vpop.f32.mrf.mxu1 }
 0x167   : > { %v7354_v54 = vadd.f32 %v6758_v38, %v799_v53 }
 0x169   : > { %9791 = vst [vmem:[#allocation16_spill] sm:$0xff] %v7354_v54  ;;  %6215 = vmatmul.msk.f32.gmra.mxu2 %vm736_vm1, %v7354_v54 }
 0x1b4   : > { %v7358_v55 = vpop.f32.mrf.mxu2 }
 0x1bc   : > { %v7360_v56 = vpop.f32.mrf.mxu2 }
 0x1bd   : > { %1051 = vrot.lane.b32.xlu0 %v7360_v56, %s9696_s2 }
 0x1c4   : > { %v7364_v57 = vpop.f32.mrf.mxu2 }
 0x1c5   : > { %1049 = vrot.lane.b32.xlu0 %v7358_v55, %s9696_s2 }
 0x1cc   : > { %v7368_v58 = vpop.f32.mrf.mxu2 }
 0x1cd   : > { %1088 = vrot.lane.b32.xlu1 %v7368_v58, %s9696_s2 }
 0x1d4   : > { %v7372_v59 = vpop.f32.mrf.mxu2 }
 0x1d5   : > { %1086 = vrot.lane.b32.xlu1 %v7364_v57, %s9696_s2 }
 0x1dc   : > { %v7376_v60 = vpop.f32.mrf.mxu2 }
 0x1dd   : > { %1125 = vrot.lane.b32.xlu2 %v7376_v60, %s9696_s2 }
 0x1e4   : > { %v7380_v61 = vpop.f32.mrf.mxu2 }
 0x1e5   : > { %1123 = vrot.lane.b32.xlu2 %v7372_v59, %s9696_s2  ;;  %1160 = vrot.lane.b32.xlu1 %v7380_v61, %s9696_s2 }
 0x1ec   : > { %v7386_v62 = vpop.f32.mrf.mxu2 }
 0x1ed   : > { %1162 = vrot.lane.b32.xlu0 %v7386_v62, %s9696_s2  ;;  %s9792_s2 = sld [smem:[#allocation53_spill]]  ;;  %v7493_v53 = vpack.i.bf16 %v7380_v61, %v7386_v62 }
 0x1f3   : > { %s7429_s5 = scalar_lea.vmem %s9792_s2, %s7270_s21  ;;  %s877_s2 = smul.f32 %s858_s6, %s858_s6 }
 0x1f4   : > { %v7432_v9 = vld [vmem:[%s7429_s5 + $0x20] sm:$0xff]  ;;  %v7446_v18 = vld [vmem:[%s7429_s5 + $0x28] sm:$0xff]  ;;  %v7464_v27 = vld [vmem:[%s7429_s5 + $0x30] sm:$0xff]  ;;  %s9703_s6 = smov 120  }
 0x1f5   : > { %v834_v13 = vmul.f32 %v7432_v9, %v7432_v9  ;;  %v865_v17 = vmul.f32 %v7439_v15, %v7432_v9  ;;  %v835_v22 = vmul.f32 %v7446_v18, %v7446_v18  ;;  %v7454_v23 = vstv %s877_s2  ;;  %s6205_s2 = sld [smem:[#allocation3 + $0x1]] }
 0x1f6   : > { %v866_v26 = vmul.f32 %v7439_v15, %v7446_v18  ;;  %v836_v32 = vmul.f32 %v7464_v27, %v7464_v27  ;;  %v867_v37 = vmul.f32 %v7439_v15, %v7464_v27 }
 0x1f7   : > { %v7441_v16 = vsub.f32 %v844_v14, %v834_v13  ;;  %v7459_v25 = vsub.f32 %v844_v14, %v835_v22  ;;  %v819_v13 = vld [vmem:[%s7420_s27 + $0x1] sm:$0x1]  ;;  %v7531_v14 = vld [vmem:[%s7429_s5 + $0x10] sm:$0xff] }
 0x1f8   : > { %v7475_v36 = vsub.f32 %v845_v33, %v836_v32  ;;  %vm823_vm5 = vcmp.gt.f32.partialorder %v819_v13, 0.0  ;;  %v832_v20 = vmul.f32 %v7531_v14, %v7531_v14 }
 0x1f9   : > { %v873_v21 = vadd.f32 %v865_v17, %v7441_v16  ;;  %v874_v31 = vadd.f32 %v866_v26, %v7459_v25  ;;  %v827_v17 = vsel %vm823_vm5, 0.0, %v9698_v10  ;;  %v863_v26 = vmul.f32 %v7439_v15, %v7531_v14 }
 0x1fa   : > { %v875_v41 = vadd.f32 %v867_v37, %v7475_v36 }
 0x1fb   : > { %v7457_v24 = vsub.f32 %v873_v21, %v7454_v23  ;;  %v7473_v35 = vsub.f32 %v874_v31, %v7454_v23  ;;  %v843_v21 = vperm.slane %v827_v17, 0 }
 0x1fc   : > { %v7483_v45 = vsub.f32 %v875_v41, %v7454_v23 }
 0x1fd   : > { %9793 = vst [vmem:[#allocation17_spill] sm:$0xff] %v7457_v24  ;;  %v7536_v22 = vsub.f32 %v843_v21, %v832_v20 }
 0x1fe   : > { %9794 = vst [vmem:[#allocation18_spill] sm:$0xff] %v7473_v35 }
 0x1ff   : > { %9795 = vst [vmem:[#allocation19_spill] sm:$0xff] %v7483_v45  ;;  %v871_v28 = vadd.f32 %v863_v26, %v7536_v22 }
 0x22f   : > { %v1052_v63 = vpop.permute.xlu0 %1051 }
 0x230   : > { %6216 = vmatpush.xpose.msk.msrb.mxu0 %vm662_vm0, %v1052_v63  ;;  %6539 = vmatpush.xpose.msk.msra.mxu3 %vm662_vm0, %v1052_v63  ;;  %v7499_v63 = vpack.i.bf16 %v7372_v59, %v7376_v60 }
 0x237   : > { %v1050_v0 = vpop.permute.xlu0 %1049  ;;  %v1126_v2 = vpop.permute.xlu2 %1125 }
 0x238   : > { %6217 = vmatpush.xpose.msk.msrb.mxu0 %vm662_vm0, %v1050_v0  ;;  %6540 = vmatpush.xpose.msk.msra.mxu3 %vm662_vm0, %v1050_v0  ;;  %v7502_v0 = vld [vmem:[%s7429_s5 + $0x38] sm:$0xff] }
 0x23b   : > { %6218 = vmatmul.msk.f32.vlgmr.msrb.gmra.mxu0 %vm662_vm0, %v7358_v55  ;;  %6219 = vmatmul.msk.f32.vlgmr.msra.gmra.mxu3 %vm662_vm0, %v7360_v56 }
 0x23f   : > { %v1089_v1 = vpop.permute.xlu1 %1088  ;;  %v1124_v4 = vpop.permute.xlu2 %1123 }
 0x240   : > { %6220 = vmatpush.xpose.msk.msrb.mxu3 %vm662_vm0, %v1089_v1  ;;  %v837_v1 = vmul.f32 %v7502_v0, %v7502_v0 }
 0x247   : > { %v1087_v3 = vpop.permute.xlu1 %1086 }
 0x248   : > { %6221 = vmatpush.xpose.msk.msrb.mxu3 %vm662_vm0, %v1087_v3  ;;  %v868_v3 = vmul.f32 %v7439_v15, %v7502_v0 }
 0x24b   : > { %6222 = vmatmul.msk.f32.vlgmr.msrb.gmra.mxu3 %vm662_vm0, %v7364_v57 }
 0x24c   : > { %6224 = vmatpush.xpose.msk.msra.mxu3 %vm662_vm0, %v1126_v2  ;;  %v7510_v2 = vsub.f32 %v845_v33, %v837_v1 }
 0x250   : > { %6225 = vmatpush.xpose.msk.msra.mxu3 %vm662_vm0, %v1124_v4  ;;  %v876_v4 = vadd.f32 %v868_v3, %v7510_v2 }
 0x253   : > { %6223 = vmatmul.msk.f32.gmra.mxu3 %vm662_vm0, %v7368_v58 }
 0x257   : > { %v1161_v6 = vpop.permute.xlu1 %1160 }
 0x25b   : > { %6226 = vmatmul.msk.f32.vlgmr.msra.gmra.mxu3 %vm662_vm0, %v7372_v59 }
 0x25f   : > { %v1163_v5 = vpop.permute.xlu0 %1162 }
 0x260   : > { %6228 = vmatpush.xpose.msk.msrb.mxu3 %vm662_vm0, %v1163_v5  ;;  %v7518_v5 = vsub.f32 %v876_v4, %v7454_v23 }
 0x262   : > { %9796 = vst [vmem:[#allocation20_spill] sm:$0xff] %v7518_v5 }
 0x263   : > { %6227 = vmatmul.msk.f32.gmra.mxu3 %vm662_vm0, %v7376_v60 }
 0x264   : > { %6229 = vmatpush.xpose.msk.msrb.mxu3 %vm662_vm0, %v1161_v6 }
 0x26b   : > { %6230 = vmatmul.msk.f32.vlgmr.msrb.gmra.mxu3 %vm662_vm0, %v7380_v61 }
 0x273   : > { %6231 = vmatmul.msk.f32.gmra.mxu3 %vm662_vm0, %v7386_v62 }
 0x2be   : > { %v7422_v7 = vpop.f32.mrf.mxu3 }
 0x2ce   : > { %v7435_v12 = vpop.f32.mrf.mxu3 }
 0x2d6   : > { %v7448_v19 = vpop.f32.mrf.mxu3 }
 0x2de   : > { %v1152_v29 = vpop.f32.mrf.mxu3 }
 0x2df   : > { %v1153_v30 = vadd.f32 %v1152_v29, %v7457_v24  ;;  %v7542_v29 = vsub.f32 %v871_v28, %v7454_v23 }
 0x2e1   : > { %v1208_v34 = vsel %vm1195_vm4, %v1153_v30, -inf  ;;  %9797 = vst [vmem:[#allocation21_spill] sm:$0xff] %v7542_v29  ;;  %v7546_v31 = vadd.f32 %v7435_v12, %v7542_v29  ;;  %v7556_v12 = vpack.i.bf16 %v7364_v57, %v7368_v58 }
 0x2e2   : > { %1209 = vmax.xlane.f32.xlu2 %v1208_v34 }
 0x2e3   : > { %v1202_v32 = vsel %vm1195_vm4, %v7546_v31, -inf }
 0x2e6   : > { %v1155_v38 = vpop.f32.mrf.mxu3 }
 0x2e7   : > { %v1156_v39 = vadd.f32 %v1155_v38, %v7473_v35 }
 0x2e9   : > { %v1211_v43 = vsel %vm1195_vm4, %v1156_v39, -inf }
 0x2ea   : > { %1212 = vmax.xlane.f32.xlu0 %v1211_v43 }
 0x2ee   : > { %v1189_v47 = vpop.f32.mrf.mxu3 }
 0x2ef   : > { %v1190_v49 = vadd.f32 %v1189_v47, %v7483_v45 }
 0x2f1   : > { %v1214_v51 = vsel %vm1195_vm4, %v1190_v49, -inf }
 0x2f2   : > { %1215 = vmax.xlane.f32.xlu1 %v1214_v51 }
 0x2f6   : > { %v1192_v6 = vpop.f32.mrf.mxu3 }
 0x2f7   : > { %v7523_v8 = vadd.f32 %v1192_v6, %v7518_v5 }
 0x2f9   : > { %v1217_v11 = vsel %vm1195_vm4, %v7523_v8, -inf }
 0x2fa   : > { %1610 = vrot.lane.b32.xlu2 %v7372_v59, %s9705_s23 }
 0x2fe   : > { %1612 = vrot.lane.b32.xlu0 %v7376_v60, %s9705_s23 }
 0x306   : > { %6600 = vrot.lane.b32.xlu0 %v7493_v53, %s9726_s24 }
 0x30b   : > { %6595 = vrot.lane.b32.xlu1 %v7499_v63, %s9726_s24 }
 0x30e   : > { %1651 = vrot.lane.b32.xlu0 %v7386_v62, %s9705_s23 }
 0x313   : > { %1606 = vrot.lane.b32.xlu1 %v7372_v59, %s9703_s6 }
 0x31b   : > { %1608 = vrot.lane.b32.xlu1 %v7376_v60, %s9703_s6 }
 0x323   : > { %1218 = vmax.xlane.f32.xlu2 %v1217_v11  ;;  %1649 = vrot.lane.b32.xlu1 %v7380_v61, %s9705_s23 }
 0x34d   : > { %1203 = vmax.xlane.f32.xlu1 %v1202_v32 }
 0x355   : > { %v1210_v33 = vpop.xlane.xlu2 %1209 }
 0x356   : > { %v1224_v34 = vsub.f32 %v1153_v30, %v1210_v33 }
 0x358   : > { %v1236_v37 = vmul.f32 1.442695, %v1224_v34 }
 0x35a   : > { %6761 = vpow2.f32 %v1236_v37 }
 0x35d   : > { %v1213_v38 = vpop.xlane.xlu0 %1212  ;;  %v1611_v37 = vpop.permute.xlu2 %1610 }
 0x35e   : > { %v1225_v41 = vsub.f32 %v1156_v39, %v1213_v38 }
 0x360   : > { %v7550_v43 = vpop.eup %6761  ;;  %v1238_v47 = vmul.f32 1.442695, %v1225_v41  ;;  %v7582_v41 = vld [vmem:[%s7429_s5 + $0x18] sm:$0xff] }
 0x361   : > { %v1256_v51 = vsel %vm1195_vm4, %v7550_v43, 0.0 }
 0x362   : > { %6763 = vpow2.f32 %v1238_v47  ;;  %1257 = vadd.xlane.f32.xlu2 %v1256_v51  ;;  %v833_v47 = vmul.f32 %v7582_v41, %v7582_v41 }
 0x365   : > { %v1216_v1 = vpop.xlane.xlu1 %1215 }
 0x366   : > { %v1226_v3 = vsub.f32 %v1190_v49, %v1216_v1  ;;  %6605 = vrot.lane.b32.xlu1 %v7556_v12, %s9726_s24 }
 0x368   : > { %v7560_v30 = vpop.eup %6763  ;;  %v1240_v39 = vmul.f32 1.442695, %v1226_v3  ;;  %v7587_v3 = vsub.f32 %v843_v21, %v833_v47 }
 0x369   : > { %v1259_v4 = vsel %vm1195_vm4, %v7560_v30, 0.0 }
 0x36a   : > { %6765 = vpow2.f32 %v1240_v39  ;;  %1260 = vadd.xlane.f32.xlu0 %v1259_v4  ;;  %v864_v39 = vmul.f32 %v7439_v15, %v7582_v41 }
 0x36e   : > { %1567 = vrot.lane.b32.xlu1 %v7364_v57, %s9703_s6 }
 0x370   : > { %v7566_v6 = vpop.eup %6765  ;;  %v1613_v11 = vpop.permute.xlu0 %1612 }
 0x371   : > { %v1262_v49 = vsel %vm1195_vm4, %v7566_v6, 0.0 }
 0x372   : > { %1263 = vadd.xlane.f32.xlu2 %v1262_v49  ;;  %v872_v49 = vadd.f32 %v864_v39, %v7587_v3 }
 0x376   : > { %2152 = vrot.lane.b32.xlu1 %v7360_v56, %s9724_s28 }
 0x378   : > { %v6601_v13 = vpop.permute.xlu0 %6600 }
 0x379   : > { %v6602_v17 = vunpack.i.l.bf16 %v6601_v13  ;;  %v6603_v20 = vunpack.i.h.bf16 %v6601_v13  ;;  %v7594_v13 = vsub.f32 %v872_v49, %v7454_v23 }
 0x37b   : > { %1519 = vmatpush.msra.mxu3 %v6602_v17  ;;  %9798 = vst [vmem:[#allocation22_spill] sm:$0xff] %v7594_v13  ;;  %v7602_v21 = vadd.f32 %v7448_v19, %v7594_v13 }
 0x37d   : > { %v6596_v26 = vpop.permute.xlu1 %6595  ;;  %1520 = vmatpush.msra.mxu3 %v6603_v20 }
 0x37e   : > { %1645 = vrot.lane.b32.xlu0 %v7380_v61, %s9703_s6  ;;  %v6597_v28 = vunpack.i.l.bf16 %v6596_v26  ;;  %v6598_v33 = vunpack.i.h.bf16 %v6596_v26 }
 0x380   : > { %1484 = vmatpush.msrb.mxu2 %v6597_v28  ;;  %v1652_v32 = vpop.permute.xlu0 %1651 }
 0x381   : > { %6252 = vmatpush.xpose.msk.msrb.mxu3 %vm662_vm0, %v1652_v32 }
 0x382   : > { %1485 = vmatpush.msrb.mxu2 %v6598_v33 }
 0x384   : > { %6248 = vmatpush.xpose.msk.msra.mxu2 %vm662_vm0, %v1613_v11 }
 0x385   : > { %v7576_v34 = vpop.permute.xlu1 %1606 }
 0x388   : > { %6249 = vmatpush.xpose.msk.msra.mxu2 %vm662_vm0, %v1611_v37 }
 0x38d   : > { %v7579_v38 = vpop.permute.xlu1 %1608 }
 0x395   : > { %v1650_v51 = vpop.permute.xlu1 %1649 }
 0x396   : > { %v1219_v1 = vpop.xlane.xlu2 %1218  ;;  %6253 = vmatpush.xpose.msk.msrb.mxu3 %vm662_vm0, %v1650_v51 }
 0x397   : > { %v1227_v4 = vsub.f32 %v7523_v8, %v1219_v1  ;;  %v1205_v8 = vsel %vm1195_vm4, %v7602_v21, -inf }
 0x399   : > { %v1242_v11 = vmul.f32 1.442695, %v1227_v4 }
 0x39b   : > { %6767 = vpow2.f32 %v1242_v11 }
 0x3a1   : > { %v7596_v17 = vpop.eup %6767 }
 0x3a2   : > { %v1265_v20 = vsel %vm1195_vm4, %v7596_v17, 0.0 }
 0x3a3   : > { %1266 = vadd.xlane.f32.xlu2 %v1265_v20 }
 0x3a8   : > { %1206 = vmax.xlane.f32.xlu0 %v1205_v8 }
 0x3bb   : > { %1647 = vrot.lane.b32.xlu2 %v7386_v62, %s9703_s6 }
 0x3c0   : > { %v1204_v26 = vpop.xlane.xlu1 %1203 }
 0x3c1   : > { %v1222_v28 = vsub.f32 %v7546_v31, %v1204_v26 }
 0x3c3   : > { %v1232_v33 = vmul.f32 1.442695, %v1222_v28 }
 0x3d5   : > { %v1258_v32 = vpop.xlane.xlu2 %1257 }
 0x3d6   : > { %6769 = vrcp.f32 %v1258_v32  ;;  %v1335_v20 = vand.u32 2147483648, %v1258_v32  ;;  %v1333_v31 = vand.u32 2147483647, %v1258_v32  ;;  %vm1329_vm7 = vweird.f32 %v1258_v32 }
 0x3d7   : > { %6771 = vpow2.f32 %v1232_v33 }
 0x3d8   : > { %v6606_v37 = vpop.permute.xlu1 %6605  ;;  %v1336_v33 = vor.u32 1.1754944e-38, %v1335_v20  ;;  %vm1334_vm9 = vcmp.eq.f32.partialorder %v1333_v31, 8.507059e+37 }
 0x3d9   : > { %v6607_v47 = vunpack.i.l.bf16 %v6606_v37  ;;  %v6608_v19 = vunpack.i.h.bf16 %v6606_v37 }
 0x3db   : > { %1449 = vmatpush.msrb.mxu1 %v6607_v47 }
 0x3dc   : > { %v6770_v51 = vpop.eup %6769 }
 0x3dd   : > { %v1325_v1 = vmul.f32 %v6770_v51, %v1258_v32  ;;  %1450 = vmatpush.msrb.mxu1 %v6608_v19  ;;  %v1261_v39 = vpop.xlane.xlu0 %1260  ;;  %v7609_v11 = vpop.eup %6771  ;;  %vm1330_vm6 = vweird.f32 %v6770_v51 }
 0x3de   : > { %6773 = vrcp.f32 %v1261_v39  ;;  %v1250_v8 = vsel %vm1195_vm4, %v7609_v11, 0.0  ;;  %vm1331_vm8 = vmor %vm1329_vm7, %vm1330_vm6  ;;  %v1349_v13 = vand.u32 2147483648, %v1261_v39  ;;  %v1347_v32 = vand.u32 2147483647, %v1261_v39 }
 0x3df   : > { %v1326_v4 = vsub.f32 1.0, %v1325_v1  ;;  %vm1343_vm11 = vweird.f32 %v1261_v39 }
 0x3e0   : > { %v1350_v20 = vor.u32 1.1754944e-38, %v1349_v13  ;;  %vm1348_vm13 = vcmp.eq.f32.partialorder %v1347_v32, 8.507059e+37 }
 0x3e1   : > { %v1327_v49 = vmul.f32 %v6770_v51, %v1326_v4 }
 0x3e3   : > { %v1328_v26 = vadd.f32 %v6770_v51, %v1327_v49 }
 0x3e4   : > { %v6774_v28 = vpop.eup %6773  ;;  %1251 = vadd.xlane.f32.xlu2 %v1250_v8 }
 0x3e5   : > { %v1339_v37 = vmul.f32 %v6774_v28, %v1261_v39  ;;  %v1264_v47 = vpop.xlane.xlu2 %1263  ;;  %v1332_v19 = vsel %vm1331_vm8, %v6770_v51, %v1328_v26  ;;  %vm1344_vm10 = vweird.f32 %v6774_v28 }
 0x3e6   : > { %6775 = vrcp.f32 %v1264_v47  ;;  %v1337_v10 = vsel %vm1334_vm9, %v1336_v33, %v1332_v19  ;;  %vm1345_vm12 = vmor %vm1343_vm11, %vm1344_vm10  ;;  %v1363_v33 = vand.u32 2147483648, %v1264_v47  ;;  %vm1357_vm15 = vweird.f32 %v1264_v47 }
 0x3e7   : > { %v1340_v1 = vsub.f32 1.0, %v1339_v37  ;;  %v1384_v4 = vmul.f32 %v7550_v43, %v1337_v10  ;;  %v1361_v43 = vand.u32 2147483647, %v1264_v47 }
 0x3e9   : > { %v1341_v29 = vmul.f32 %v6774_v28, %v1340_v1  ;;  %6236 = vmatmul.msk.f32.vlgmr.msrb.gmra.mxu2 %vm1195_vm4, %v1384_v4  ;;  %vm1362_vm3 = vcmp.eq.f32.partialorder %v1361_v43, 8.507059e+37 }
 0x3eb   : > { %v1342_v49 = vadd.f32 %v6774_v28, %v1341_v29  ;;  %v1364_v29 = vor.u32 1.1754944e-38, %v1363_v33 }
 0x3ec   : > { %v6776_v35 = vpop.eup %6775 }
 0x3ed   : > { %v1353_v8 = vmul.f32 %v6776_v35, %v1264_v47  ;;  %v1346_v24 = vsel %vm1345_vm12, %v6774_v28, %v1342_v49  ;;  %vm1358_vm14 = vweird.f32 %v6776_v35 }
 0x3ee   : > { %v1351_v51 = vsel %vm1348_vm13, %v1350_v20, %v1346_v24  ;;  %vm1359_vm2 = vmor %vm1357_vm15, %vm1358_vm14 }
 0x3ef   : > { %v1354_v31 = vsub.f32 1.0, %v1353_v8  ;;  %v1385_v26 = vmul.f32 %v7560_v30, %v1351_v51 }
 0x3f0   : > { %v1646_v24 = vpop.permute.xlu0 %1645 }
 0x3f1   : > { %v1355_v10 = vmul.f32 %v6776_v35, %v1354_v31  ;;  %6237 = vmatmul.msk.f32.gmra.mxu2 %vm1195_vm4, %v1385_v26 }
 0x3f3   : > { %v1356_v37 = vadd.f32 %v6776_v35, %v1355_v10 }
 0x3f5   : > { %v1360_v39 = vsel %vm1359_vm2, %v6776_v35, %v1356_v37 }
 0x3f6   : > { %v1365_v13 = vsel %vm1362_vm3, %v1364_v29, %v1360_v39 }
 0x3f7   : > { %v1386_v28 = vmul.f32 %v7566_v6, %v1365_v13 }
 0x3f9   : > { %6238 = vmatmul.msk.f32.vlgmr.msra.gmra.mxu3 %vm1195_vm4, %v1386_v28  ;;  %6250 = vmatmul.msk.f32.vlgmr.msra.gmra.mxu2 %vm662_vm0, %v7576_v34 }
 0x3fc   : > { %1573 = vrot.lane.b32.xlu2 %v7368_v58, %s9705_s23 }
 0x401   : > { %6251 = vmatmul.msk.f32.gmra.mxu2 %vm662_vm0, %v7579_v38 }
 0x404   : > { %1569 = vrot.lane.b32.xlu2 %v7368_v58, %s9703_s6  ;;  %s888_s6 = smul.f32 2.0, %s6205_s2 }
 0x40c   : > { %2150 = vrot.lane.b32.xlu2 %v7358_v55, %s9724_s28 }
 0x416   : > { %v1267_v35 = vpop.xlane.xlu2 %1266 }
 0x417   : > { %6777 = vrcp.f32 %v1267_v35  ;;  %v1377_v4 = vand.u32 2147483648, %v1267_v35  ;;  %v1375_v38 = vand.u32 2147483647, %v1267_v35  ;;  %vm1371_vm6 = vweird.f32 %v1267_v35 }
 0x419   : > { %v1378_v20 = vor.u32 1.1754944e-38, %v1377_v4  ;;  %vm1376_vm8 = vcmp.eq.f32.partialorder %v1375_v38, 8.507059e+37 }
 0x41b   : > { %v1207_v30 = vpop.xlane.xlu0 %1206 }
 0x41c   : > { %v1223_v6 = vsub.f32 %v7602_v21, %v1207_v30 }
 0x41d   : > { %v6778_v47 = vpop.eup %6777 }
 0x41e   : > { %v1367_v34 = vmul.f32 %v6778_v47, %v1267_v35  ;;  %v1234_v19 = vmul.f32 1.442695, %v1223_v6  ;;  %vm1372_vm5 = vweird.f32 %v6778_v47  ;;  %v1648_v33 = vpop.permute.xlu2 %1647 }
 0x41f   : > { %vm1373_vm7 = vmor %vm1371_vm6, %vm1372_vm5 }
 0x420   : > { %v1368_v1 = vsub.f32 1.0, %v1367_v34  ;;  %6779 = vpow2.f32 %v1234_v19  ;;  %v7649_v19 = vstv %s888_s6  ;;  %s6206_s6 = sld [smem:[#allocation3 + $0x2]] }
 0x422   : > { %v1369_v32 = vmul.f32 %v6778_v47, %v1368_v1  ;;  %v894_v1 = vmul.f32 %v7649_v19, %v7432_v9 }
 0x424   : > { %v1370_v49 = vadd.f32 %v6778_v47, %v1369_v32  ;;  %v902_v32 = vadd.f32 %v894_v1, %v7441_v16 }
 0x426   : > { %v7630_v8 = vpop.eup %6779  ;;  %v1374_v51 = vsel %vm1373_vm7, %v6778_v47, %v1370_v49 }
 0x427   : > { %v1253_v21 = vsel %vm1195_vm4, %v7630_v8, 0.0  ;;  %v1379_v31 = vsel %vm1376_vm8, %v1378_v20, %v1374_v51 }
 0x428   : > { %1254 = vadd.xlane.f32.xlu0 %v1253_v21  ;;  %v1387_v26 = vmul.f32 %v7596_v17, %v1379_v31 }
 0x42a   : > { %6239 = vmatmul.msk.f32.gmra.mxu3 %vm1195_vm4, %v1387_v26 }
 0x432   : > { %6254 = vmatmul.msk.f32.vlgmr.msrb.gmra.mxu3 %vm662_vm0, %v1646_v24 }
 0x43a   : > { %6255 = vmatmul.msk.f32.gmra.mxu3 %vm662_vm0, %v1648_v33 }
 0x43c   : > { %1571 = vrot.lane.b32.xlu0 %v7364_v57, %s9705_s23  ;;  %s906_s23 = smul.f32 %s6205_s2, %s6205_s2 }
 0x43d   : > { %s917_s2 = smul.f32 2.0, %s6206_s6 }
 0x43e   : > { %v7656_v38 = vstv %s906_s23  ;;  %s9746_s23 = smov 104  }
 0x43f   : > { %v7659_v49 = vsub.f32 %v902_v32, %v7656_v38 }
 0x441   : > { %9799 = vst [vmem:[#allocation23_spill] sm:$0xff] %v7659_v49 }
 0x444   : > { %6610 = vrot.lane.b32.xlu0 %v7499_v63, %s9752_s12 }
 0x44c   : > { %2146 = vrot.lane.b32.xlu0 %v7358_v55, %s9722_s30 }
 0x457   : > { %v1252_v10 = vpop.xlane.xlu2 %1251 }
 0x458   : > { %6781 = vrcp.f32 %v1252_v10  ;;  %v1307_v39 = vand.u32 2147483648, %v1252_v10  ;;  %v1305_v28 = vand.u32 2147483647, %v1252_v10  ;;  %vm1301_vm10 = vweird.f32 %v1252_v10 }
 0x45a   : > { %v1308_v35 = vor.u32 1.1754944e-38, %v1307_v39  ;;  %vm1306_vm12 = vcmp.eq.f32.partialorder %v1305_v28, 8.507059e+37 }
 0x45e   : > { %v6782_v17 = vpop.eup %6781 }
 0x45f   : > { %v1297_v43 = vmul.f32 %v6782_v17, %v1252_v10  ;;  %v1574_v37 = vpop.permute.xlu2 %1573  ;;  %vm1302_vm9 = vweird.f32 %v6782_v17 }
 0x460   : > { %6244 = vmatpush.xpose.msk.msra.mxu1 %vm662_vm0, %v1574_v37  ;;  %vm1303_vm11 = vmor %vm1301_vm10, %vm1302_vm9 }
 0x461   : > { %v1298_v29 = vsub.f32 1.0, %v1297_v43 }
 0x463   : > { %v1299_v13 = vmul.f32 %v6782_v17, %v1298_v29 }
 0x465   : > { %v1300_v24 = vadd.f32 %v6782_v17, %v1299_v13 }
 0x467   : > { %v1304_v30 = vsel %vm1303_vm11, %v6782_v17, %v1300_v24 }
 0x468   : > { %v1309_v6 = vsel %vm1306_vm12, %v1308_v35, %v1304_v30  ;;  %v896_v30 = vmul.f32 %v7649_v19, %v7464_v27 }
 0x469   : > { %v1382_v47 = vmul.f32 %v7609_v11, %v1309_v6  ;;  %v895_v11 = vmul.f32 %v7649_v19, %v7446_v18 }
 0x46b   : > { %6234 = vmatmul.msk.f32.vlgmr.msrb.gmra.mxu1 %vm1195_vm4, %v1382_v47  ;;  %v903_v21 = vadd.f32 %v895_v11, %v7459_v25  ;;  %v818_v11 = vld [vmem:[%s7420_s27] sm:$0x1]  ;;  %s9750_s27 = smov 48  }
 0x46c   : > { %v7647_v34 = vpop.f32.mrf.mxu2  ;;  %vm822_vm3 = vcmp.gt.f32.partialorder %v818_v11, 0.0 }
 0x46d   : > { %v7670_v31 = vsub.f32 %v903_v21, %v7656_v38  ;;  %v904_v21 = vadd.f32 %v896_v30, %v7475_v36 }
 0x46f   : > { %9800 = vst [vmem:[#allocation24_spill] sm:$0xff] %v7670_v31  ;;  %v7694_v27 = vsub.f32 %v904_v21, %v7656_v38 }
 0x471   : > { %9801 = vst [vmem:[#allocation25_spill] sm:$0xff] %v7694_v27 }
 0x474   : > { %v7653_v4 = vpop.f32.mrf.mxu2 }
 0x47c   : > { %v1639_v20 = vpop.f32.mrf.mxu2  ;;  %v7679_v37 = vpop.f32.mrf.mxu3 }
 0x47d   : > { %v7664_v51 = vadd.f32 %v1639_v20, %v7659_v49 }
 0x47f   : > { %v1696_v9 = vsel %vm1195_vm4, %v7664_v51, -inf }
 0x480   : > { %1697 = vmax.xlane.f32.xlu1 %v1696_v9  ;;  %v1568_v9 = vpop.permute.xlu1 %1567 }
 0x484   : > { %v1642_v26 = vpop.f32.mrf.mxu2 }
 0x485   : > { %v7673_v33 = vadd.f32 %v1642_v26, %v7670_v31  ;;  %v7691_v26 = vld [vmem:[%s7429_s5 + $0x8] sm:$0xff] }
 0x487   : > { %v1699_v18 = vsel %vm1195_vm4, %v7673_v33, -inf }
 0x488   : > { %1700 = vmax.xlane.f32.xlu2 %v1699_v18  ;;  %v897_v18 = vmul.f32 %v7649_v19, %v7502_v0  ;;  %v2153_v11 = vpop.permute.xlu1 %2152 }
 0x49b   : > { %v1255_v10 = vpop.xlane.xlu0 %1254 }
 0x49c   : > { %6783 = vrcp.f32 %v1255_v10  ;;  %v1321_v39 = vand.u32 2147483648, %v1255_v10  ;;  %v1319_v28 = vand.u32 2147483647, %v1255_v10  ;;  %vm1315_vm14 = vweird.f32 %v1255_v10 }
 0x49e   : > { %v1322_v35 = vor.u32 1.1754944e-38, %v1321_v39  ;;  %vm1320_vm2 = vcmp.eq.f32.partialorder %v1319_v28, 8.507059e+37  ;;  %v905_v28 = vadd.f32 %v897_v18, %v7510_v2 }
 0x4a0   : > { %2230 = vrot.lane.b32.xlu2 %v7376_v60, %s9724_s28 }
 0x4a2   : > { %v6784_v17 = vpop.eup %6783 }
 0x4a3   : > { %v1311_v43 = vmul.f32 %v6784_v17, %v1255_v10  ;;  %vm1316_vm13 = vweird.f32 %v6784_v17  ;;  %v9802_v10 = vmov -1e+30  }
 0x4a4   : > { %vm1317_vm15 = vmor %vm1315_vm14, %vm1316_vm13 }
 0x4a5   : > { %v1312_v29 = vsub.f32 1.0, %v1311_v43  ;;  %v1570_v43 = vpop.permute.xlu2 %1569 }
 0x4a7   : > { %v1313_v13 = vmul.f32 %v6784_v17, %v1312_v29 }
 0x4a9   : > { %v1314_v24 = vadd.f32 %v6784_v17, %v1313_v13 }
 0x4ab   : > { %v1318_v6 = vsel %vm1317_vm15, %v6784_v17, %v1314_v24  ;;  %v831_v17 = vmul.f32 %v7691_v26, %v7691_v26 }
 0x4ac   : > { %v1323_v47 = vsel %vm1320_vm2, %v1322_v35, %v1318_v6  ;;  %v862_v6 = vmul.f32 %v7439_v15, %v7691_v26 }
 0x4ad   : > { %v7683_v1 = vpop.f32.mrf.mxu3  ;;  %v1383_v32 = vmul.f32 %v7630_v8, %v1323_v47  ;;  %v7699_v8 = vsel %vm822_vm3, 0.0, %v9802_v10  ;;  %v2151_v18 = vpop.permute.xlu2 %2150 }
 0x4ae   : > { %v1572_v20 = vpop.permute.xlu0 %1571  ;;  %v842_v24 = vperm.slane %v7699_v8, 0 }
 0x4af   : > { %6235 = vmatmul.msk.f32.gmra.mxu1 %vm1195_vm4, %v1383_v32  ;;  %v7713_v32 = vsub.f32 %v905_v28, %v7656_v38 }
 0x4b0   : > { %6245 = vmatpush.xpose.msk.msra.mxu1 %vm662_vm0, %v1572_v20  ;;  %v7708_v30 = vsub.f32 %v842_v24, %v831_v17 }
 0x4b1   : > { %9803 = vst [vmem:[#allocation26_spill] sm:$0xff] %v7713_v32 }
 0x4b2   : > { %v870_v20 = vadd.f32 %v862_v6, %v7708_v30 }
 0x4b4   : > { %v7722_v8 = vsub.f32 %v870_v20, %v7454_v23  ;;  %v7763_v20 = vld [vmem:[%s7429_s5] sm:$0xff] }
 0x4b5   : > { %v1678_v29 = vpop.f32.mrf.mxu3 }
 0x4b6   : > { %v1679_v39 = vadd.f32 %v1678_v29, %v7694_v27  ;;  %v6611_v13 = vpop.permute.xlu0 %6610  ;;  %9804 = vst [vmem:[#allocation27_spill] sm:$0xff] %v7722_v8  ;;  %v7726_v17 = vadd.f32 %v7422_v7, %v7722_v8 }
 0x4b7   : > { %v6612_v35 = vunpack.i.l.bf16 %v6611_v13  ;;  %6246 = vmatmul.msk.f32.vlgmr.msra.gmra.mxu1 %vm662_vm0, %v1568_v9  ;;  %v6613_v47 = vunpack.i.h.bf16 %v6611_v13 }
 0x4b8   : > { %v1702_v0 = vsel %vm1195_vm4, %v1679_v39, -inf  ;;  %v1199_v29 = vsel %vm1195_vm4, %v7726_v17, -inf }
 0x4b9   : > { %1972 = vmatpush.msrb.mxu2 %v6612_v35  ;;  %1703 = vmax.xlane.f32.xlu0 %v1702_v0 }
 0x4bb   : > { %1973 = vmatpush.msrb.mxu2 %v6613_v47 }
 0x4bd   : > { %6280 = vmatpush.xpose.msk.msra.mxu2 %vm662_vm0, %v2153_v11  ;;  %v1681_v21 = vpop.f32.mrf.mxu3 }
 0x4be   : > { %v1682_v9 = vadd.f32 %v1681_v21, %v7713_v32 }
 0x4bf   : > { %6247 = vmatmul.msk.f32.gmra.mxu1 %vm662_vm0, %v1570_v43 }
 0x4c0   : > { %v1705_v10 = vsel %vm1195_vm4, %v1682_v9, -inf }
 0x4c1   : > { %6281 = vmatpush.xpose.msk.msra.mxu2 %vm662_vm0, %v2151_v18  ;;  %1706 = vmax.xlane.f32.xlu0 %v1705_v10  ;;  %v830_v10 = vmul.f32 %v7763_v20, %v7763_v20 }
 0x4c9   : > { %1200 = vmax.xlane.f32.xlu2 %v1199_v29 }
 0x4d5   : > { %2148 = vrot.lane.b32.xlu0 %v7360_v56, %s9722_s30 }
 0x4dd   : > { %2228 = vrot.lane.b32.xlu0 %v7372_v59, %s9724_s28 }
 0x4e1   : > { %2269 = vrot.lane.b32.xlu2 %v7386_v62, %s9724_s28 }
 0x4e5   : > { %2191 = vrot.lane.b32.xlu0 %v7368_v58, %s9724_s28 }
 0x4ed   : > { %2224 = vrot.lane.b32.xlu0 %v7372_v59, %s9722_s30 }
 0x4f3   : > { %v1698_v7 = vpop.xlane.xlu1 %1697 }
 0x4f4   : > { %v1712_v43 = vsub.f32 %v7664_v51, %v1698_v7  ;;  %v7767_v7 = vsub.f32 %v842_v24, %v830_v10  ;;  %v1078_v24 = vpop.f32.mrf.mxu0 }
 0x4f5   : > { %2189 = vrot.lane.b32.xlu0 %v7364_v57, %s9724_s28 }
 0x4f6   : > { %v1724_v13 = vmul.f32 1.442695, %v1712_v43  ;;  %v861_v43 = vmul.f32 %v7439_v15, %v7763_v20 }
 0x4f8   : > { %6785 = vpow2.f32 %v1724_v13 }
 0x4fb   : > { %v1701_v28 = vpop.xlane.xlu2 %1700 }
 0x4fc   : > { %v1713_v35 = vsub.f32 %v7673_v33, %v1701_v28  ;;  %v7760_v33 = vpop.permute.xlu0 %2146 }
 0x4fd   : > { %2185 = vrot.lane.b32.xlu0 %v7364_v57, %s9722_s30 }
 0x4fe   : > { %v7746_v0 = vpop.eup %6785  ;;  %v1726_v6 = vmul.f32 1.442695, %v1713_v35 }
 0x4ff   : > { %v1744_v47 = vsel %vm1195_vm4, %v7746_v0, 0.0 }
 0x500   : > { %6787 = vpow2.f32 %v1726_v6  ;;  %1745 = vadd.xlane.f32.xlu1 %v1744_v47  ;;  %v869_v6 = vadd.f32 %v861_v43, %v7767_v7  ;;  %v7802_v43 = vpop.f32.mrf.mxu1 }
 0x505   : > { %2187 = vrot.lane.b32.xlu0 %v7368_v58, %s9722_s30 }
 0x506   : > { %v7752_v51 = vpop.eup %6787 }
 0x507   : > { %v1747_v11 = vsel %vm1195_vm4, %v7752_v51, 0.0 }
 0x50a   : > { %1748 = vadd.xlane.f32.xlu2 %v1747_v11  ;;  %v7777_v11 = vsub.f32 %v869_v6, %v7454_v23  ;;  %v7792_v23 = vpack.i.bf16 %v7358_v55, %v7360_v56 }
 0x50c   : > { %9805 = vst [vmem:[#allocation28_spill] sm:$0xff] %v7777_v11  ;;  %v7782_v15 = vadd.f32 %v1078_v24, %v7777_v11 }
 0x50d   : > { %2267 = vrot.lane.b32.xlu0 %v7380_v61, %s9724_s28  ;;  %s9809_s28 = smov 88  }
 0x519   : > { %6615 = vrot.lane.b32.xlu1 %v7493_v53, %s9752_s12 }
 0x52c   : > { %v1704_v21 = vpop.xlane.xlu0 %1703  ;;  %v7804_v6 = vpop.f32.mrf.mxu1 }
 0x52d   : > { %v1714_v18 = vsub.f32 %v1679_v39, %v1704_v21 }
 0x52f   : > { %v1728_v29 = vmul.f32 1.442695, %v1714_v18  ;;  %v1196_v18 = vsel %vm1195_vm4, %v7782_v15, -inf }
 0x531   : > { %6789 = vpow2.f32 %v1728_v29  ;;  %v2231_v29 = vpop.permute.xlu2 %2230 }
 0x534   : > { %v1707_v13 = vpop.xlane.xlu0 %1706  ;;  %v1600_v49 = vpop.f32.mrf.mxu1 }
 0x535   : > { %v1715_v28 = vsub.f32 %v1682_v9, %v1707_v13 }
 0x537   : > { %v7771_v35 = vpop.eup %6789  ;;  %v1730_v47 = vmul.f32 1.442695, %v1715_v28 }
 0x538   : > { %v1750_v39 = vsel %vm1195_vm4, %v7771_v35, 0.0 }
 0x539   : > { %6791 = vpow2.f32 %v1730_v47  ;;  %1751 = vadd.xlane.f32.xlu0 %v1750_v39  ;;  %v892_v47 = vmul.f32 %v7649_v19, %v7531_v14 }
 0x53c   : > { %v1201_v28 = vpop.xlane.xlu2 %1200 }
 0x53d   : > { %v1221_v5 = vsub.f32 %v7726_v17, %v1201_v28 }
 0x53f   : > { %v7779_v21 = vpop.eup %6791  ;;  %v1230_v50 = vmul.f32 1.442695, %v1221_v5 }
 0x540   : > { %v1753_v9 = vsel %vm1195_vm4, %v7779_v21, 0.0 }
 0x541   : > { %1754 = vadd.xlane.f32.xlu2 %v1753_v9  ;;  %v900_v9 = vadd.f32 %v892_v47, %v7536_v22 }
 0x543   : > { %1197 = vmax.xlane.f32.xlu1 %v1196_v18  ;;  %v7812_v31 = vsub.f32 %v900_v9, %v7656_v38 }
 0x544   : > { %v7809_v18 = vpop.permute.xlu2 %2269 }
 0x545   : > { %9806 = vst [vmem:[#allocation29_spill] sm:$0xff] %v7812_v31  ;;  %v7815_v11 = vadd.f32 %v1600_v49, %v7812_v31 }
 0x547   : > { %v7798_v10 = vpop.permute.xlu0 %2148  ;;  %v1690_v9 = vsel %vm1195_vm4, %v7815_v11, -inf }
 0x54d   : > { %2263 = vrot.lane.b32.xlu0 %v7380_v61, %s9722_s30 }
 0x54f   : > { %v2229_v13 = vpop.permute.xlu0 %2228 }
 0x557   : > { %v2192_v39 = vpop.permute.xlu0 %2191 }
 0x559   : > { %6620 = vrot.lane.b32.xlu2 %v7792_v23, %s9726_s24  ;;  %s8181_s24 = sld [smem:[#allocation3 + $0x3]] }
 0x55c   : > { %2226 = vrot.lane.b32.xlu1 %v7376_v60, %s9722_s30 }
 0x55f   : > { %v2225_v27 = vpop.permute.xlu0 %2224 }
 0x564   : > { %2265 = vrot.lane.b32.xlu1 %v7386_v62, %s9722_s30  ;;  %s935_s30 = smul.f32 %s6206_s6, %s6206_s6  ;;  %s9748_s6 = smov 72  }
 0x567   : > { %v2190_v17 = vpop.permute.xlu0 %2189 }
 0x573   : > { %v1746_v24 = vpop.xlane.xlu1 %1745 }
 0x574   : > { %6793 = vrcp.f32 %v1746_v24  ;;  %v1823_v54 = vand.u32 2147483648, %v1746_v24  ;;  %v1821_v52 = vand.u32 2147483647, %v1746_v24  ;;  %vm1817_vm6 = vweird.f32 %v1746_v24 }
 0x576   : > { %v1824_v46 = vor.u32 1.1754944e-38, %v1823_v54  ;;  %vm1822_vm8 = vcmp.eq.f32.partialorder %v1821_v52, 8.507059e+37 }
 0x57a   : > { %v6794_v32 = vpop.eup %6793 }
 0x57b   : > { %v1813_v8 = vmul.f32 %v6794_v32, %v1746_v24  ;;  %vm1818_vm5 = vweird.f32 %v6794_v32 }
 0x57c   : > { %vm1819_vm7 = vmor %vm1817_vm6, %vm1818_vm5 }
 0x57d   : > { %v1814_v14 = vsub.f32 1.0, %v1813_v8  ;;  %v1749_v45 = vpop.xlane.xlu2 %1748 }
 0x57e   : > { %6795 = vrcp.f32 %v1749_v45  ;;  %v1837_v5 = vand.u32 2147483648, %v1749_v45  ;;  %v1835_v24 = vand.u32 2147483647, %v1749_v45  ;;  %vm1831_vm10 = vweird.f32 %v1749_v45 }
 0x57f   : > { %v1815_v47 = vmul.f32 %v6794_v32, %v1814_v14  ;;  %6797 = vpow2.f32 %v1230_v50 }
 0x580   : > { %vm1836_vm12 = vcmp.eq.f32.partialorder %v1835_v24, 8.507059e+37 }
 0x581   : > { %v1816_v48 = vadd.f32 %v6794_v32, %v1815_v47 }
 0x582   : > { %1691 = vmax.xlane.f32.xlu2 %v1690_v9 }
 0x583   : > { %v1820_v49 = vsel %vm1819_vm7, %v6794_v32, %v1816_v48 }
 0x584   : > { %v6796_v31 = vpop.eup %6795  ;;  %v1825_v8 = vsel %vm1822_vm8, %v1824_v46, %v1820_v49  ;;  %v1838_v46 = vor.u32 1.1754944e-38, %v1837_v5 }
 0x585   : > { %v1827_v28 = vmul.f32 %v6796_v31, %v1749_v45  ;;  %v1872_v14 = vmul.f32 %v7746_v0, %v1825_v8  ;;  %vm1832_vm9 = vweird.f32 %v6796_v31  ;;  %v7823_v9 = vpop.eup %6797 }
 0x586   : > { %vm1833_vm11 = vmor %vm1831_vm10, %vm1832_vm9  ;;  %v1247_v54 = vsel %vm1195_vm4, %v7823_v9, 0.0 }
 0x587   : > { %v1828_v44 = vsub.f32 1.0, %v1827_v28  ;;  %6260 = vmatmul.msk.f32.vlgmr.msrb.gmra.mxu2 %vm1195_vm4, %v1872_v14 }
 0x588   : > { %6288 = vmatpush.xpose.msk.msrb.mxu2 %vm662_vm0, %v2231_v29  ;;  %v7828_v29 = vpop.permute.xlu0 %2185 }
 0x589   : > { %v1829_v47 = vmul.f32 %v6796_v31, %v1828_v44 }
 0x58b   : > { %v6616_v48 = vpop.permute.xlu1 %6615  ;;  %v1830_v52 = vadd.f32 %v6796_v31, %v1829_v47 }
 0x58c   : > { %v6617_v50 = vunpack.i.l.bf16 %v6616_v48  ;;  %6289 = vmatpush.xpose.msk.msrb.mxu2 %vm662_vm0, %v2229_v13  ;;  %v6618_v0 = vunpack.i.h.bf16 %v6616_v48 }
 0x58d   : > { %v1834_v32 = vsel %vm1833_vm11, %v6796_v31, %v1830_v52 }
 0x58e   : > { %1248 = vadd.xlane.f32.xlu1 %v1247_v54  ;;  %2007 = vmatpush.msra.mxu3 %v6617_v50  ;;  %v1839_v44 = vsel %vm1836_vm12, %v1838_v46, %v1834_v32 }
 0x58f   : > { %v1873_v49 = vmul.f32 %v7752_v51, %v1839_v44 }
 0x590   : > { %2008 = vmatpush.msra.mxu3 %v6618_v0  ;;  %v7834_v45 = vpop.permute.xlu0 %2187 }
 0x591   : > { %6261 = vmatmul.msk.f32.gmra.mxu2 %vm1195_vm4, %v1873_v49 }
 0x592   : > { %6284 = vmatpush.xpose.msk.msrb.mxu3 %vm662_vm0, %v2192_v39 }
 0x596   : > { %6285 = vmatpush.xpose.msk.msrb.mxu3 %vm662_vm0, %v2190_v17 }
 0x598   : > { %v2268_v31 = vpop.permute.xlu0 %2267 }
 0x599   : > { %6282 = vmatmul.msk.f32.vlgmr.msra.gmra.mxu2 %vm662_vm0, %v7760_v33 }
 0x5a1   : > { %6283 = vmatmul.msk.f32.gmra.mxu2 %vm662_vm0, %v7798_v10 }
 0x5a9   : > { %6290 = vmatmul.msk.f32.vlgmr.msrb.gmra.mxu2 %vm662_vm0, %v2225_v27  ;;  %v893_v27 = vmul.f32 %v7649_v19, %v7582_v41 }
 0x5ac   : > { %v1752_v13 = vpop.xlane.xlu0 %1751 }
 0x5ad   : > { %6799 = vrcp.f32 %v1752_v13  ;;  %v1851_v14 = vand.u32 2147483648, %v1752_v13  ;;  %v1849_v47 = vand.u32 2147483647, %v1752_v13  ;;  %vm1845_vm14 = vweird.f32 %v1752_v13 }
 0x5af   : > { %v1852_v52 = vor.u32 1.1754944e-38, %v1851_v14  ;;  %vm1850_vm2 = vcmp.eq.f32.partialorder %v1849_v47, 8.507059e+37  ;;  %v1603_v47 = vpop.f32.mrf.mxu1 }
 0x5b3   : > { %v6800_v51 = vpop.eup %6799 }
 0x5b4   : > { %v1841_v8 = vmul.f32 %v6800_v51, %v1752_v13  ;;  %v1755_v28 = vpop.xlane.xlu2 %1754  ;;  %vm1846_vm13 = vweird.f32 %v6800_v51 }
 0x5b5   : > { %6801 = vrcp.f32 %v1755_v28  ;;  %vm1847_vm15 = vmor %vm1845_vm14, %vm1846_vm13  ;;  %vm1859_vm5 = vweird.f32 %v1755_v28 }
 0x5b6   : > { %v1842_v39 = vsub.f32 1.0, %v1841_v8  ;;  %v1198_v17 = vpop.xlane.xlu1 %1197  ;;  %v1865_v8 = vand.u32 2147483648, %v1755_v28 }
 0x5b7   : > { %v1220_v33 = vsub.f32 %v7782_v15, %v1198_v17  ;;  %v901_v15 = vadd.f32 %v893_v27, %v7587_v3 }
 0x5b8   : > { %v1843_v5 = vmul.f32 %v6800_v51, %v1842_v39  ;;  %v1863_v39 = vand.u32 2147483647, %v1755_v28 }
 0x5b9   : > { %v1228_v10 = vmul.f32 1.442695, %v1220_v33 }
 0x5ba   : > { %v1844_v24 = vadd.f32 %v6800_v51, %v1843_v5  ;;  %v1866_v5 = vor.u32 1.1754944e-38, %v1865_v8  ;;  %vm1864_vm7 = vcmp.eq.f32.partialorder %v1863_v39, 8.507059e+37 }
 0x5bb   : > { %v6802_v48 = vpop.eup %6801  ;;  %6803 = vpow2.f32 %v1228_v10 }
 0x5bc   : > { %v1848_v50 = vsel %vm1847_vm15, %v6800_v51, %v1844_v24  ;;  %v1855_v46 = vmul.f32 %v6802_v48, %v1755_v28  ;;  %v6621_v54 = vpop.permute.xlu2 %6620  ;;  %vm1860_vm3 = vweird.f32 %v6802_v48 }
 0x5bd   : > { %v6622_v32 = vunpack.i.l.bf16 %v6621_v54  ;;  %v1853_v0 = vsel %vm1850_vm2, %v1852_v52, %v1848_v50  ;;  %v6623_v13 = vunpack.i.h.bf16 %v6621_v54  ;;  %vm1861_vm6 = vmor %vm1859_vm5, %vm1860_vm3  ;;  %v7881_v54 = vstv %s917_s2  ;;  %s946_s2 = smul.f32 2.0, %s8181_s24 }
 0x5be   : > { %v1856_v44 = vsub.f32 1.0, %v1855_v46  ;;  %v1874_v49 = vmul.f32 %v7771_v35, %v1853_v0  ;;  %v7852_v35 = vsub.f32 %v901_v15, %v7656_v38 }
 0x5bf   : > { %1414 = vmatpush.msra.mxu0 %v6622_v32  ;;  %v919_v32 = vmul.f32 %v7881_v54, %v7763_v20 }
 0x5c0   : > { %6262 = vmatmul.msk.f32.vlgmr.msra.gmra.mxu3 %vm1195_vm4, %v1874_v49  ;;  %v1857_v41 = vmul.f32 %v6802_v48, %v1856_v44  ;;  %9807 = vst [vmem:[#allocation30_spill] sm:$0xff] %v7852_v35  ;;  %v1604_v10 = vadd.f32 %v1603_v47, %v7852_v35  ;;  %v7888_v44 = vstv %s935_s30  ;;  %s9815_s30 = smov 120  }
 0x5c1   : > { %6292 = vmatpush.xpose.msk.msra.mxu3 %vm662_vm0, %v7809_v18  ;;  %1415 = vmatpush.msra.mxu0 %v6623_v13  ;;  %v7849_v51 = vpop.eup %6803 }
 0x5c2   : > { %v1858_v14 = vadd.f32 %v6802_v48, %v1857_v41  ;;  %v1244_v17 = vsel %vm1195_vm4, %v7849_v51, 0.0  ;;  %v1693_v28 = vsel %vm1195_vm4, %v1604_v10, -inf }
 0x5c3   : > { %1245 = vadd.xlane.f32.xlu0 %v1244_v17 }
 0x5c4   : > { %v1862_v33 = vsel %vm1861_vm6, %v6802_v48, %v1858_v14 }
 0x5c5   : > { %6293 = vmatpush.xpose.msk.msra.mxu3 %vm662_vm0, %v2268_v31  ;;  %v1867_v18 = vsel %vm1864_vm7, %v1866_v5, %v1862_v33  ;;  %v2264_v31 = vpop.permute.xlu0 %2263 }
 0x5c6   : > { %v1875_v24 = vmul.f32 %v7779_v21, %v1867_v18 }
 0x5c8   : > { %6263 = vmatmul.msk.f32.gmra.mxu3 %vm1195_vm4, %v1875_v24 }
 0x5cb   : > { %1694 = vmax.xlane.f32.xlu0 %v1693_v28 }
 0x5ce   : > { %v2227_v27 = vpop.permute.xlu1 %2226 }
 0x5cf   : > { %6291 = vmatmul.msk.f32.gmra.mxu2 %vm662_vm0, %v2227_v27 }
 0x5d0   : > { %6286 = vmatmul.msk.f32.vlgmr.msrb.gmra.mxu3 %vm662_vm0, %v7828_v29 }
 0x5d6   : > { %v2266_v21 = vpop.permute.xlu1 %2265 }
 0x5d8   : > { %6287 = vmatmul.msk.f32.gmra.mxu3 %vm662_vm0, %v7834_v45 }
 0x5df   : > { %6625 = vrot.lane.b32.xlu0 %v7556_v12, %s9752_s12 }
 0x5e0   : > { %6294 = vmatmul.msk.f32.vlgmr.msra.gmra.mxu3 %vm662_vm0, %v2264_v31 }
 0x5e7   : > { %6630 = vrot.lane.b32.xlu0 %v7792_v23, %s9750_s27 }
 0x5e8   : > { %6295 = vmatmul.msk.f32.gmra.mxu3 %vm662_vm0, %v2266_v21 }
 0x5ef   : > { %2707 = vrot.lane.b32.xlu0 %v7358_v55, %s9746_s23 }
 0x5f5   : > { %v1692_v29 = vpop.xlane.xlu2 %1691 }
 0x5f6   : > { %v1710_v45 = vsub.f32 %v7815_v11, %v1692_v29  ;;  %v927_v11 = vadd.f32 %v919_v32, %v7767_v7 }
 0x5f8   : > { %v1720_v48 = vmul.f32 1.442695, %v1710_v45  ;;  %v7891_v49 = vsub.f32 %v927_v11, %v7888_v44 }
 0x5fa   : > { %6805 = vpow2.f32 %v1720_v48  ;;  %9808 = vst [vmem:[#allocation31_spill] sm:$0xff] %v7891_v49 }
 0x600   : > { %v7875_v52 = vpop.eup %6805 }
 0x601   : > { %v1738_v50 = vsel %vm1195_vm4, %v7875_v52, 0.0  ;;  %v1249_v8 = vpop.xlane.xlu1 %1248 }
 0x602   : > { %1739 = vadd.xlane.f32.xlu1 %v1738_v50  ;;  %6807 = vrcp.f32 %v1249_v8  ;;  %vm1287_vm13 = vweird.f32 %v1249_v8 }
 0x608   : > { %v6808_v39 = vpop.eup %6807 }
 0x609   : > { %v1283_v14 = vmul.f32 %v6808_v39, %v1249_v8  ;;  %vm1288_vm12 = vweird.f32 %v6808_v39 }
 0x60a   : > { %v7879_v46 = vpop.f32.mrf.mxu2  ;;  %vm1289_vm14 = vmor %vm1287_vm13, %vm1288_vm12 }
 0x60b   : > { %v1284_v5 = vsub.f32 1.0, %v1283_v14  ;;  %v1291_v14 = vand.u32 2147483647, %v1249_v8 }
 0x60d   : > { %v1285_v45 = vmul.f32 %v6808_v39, %v1284_v5  ;;  %vm1292_vm15 = vcmp.eq.f32.partialorder %v1291_v14, 8.507059e+37 }
 0x60f   : > { %v1286_v11 = vadd.f32 %v6808_v39, %v1285_v45 }
 0x614   : > { %v7885_v0 = vpop.f32.mrf.mxu2 }
 0x61b   : > { %1532 = vrot.lane.b32.xlu1 %v7358_v55, %s9809_s28 }
 0x61c   : > { %v2179_v15 = vpop.f32.mrf.mxu2 }
 0x61d   : > { %v7896_v13 = vadd.f32 %v2179_v15, %v7891_v49 }
 0x61f   : > { %v2302_v20 = vsel %vm1195_vm4, %v7896_v13, -inf }
 0x620   : > { %2303 = vmax.xlane.f32.xlu0 %v2302_v20 }
 0x623   : > { %2713 = vrot.lane.b32.xlu1 %v7360_v56, %s9748_s6 }
 0x624   : > { %v2182_v45 = vpop.f32.mrf.mxu2 }
 0x62b   : > { %6640 = vrot.lane.b32.xlu1 %v7556_v12, %s9750_s27 }
 0x633   : > { %2711 = vrot.lane.b32.xlu1 %v7358_v55, %s9748_s6 }
 0x636   : > { %v1246_v41 = vpop.xlane.xlu0 %1245 }
 0x637   : > { %6809 = vrcp.f32 %v1246_v41  ;;  %v1279_v28 = vand.u32 2147483648, %v1246_v41  ;;  %v1277_v21 = vand.u32 2147483647, %v1246_v41  ;;  %vm1273_vm9 = vweird.f32 %v1246_v41 }
 0x639   : > { %v1280_v50 = vor.u32 1.1754944e-38, %v1279_v28  ;;  %vm1278_vm11 = vcmp.eq.f32.partialorder %v1277_v21, 8.507059e+37  ;;  %v7925_v21 = vld [vmem:[%s7429_s5 + $0x10] sm:$0xff] }
 0x63d   : > { %v6810_v17 = vpop.eup %6809 }
 0x63e   : > { %v1269_v47 = vmul.f32 %v6810_v17, %v1246_v41  ;;  %v1695_v33 = vpop.xlane.xlu0 %1694  ;;  %vm1274_vm8 = vweird.f32 %v6810_v17 }
 0x63f   : > { %v1711_v18 = vsub.f32 %v1604_v10, %v1695_v33  ;;  %vm1275_vm10 = vmor %vm1273_vm9, %vm1274_vm8  ;;  %v1293_v10 = vand.u32 2147483648, %v1249_v8  ;;  %v920_v33 = vmul.f32 %v7881_v54, %v7691_v26  ;;  %v921_v26 = vmul.f32 %v7925_v21, %v7881_v54 }
 0x640   : > { %v1270_v24 = vsub.f32 1.0, %v1269_v47 }
 0x641   : > { %v1722_v27 = vmul.f32 1.442695, %v1711_v18  ;;  %v1294_v18 = vor.u32 1.1754944e-38, %v1293_v10  ;;  %v928_v8 = vadd.f32 %v920_v33, %v7708_v30 }
 0x642   : > { %v1271_v31 = vmul.f32 %v6810_v17, %v1270_v24 }
 0x643   : > { %v7906_v29 = vpop.f32.mrf.mxu3  ;;  %6811 = vpow2.f32 %v1722_v27 }
 0x644   : > { %v1272_v48 = vadd.f32 %v6810_v17, %v1271_v31 }
 0x646   : > { %v1276_v32 = vsel %vm1275_vm10, %v6810_v17, %v1272_v48  ;;  %v1290_v17 = vsel %vm1289_vm14, %v6808_v39, %v1286_v11  ;;  %v7922_v39 = vsub.f32 %v928_v8, %v7888_v44 }
 0x647   : > { %v1281_v15 = vsel %vm1278_vm11, %v1280_v50, %v1276_v32  ;;  %v929_v50 = vadd.f32 %v921_v26, %v7536_v22  ;;  %v7934_v32 = vld [vmem:[%s7429_s5 + $0x30] sm:$0xff] }
 0x648   : > { %v1380_v20 = vmul.f32 %v7849_v51, %v1281_v15  ;;  %v1295_v51 = vsel %vm1292_vm15, %v1294_v18, %v1290_v17  ;;  %9810 = vst [vmem:[#allocation32_spill] sm:$0xff] %v7922_v39  ;;  %v925_v11 = vmul.f32 %v7934_v32, %v7881_v54 }
 0x649   : > { %v7909_v47 = vpop.eup %6811  ;;  %v1381_v24 = vmul.f32 %v7823_v9, %v1295_v51  ;;  %v7930_v9 = vadd.f32 %v2182_v45, %v7922_v39  ;;  %v7939_v14 = vsub.f32 %v929_v50, %v7888_v44 }
 0x64a   : > { %6232 = vmatmul.msk.f32.vlgmr.msra.gmra.mxu0 %vm1195_vm4, %v1380_v20  ;;  %v1741_v41 = vsel %vm1195_vm4, %v7909_v47, 0.0  ;;  %v933_v18 = vadd.f32 %v925_v11, %v7475_v36 }
 0x64b   : > { %v7912_v5 = vpop.f32.mrf.mxu3  ;;  %1742 = vadd.xlane.f32.xlu2 %v1741_v41  ;;  %9811 = vst [vmem:[#allocation33_spill] sm:$0xff] %v7939_v14  ;;  %v7942_v41 = vld [vmem:[%s7429_s5 + $0x18] sm:$0xff]  ;;  %v2305_v33 = vsel %vm1195_vm4, %v7930_v9, -inf }
 0x64c   : > { %v922_v17 = vmul.f32 %v7942_v41, %v7881_v54 }
 0x651   : > { %v6626_v28 = vpop.permute.xlu0 %6625 }
 0x652   : > { %v6627_v27 = vunpack.i.l.bf16 %v6626_v28  ;;  %6233 = vmatmul.msk.f32.gmra.mxu0 %vm1195_vm4, %v1381_v24  ;;  %v6628_v48 = vunpack.i.h.bf16 %v6626_v28  ;;  %v930_v24 = vadd.f32 %v922_v17, %v7587_v3  ;;  %v7954_v28 = vsub.f32 %v933_v18, %v7888_v44 }
 0x653   : > { %v2218_v31 = vpop.f32.mrf.mxu3 }
 0x654   : > { %1937 = vmatpush.msrb.mxu1 %v6627_v27  ;;  %v7950_v8 = vadd.f32 %v2218_v31, %v7939_v14  ;;  %9812 = vst [vmem:[#allocation34_spill] sm:$0xff] %v7954_v28  ;;  %v7957_v26 = vsub.f32 %v930_v24, %v7888_v44  ;;  %v7967_v31 = vld [vmem:[%s7429_s5 + $0x38] sm:$0xff] }
 0x655   : > { %v926_v50 = vmul.f32 %v7967_v31, %v7881_v54 }
 0x656   : > { %1938 = vmatpush.msrb.mxu1 %v6628_v48  ;;  %9813 = vst [vmem:[#allocation35_spill] sm:$0xff] %v7957_v26  ;;  %v2308_v48 = vsel %vm1195_vm4, %v7950_v8, -inf }
 0x659   : > { %v6631_v15 = vpop.permute.xlu0 %6630 }
 0x65a   : > { %v6632_v10 = vunpack.i.l.bf16 %v6631_v15  ;;  %v6633_v51 = vunpack.i.h.bf16 %v6631_v15 }
 0x65b   : > { %v2221_v20 = vpop.f32.mrf.mxu3 }
 0x65c   : > { %2520 = vmatpush.msra.mxu2 %v6632_v10  ;;  %v7974_v15 = vadd.f32 %v2221_v20, %v7957_v26  ;;  %v934_v10 = vadd.f32 %v926_v50, %v7510_v2 }
 0x65d   : > { %2306 = vmax.xlane.f32.xlu1 %v2305_v33 }
 0x65e   : > { %2521 = vmatpush.msra.mxu2 %v6633_v51  ;;  %v7978_v17 = vsub.f32 %v934_v10, %v7888_v44  ;;  %v2311_v33 = vsel %vm1195_vm4, %v7974_v15, -inf }
 0x660   : > { %9814 = vst [vmem:[#allocation36_spill] sm:$0xff] %v7978_v17 }
 0x661   : > { %v2708_v35 = vpop.permute.xlu0 %2707 }
 0x663   : > { %v2296_v27 = vpop.f32.mrf.mxu3  ;;  %1534 = vrot.lane.b32.xlu2 %v7360_v56, %s9809_s28 }
 0x664   : > { %v7960_v45 = vadd.f32 %v2296_v27, %v7954_v28 }
 0x665   : > { %2309 = vmax.xlane.f32.xlu1 %v2308_v48 }
 0x666   : > { %v2320_v11 = vsel %vm1195_vm4, %v7960_v45, -inf }
 0x667   : > { %2321 = vmax.xlane.f32.xlu0 %v2320_v11 }
 0x66b   : > { %1528 = vrot.lane.b32.xlu2 %v7358_v55, %s9815_s30  ;;  %v2299_v18 = vpop.f32.mrf.mxu3  ;;  %v1043_v55 = vld [vmem:[%s9687_s11] sm:$0xff] }
 0x66c   : > { %v7985_v51 = vadd.f32 %v2299_v18, %v7978_v17  ;;  %2120 = vmatpush.msra.mxu1 %v1043_v55 }
 0x66d   : > { %2312 = vmax.xlane.f32.xlu1 %v2311_v33 }
 0x66e   : > { %v2323_v20 = vsel %vm1195_vm4, %v7985_v51, -inf }
 0x673   : > { %1530 = vrot.lane.b32.xlu2 %v7360_v56, %s9815_s30 }
 0x675   : > { %v1740_v24 = vpop.xlane.xlu1 %1739  ;;  %2324 = vmax.xlane.f32.xlu1 %v2323_v20 }
 0x676   : > { %6813 = vrcp.f32 %v1740_v24  ;;  %v1795_v11 = vand.u32 2147483648, %v1740_v24  ;;  %v1793_v33 = vand.u32 2147483647, %v1740_v24  ;;  %vm1789_vm3 = vweird.f32 %v1740_v24 }
 0x678   : > { %v1796_v20 = vor.u32 1.1754944e-38, %v1795_v11  ;;  %vm1794_vm6 = vcmp.eq.f32.partialorder %v1793_v33, 8.507059e+37  ;;  %v2257_v11 = vpop.f32.mrf.mxu2 }
 0x67b   : > { %2750 = vrot.lane.b32.xlu0 %v7364_v57, %s9748_s6  ;;  %6635 = vrot.lane.b32.xlu2 %v7499_v63, %s9750_s27 }
 0x67c   : > { %v6814_v27 = vpop.eup %6813 }
 0x67d   : > { %v1785_v48 = vmul.f32 %v6814_v27, %v1740_v24  ;;  %vm1790_vm2 = vweird.f32 %v6814_v27  ;;  %v8007_v24 = vld [vmem:[%s7429_s5 + $0x20] sm:$0xff] }
 0x67e   : > { %vm1791_vm5 = vmor %vm1789_vm3, %vm1790_vm2 }
 0x67f   : > { %v1786_v50 = vsub.f32 1.0, %v1785_v48 }
 0x681   : > { %v1787_v10 = vmul.f32 %v6814_v27, %v1786_v50 }
 0x683   : > { %v1788_v18 = vadd.f32 %v6814_v27, %v1787_v10  ;;  %2746 = vrot.lane.b32.xlu0 %v7364_v57, %s9746_s23  ;;  %v923_v57 = vmul.f32 %v8007_v24, %v7881_v54 }
 0x685   : > { %v1792_v55 = vsel %vm1791_vm5, %v6814_v27, %v1788_v18  ;;  %v931_v27 = vadd.f32 %v923_v57, %v7441_v16 }
 0x686   : > { %v1797_v39 = vsel %vm1794_vm6, %v1796_v20, %v1792_v55 }
 0x687   : > { %v1870_v28 = vmul.f32 %v7875_v52, %v1797_v39  ;;  %v8014_v52 = vsub.f32 %v931_v27, %v7888_v44  ;;  %v8017_v39 = vld [vmem:[%s7429_s5 + $0x28] sm:$0xff]  ;;  %v2260_v27 = vpop.f32.mrf.mxu2 }
 0x689   : > { %6258 = vmatmul.msk.f32.vlgmr.msrb.gmra.mxu1 %vm1195_vm4, %v1870_v28  ;;  %9816 = vst [vmem:[#allocation37_spill] sm:$0xff] %v8014_v52  ;;  %v924_v28 = vmul.f32 %v8017_v39, %v7881_v54  ;;  %v8022_v18 = vadd.f32 %v2257_v11, %v8014_v52 }
 0x68b   : > { %6645 = vrot.lane.b32.xlu0 %v7493_v53, %s9750_s27  ;;  %v932_v20 = vadd.f32 %v924_v28, %v7459_v25  ;;  %s9853_s27 = smov 64  }
 0x68d   : > { %v1533_v48 = vpop.permute.xlu1 %1532  ;;  %v8026_v57 = vsub.f32 %v932_v20, %v7888_v44 }
 0x68e   : > { %2752 = vrot.lane.b32.xlu1 %v7368_v58, %s9748_s6 }
 0x68f   : > { %9817 = vst [vmem:[#allocation38_spill] sm:$0xff] %v8026_v57  ;;  %v8032_v26 = vadd.f32 %v2260_v27, %v8026_v57 }
 0x691   : > { %v2317_v28 = vsel %vm1195_vm4, %v8032_v26, -inf }
 0x695   : > { %v2714_v50 = vpop.permute.xlu1 %2713 }
 0x696   : > { %6312 = vmatpush.xpose.msk.msrb.mxu1 %vm662_vm0, %v2714_v50  ;;  %v2314_v50 = vsel %vm1195_vm4, %v8022_v18, -inf }
 0x69d   : > { %v6641_v10 = vpop.permute.xlu1 %6640 }
 0x69e   : > { %v6642_v33 = vunpack.i.l.bf16 %v6641_v10  ;;  %v6643_v55 = vunpack.i.h.bf16 %v6641_v10 }
 0x6a0   : > { %2555 = vmatpush.msrb.mxu3 %v6642_v33 }
 0x6a2   : > { %2556 = vmatpush.msrb.mxu3 %v6643_v55 }
 0x6a4   : > { %2315 = vmax.xlane.f32.xlu2 %v2314_v50 }
 0x6a5   : > { %v2712_v54 = vpop.permute.xlu1 %2711 }
 0x6a6   : > { %6313 = vmatpush.xpose.msk.msrb.mxu1 %vm662_vm0, %v2712_v54 }
 0x6ac   : > { %2318 = vmax.xlane.f32.xlu2 %v2317_v28 }
 0x6be   : > { %v1743_v11 = vpop.xlane.xlu2 %1742 }
 0x6bf   : > { %6815 = vrcp.f32 %v1743_v11  ;;  %v1809_v55 = vand.u32 2147483648, %v1743_v11  ;;  %v1807_v27 = vand.u32 2147483647, %v1743_v11  ;;  %vm1803_vm8 = vweird.f32 %v1743_v11 }
 0x6c1   : > { %v1810_v28 = vor.u32 1.1754944e-38, %v1809_v55  ;;  %vm1808_vm10 = vcmp.eq.f32.partialorder %v1807_v27, 8.507059e+37 }
 0x6c4   : > { %2709 = vrot.lane.b32.xlu2 %v7360_v56, %s9746_s23 }
 0x6c5   : > { %v6816_v44 = vpop.eup %6815 }
 0x6c6   : > { %v1799_v10 = vmul.f32 %v6816_v44, %v1743_v11  ;;  %v1535_v33 = vpop.permute.xlu2 %1534  ;;  %vm1804_vm7 = vweird.f32 %v6816_v44 }
 0x6c7   : > { %6240 = vmatpush.xpose.msk.msrb.mxu0 %vm662_vm0, %v1535_v33  ;;  %vm1805_vm9 = vmor %vm1803_vm8, %vm1804_vm7  ;;  %v1417_v11 = vpop.f32.mrf.mxu0 }
 0x6c8   : > { %v1800_v20 = vsub.f32 1.0, %v1799_v10 }
 0x6ca   : > { %v1801_v50 = vmul.f32 %v6816_v44, %v1800_v20 }
 0x6cb   : > { %6241 = vmatpush.xpose.msk.msrb.mxu0 %vm662_vm0, %v1533_v48 }
 0x6cc   : > { %v1802_v54 = vadd.f32 %v6816_v44, %v1801_v50 }
 0x6ce   : > { %v1529_v57 = vpop.permute.xlu2 %1528  ;;  %v1806_v52 = vsel %vm1805_vm9, %v6816_v44, %v1802_v54  ;;  %v2304_v44 = vpop.xlane.xlu0 %2303 }
 0x6cf   : > { %6242 = vmatmul.msk.f32.vlgmr.msrb.gmra.mxu0 %vm662_vm0, %v1529_v57  ;;  %v1811_v49 = vsel %vm1808_vm10, %v1810_v28, %v1806_v52  ;;  %v1420_v28 = vpop.f32.mrf.mxu0 }
 0x6d0   : > { %v2307_v56 = vpop.xlane.xlu1 %2306  ;;  %v1871_v33 = vmul.f32 %v7909_v47, %v1811_v49 }
 0x6d1   : > { %v2327_v10 = vsub.f32 %v7930_v9, %v2307_v56  ;;  %v2326_v9 = vsub.f32 %v7896_v13, %v2304_v44 }
 0x6d2   : > { %6259 = vmatmul.msk.f32.gmra.mxu1 %vm1195_vm4, %v1871_v33 }
 0x6d3   : > { %v2336_v20 = vmul.f32 1.442695, %v2327_v10  ;;  %v2334_v27 = vmul.f32 1.442695, %v2326_v9 }
 0x6d5   : > { %6817 = vpow2.f32 %v2336_v20 }
 0x6d6   : > { %v1531_v48 = vpop.permute.xlu2 %1530 }
 0x6d7   : > { %6243 = vmatmul.msk.f32.gmra.mxu0 %vm662_vm0, %v1531_v48 }
 0x6d8   : > { %v2310_v55 = vpop.xlane.xlu1 %2309 }
 0x6d9   : > { %v2328_v50 = vsub.f32 %v7950_v8, %v2310_v55 }
 0x6da   : > { %6272 = vmatmul.msk.f32.vlgmr.msra.gmra.mxu1 %vm662_vm0, %v1417_v11  ;;  %v2322_v8 = vpop.xlane.xlu0 %2321 }
 0x6db   : > { %v8046_v57 = vpop.eup %6817  ;;  %v2338_v52 = vmul.f32 1.442695, %v2328_v50  ;;  %v2332_v9 = vsub.f32 %v7960_v45, %v2322_v8 }
 0x6dc   : > { %v2353_v49 = vsel %vm1195_vm4, %v8046_v57, 0.0 }
 0x6dd   : > { %6819 = vpow2.f32 %v2338_v52  ;;  %2354 = vadd.xlane.f32.xlu0 %v2353_v49 }
 0x6de   : > { %v6636_v47 = vpop.permute.xlu2 %6635  ;;  %6821 = vpow2.f32 %v2334_v27 }
 0x6df   : > { %v6637_v54 = vunpack.i.l.bf16 %v6636_v47  ;;  %v6638_v56 = vunpack.i.h.bf16 %v6636_v47 }
 0x6e1   : > { %2590 = vmatpush.msrb.mxu2 %v6637_v54 }
 0x6e2   : > { %6273 = vmatmul.msk.f32.gmra.mxu1 %vm662_vm0, %v1420_v28 }
 0x6e3   : > { %v8052_v10 = vpop.eup %6819  ;;  %2591 = vmatpush.msrb.mxu2 %v6638_v56 }
 0x6e4   : > { %v2356_v13 = vsel %vm1195_vm4, %v8052_v10, 0.0  ;;  %v8057_v33 = vpop.eup %6821 }
 0x6e5   : > { %2357 = vadd.xlane.f32.xlu1 %v2356_v13  ;;  %v2350_v20 = vsel %vm1195_vm4, %v8057_v33, 0.0 }
 0x6ea   : > { %6274 = vmatmul.msk.f32.gmra.mxu1 %vm662_vm0, %v7802_v43  ;;  %v2313_v43 = vpop.xlane.xlu1 %2312 }
 0x6ed   : > { %v8063_v48 = vpop.permute.xlu0 %2750  ;;  %2351 = vadd.xlane.f32.xlu2 %v2350_v20 }
 0x6f2   : > { %6275 = vmatmul.msk.f32.gmra.mxu1 %vm662_vm0, %v7804_v6  ;;  %v2325_v49 = vpop.xlane.xlu1 %2324 }
 0x6f5   : > { %v8067_v11 = vpop.permute.xlu0 %2746 }
 0x6fa   : > { %6276 = vmatmul.msk.f32.gmra.mxu1 %vm662_vm0, %v7647_v34 }
 0x6fd   : > { %v6646_v55 = vpop.permute.xlu0 %6645 }
 0x6fe   : > { %v6647_v44 = vunpack.i.l.bf16 %v6646_v55  ;;  %v6648_v50 = vunpack.i.h.bf16 %v6646_v55  ;;  %v2329_v55 = vsub.f32 %v7974_v15, %v2313_v43 }
 0x700   : > { %2625 = vmatpush.msra.mxu3 %v6647_v44  ;;  %v8112_v44 = vpop.permute.xlu1 %2752 }
 0x702   : > { %2626 = vmatpush.msra.mxu3 %v6648_v50  ;;  %6277 = vmatmul.msk.f32.gmra.mxu1 %vm662_vm0, %v7653_v4  ;;  %v2346_v4 = vmul.f32 1.442695, %v2332_v9  ;;  %v2340_v50 = vmul.f32 1.442695, %v2329_v55 }
 0x705   : > { %2791 = vrot.lane.b32.xlu2 %v7376_v60, %s9748_s6 }
 0x706   : > { %v8107_v20 = vpop.f32.mrf.mxu1 }
 0x70a   : > { %6278 = vmatmul.msk.f32.gmra.mxu1 %vm662_vm0, %v7679_v37  ;;  %v2333_v37 = vsub.f32 %v7985_v51, %v2325_v49 }
 0x712   : > { %6279 = vmatmul.msk.f32.gmra.mxu1 %vm662_vm0, %v7683_v1 }
 0x717   : > { %v2316_v6 = vpop.xlane.xlu2 %2315 }
 0x718   : > { %v2330_v34 = vsub.f32 %v8022_v18, %v2316_v6 }
 0x71a   : > { %v2342_v52 = vmul.f32 1.442695, %v2330_v34  ;;  %6314 = vmatmul.msk.f32.vlgmr.msrb.gmra.mxu1 %vm662_vm0, %v2708_v35  ;;  %v2348_v35 = vmul.f32 1.442695, %v2333_v37 }
 0x71c   : > { %6823 = vpow2.f32 %v2342_v52 }
 0x71d   : > { %6825 = vpow2.f32 %v2346_v4 }
 0x71f   : > { %v2319_v47 = vpop.xlane.xlu2 %2318 }
 0x720   : > { %v2331_v27 = vsub.f32 %v8032_v26, %v2319_v47 }
 0x722   : > { %v8083_v54 = vpop.eup %6823  ;;  %v2344_v1 = vmul.f32 1.442695, %v2331_v27 }
 0x723   : > { %v2362_v18 = vsel %vm1195_vm4, %v8083_v54, 0.0  ;;  %v8089_v45 = vpop.eup %6825 }
 0x724   : > { %6827 = vpow2.f32 %v2344_v1  ;;  %2363 = vadd.xlane.f32.xlu0 %v2362_v18  ;;  %v2368_v51 = vsel %vm1195_vm4, %v8089_v45, 0.0 }
 0x725   : > { %6829 = vpow2.f32 %v2348_v35 }
 0x726   : > { %6831 = vpow2.f32 %v2340_v50 }
 0x727   : > { %v2710_v28 = vpop.permute.xlu2 %2709 }
 0x728   : > { %6315 = vmatmul.msk.f32.gmra.mxu1 %vm662_vm0, %v2710_v28 }
 0x72a   : > { %v8091_v56 = vpop.eup %6827 }
 0x72b   : > { %v2365_v26 = vsel %vm1195_vm4, %v8091_v56, 0.0  ;;  %v8097_v13 = vpop.eup %6829 }
 0x72c   : > { %2366 = vadd.xlane.f32.xlu1 %v2365_v26  ;;  %v2371_v8 = vsel %vm1195_vm4, %v8097_v13, 0.0  ;;  %v8121_v34 = vpop.eup %6831  ;;  %v8134_v26 = vld [vmem:[%s7429_s5 + $0x8] sm:$0xff] }
 0x72d   : > { %v2359_v47 = vsel %vm1195_vm4, %v8121_v34, 0.0 }
 0x72e   : > { %2369 = vadd.xlane.f32.xlu2 %v2368_v51  ;;  %v891_v51 = vmul.f32 %v8134_v26, %v7649_v19 }
 0x730   : > { %v899_v14 = vadd.f32 %v891_v51, %v7708_v30 }
 0x734   : > { %2372 = vadd.xlane.f32.xlu1 %v2371_v8 }
 0x738   : > { %2748 = vrot.lane.b32.xlu0 %v7368_v58, %s9746_s23 }
 0x746   : > { %2787 = vrot.lane.b32.xlu2 %v7376_v60, %s9746_s23 }
 0x74c   : > { %v8131_v35 = vpop.f32.mrf.mxu0 }
 0x74d   : > { %2785 = vrot.lane.b32.xlu1 %v7372_v59, %s9746_s23 }
 0x74e   : > { %2828 = vrot.lane.b32.xlu2 %v7380_v61, %s9748_s6 }
 0x74f   : > { %v8114_v6 = vpop.f32.mrf.mxu1 }
 0x750   : > { %v8118_v60 = vpop.xlane.xlu0 %2354 }
 0x751   : > { %vm2393_vm7 = vweird.f32 %v8118_v60 }
 0x756   : > { %2826 = vrot.lane.b32.xlu2 %v7386_v62, %s9746_s23 }
 0x757   : > { %v8123_v15 = vpop.f32.mrf.mxu1 }
 0x758   : > { %v2358_v58 = vpop.xlane.xlu1 %2357  ;;  %9818 = vst [vmem:[#allocation39_spill] sm:$0xff] %v8123_v15 }
 0x759   : > { %6833 = vrcp.f32 %v2358_v58  ;;  %v2413_v27 = vand.u32 2147483648, %v2358_v58  ;;  %v2411_v1 = vand.u32 2147483647, %v2358_v58  ;;  %vm2407_vm12 = vweird.f32 %v2358_v58 }
 0x75a   : > { %6835 = vrcp.f32 %v8118_v60 }
 0x75b   : > { %v2414_v8 = vor.u32 1.1754944e-38, %v2413_v27  ;;  %vm2412_vm14 = vcmp.eq.f32.partialorder %v2411_v1, 8.507059e+37  ;;  %v8146_v1 = vsub.f32 %v899_v14, %v7656_v38 }
 0x75f   : > { %v6834_v52 = vpop.eup %6833  ;;  %v8140_v42 = vpop.f32.mrf.mxu1 }
 0x760   : > { %v2403_v9 = vmul.f32 %v6834_v52, %v2358_v58  ;;  %v2352_v43 = vpop.xlane.xlu2 %2351  ;;  %v8125_v4 = vpop.eup %6835  ;;  %vm2408_vm11 = vweird.f32 %v6834_v52 }
 0x761   : > { %6837 = vrcp.f32 %v2352_v43  ;;  %v2389_v18 = vmul.f32 %v8125_v4, %v8118_v60  ;;  %vm2409_vm13 = vmor %vm2407_vm12, %vm2408_vm11  ;;  %v2383_v27 = vand.u32 2147483647, %v2352_v43  ;;  %vm2379_vm2 = vweird.f32 %v2352_v43 }
 0x762   : > { %v2404_v49 = vsub.f32 1.0, %v2403_v9  ;;  %2360 = vadd.xlane.f32.xlu0 %v2359_v47  ;;  %vm2394_vm6 = vweird.f32 %v8125_v4 }
 0x763   : > { %v2390_v9 = vsub.f32 1.0, %v2389_v18  ;;  %v1564_v18 = vpop.f32.mrf.mxu0  ;;  %vm2384_vm5 = vcmp.eq.f32.partialorder %v2383_v27, 8.507059e+37  ;;  %vm2395_vm8 = vmor %vm2393_vm7, %vm2394_vm6 }
 0x764   : > { %v2405_v37 = vmul.f32 %v6834_v52, %v2404_v49 }
 0x766   : > { %v2406_v28 = vadd.f32 %v6834_v52, %v2405_v37  ;;  %v2385_v37 = vand.u32 2147483648, %v2352_v43 }
 0x767   : > { %v6838_v55 = vpop.eup %6837 }
 0x768   : > { %v2410_v50 = vsel %vm2409_vm13, %v6834_v52, %v2406_v28  ;;  %v2375_v49 = vmul.f32 %v6838_v55, %v2352_v43  ;;  %v2792_v40 = vpop.permute.xlu2 %2791  ;;  %vm2380_vm15 = vweird.f32 %v6838_v55  ;;  %v2391_v52 = vmul.f32 %v8125_v4, %v2390_v9  ;;  %v8157_v43 = vpop.f32.mrf.mxu1 }
 0x769   : > { %v2415_v47 = vsel %vm2412_vm14, %v2414_v8, %v2410_v50  ;;  %vm2381_vm3 = vmor %vm2379_vm2, %vm2380_vm15  ;;  %v2386_v28 = vor.u32 1.1754944e-38, %v2385_v37  ;;  %v2399_v50 = vand.u32 2147483648, %v8118_v60 }
 0x76a   : > { %v2488_v17 = vmul.f32 %v8052_v10, %v2415_v47  ;;  %v2376_v58 = vsub.f32 1.0, %v2375_v49  ;;  %v2392_v8 = vadd.f32 %v8125_v4, %v2391_v52 }
 0x76b   : > { %v2400_v9 = vor.u32 1.1754944e-38, %v2399_v50 }
 0x76c   : > { %6298 = vmatmul.msk.f32.vlgmr.msrb.gmra.mxu3 %vm1195_vm4, %v2488_v17  ;;  %v2377_v15 = vmul.f32 %v6838_v55, %v2376_v58  ;;  %v7024_v58 = vld [vmem:[%s7429_s5] sm:$0xff]  ;;  %s964_s5 = smul.f32 %s8181_s24, %s8181_s24  ;;  %s9744_s24 = smov 40  }
 0x76d   : > { %6320 = vmatpush.xpose.msk.msrb.mxu3 %vm662_vm0, %v2792_v40  ;;  %v8152_v40 = vadd.f32 %v1564_v18, %v8146_v1  ;;  %v890_v37 = vmul.f32 %v7024_v58, %v7649_v19 }
 0x76e   : > { %v2378_v10 = vadd.f32 %v6838_v55, %v2377_v15  ;;  %v2397_v15 = vand.u32 2147483647, %v8118_v60 }
 0x76f   : > { %v898_v52 = vadd.f32 %v890_v37, %v7767_v7 }
 0x770   : > { %v2382_v51 = vsel %vm2381_vm3, %v6838_v55, %v2378_v10  ;;  %v2396_v55 = vsel %vm2395_vm8, %v8125_v4, %v2392_v8  ;;  %vm2398_vm9 = vcmp.eq.f32.partialorder %v2397_v15, 8.507059e+37  ;;  %v8171_v4 = vpop.f32.mrf.mxu1 }
 0x771   : > { %v2387_v17 = vsel %vm2384_vm5, %v2386_v28, %v2382_v51  ;;  %v2401_v60 = vsel %vm2398_vm9, %v2400_v9, %v2396_v55  ;;  %v8189_v51 = vstv %s946_s2  ;;  %v8192_v50 = vsub.f32 %v898_v52, %v7656_v38  ;;  %s9867_s2 = smov 48  }
 0x772   : > { %v2486_v14 = vmul.f32 %v8057_v33, %v2387_v17  ;;  %v1687_v33 = vsel %vm1195_vm4, %v8152_v40, -inf  ;;  %v2487_v49 = vmul.f32 %v8046_v57, %v2401_v60  ;;  %v948_v55 = vmul.f32 %v7024_v58, %v8189_v51 }
 0x773   : > { %9819 = vst [vmem:[#allocation40_spill] sm:$0xff] %v8192_v50  ;;  %v8206_v58 = vstv %s964_s5  ;;  %s6067_s5 = scalar_lea.hbm %s9694_s18, %s7263_s29 }
 0x774   : > { %6296 = vmatmul.msk.f32.vlgmr.msra.gmra.mxu2 %vm1195_vm4, %v2486_v14  ;;  %v956_v37 = vadd.f32 %v948_v55, %v7767_v7 }
 0x775   : > { %6316 = vmatpush.xpose.msk.msra.mxu2 %vm662_vm0, %v8112_v44 }
 0x776   : > { %2789 = vrot.lane.b32.xlu0 %v7372_v59, %s9748_s6 }
 0x777   : > { %1688 = vmax.xlane.f32.xlu1 %v1687_v33 }
 0x778   : > { %v8177_v59 = vpop.f32.mrf.mxu1 }
 0x779   : > { %6317 = vmatpush.xpose.msk.msra.mxu2 %vm662_vm0, %v8063_v48 }
 0x77c   : > { %6297 = vmatmul.msk.f32.gmra.mxu2 %vm1195_vm4, %v2487_v49 }
 0x77e   : > { %2830 = vrot.lane.b32.xlu0 %v7386_v62, %s9748_s6  ;;  %s9860_s6 = smov 112  }
 0x780   : > { %v8179_v44 = vpop.f32.mrf.mxu1 }
 0x786   : > { %2824 = vrot.lane.b32.xlu0 %v7380_v61, %s9746_s23  ;;  %s9859_s23 = smov 80  }
 0x788   : > { %v8183_v57 = vpop.f32.mrf.mxu1 }
 0x790   : > { %v8194_v19 = vpop.f32.mrf.mxu1 }
 0x797   : > { %v2364_v47 = vpop.xlane.xlu0 %2363 }
 0x798   : > { %6839 = vrcp.f32 %v2364_v47  ;;  %v2441_v10 = vand.u32 2147483648, %v2364_v47  ;;  %v2439_v28 = vand.u32 2147483647, %v2364_v47  ;;  %vm2435_vm11 = vweird.f32 %v2364_v47  ;;  %v2740_v7 = vpop.f32.mrf.mxu1 }
 0x79a   : > { %v2442_v14 = vor.u32 1.1754944e-38, %v2441_v10  ;;  %vm2440_vm13 = vcmp.eq.f32.partialorder %v2439_v28, 8.507059e+37 }
 0x79e   : > { %v6840_v48 = vpop.eup %6839 }
 0x79f   : > { %v2431_v27 = vmul.f32 %v6840_v48, %v2364_v47  ;;  %v2367_v62 = vpop.xlane.xlu1 %2366  ;;  %vm2436_vm10 = vweird.f32 %v6840_v48  ;;  %v8202_v47 = vadd.f32 %v8131_v35, %v8192_v50 }
 0x7a0   : > { %6841 = vrcp.f32 %v2367_v62  ;;  %vm2437_vm12 = vmor %vm2435_vm11, %vm2436_vm10  ;;  %v2455_v38 = vand.u32 2147483648, %v2367_v62  ;;  %vm2449_vm15 = vweird.f32 %v2367_v62 }
 0x7a1   : > { %v2432_v61 = vsub.f32 1.0, %v2431_v27  ;;  %v2453_v27 = vand.u32 2147483647, %v2367_v62  ;;  %v1684_v35 = vsel %vm1195_vm4, %v8202_v47, -inf }
 0x7a2   : > { %v2456_v52 = vor.u32 1.1754944e-38, %v2455_v38 }
 0x7a3   : > { %v2433_v18 = vmul.f32 %v6840_v48, %v2432_v61  ;;  %vm2454_vm3 = vcmp.eq.f32.partialorder %v2453_v27, 8.507059e+37 }
 0x7a5   : > { %v2434_v8 = vadd.f32 %v6840_v48, %v2433_v18 }
 0x7a6   : > { %v6842_v17 = vpop.eup %6841 }
 0x7a7   : > { %v2438_v15 = vsel %vm2437_vm12, %v6840_v48, %v2434_v8  ;;  %v2445_v9 = vmul.f32 %v6842_v17, %v2367_v62  ;;  %vm2450_vm14 = vweird.f32 %v6842_v17 }
 0x7a8   : > { %v2443_v33 = vsel %vm2440_vm13, %v2442_v14, %v2438_v15  ;;  %vm2451_vm2 = vmor %vm2449_vm15, %vm2450_vm14  ;;  %v2373_v15 = vpop.xlane.xlu1 %2372 }
 0x7a9   : > { %v2446_v60 = vsub.f32 1.0, %v2445_v9  ;;  %v2490_v49 = vmul.f32 %v8083_v54, %v2443_v33  ;;  %v8209_v54 = vsub.f32 %v956_v37, %v8206_v58  ;;  %vm2477_vm14 = vweird.f32 %v2373_v15 }
 0x7aa   : > { %v2749_v14 = vpop.permute.xlu0 %2748 }
 0x7ab   : > { %6300 = vmatmul.msk.f32.vlgmr.msrb.gmra.mxu2 %vm1195_vm4, %v2490_v49  ;;  %v2447_v48 = vmul.f32 %v6842_v17, %v2446_v60  ;;  %9820 = vst [vmem:[#allocation41_spill] sm:$0xff] %v8209_v54  ;;  %v8215_v8 = vadd.f32 %v2740_v7, %v8209_v54 }
 0x7ad   : > { %v2448_v61 = vadd.f32 %v6842_v17, %v2447_v48  ;;  %v2863_v62 = vsel %vm1195_vm4, %v8215_v8, -inf }
 0x7af   : > { %v2452_v10 = vsel %vm2451_vm2, %v6842_v17, %v2448_v61  ;;  %v2370_v17 = vpop.xlane.xlu2 %2369 }
 0x7b0   : > { %1685 = vmax.xlane.f32.xlu0 %v1684_v35  ;;  %v2457_v18 = vsel %vm2454_vm3, %v2456_v52, %v2452_v10  ;;  %6843 = vrcp.f32 %v2370_v17  ;;  %vm2463_vm10 = vweird.f32 %v2370_v17 }
 0x7b1   : > { %v2491_v28 = vmul.f32 %v8091_v56, %v2457_v18 }
 0x7b3   : > { %6301 = vmatmul.msk.f32.gmra.mxu2 %vm1195_vm4, %v2491_v28 }
 0x7b6   : > { %v6844_v56 = vpop.eup %6843 }
 0x7b7   : > { %v2459_v9 = vmul.f32 %v6844_v56, %v2370_v17  ;;  %vm2464_vm7 = vweird.f32 %v6844_v56  ;;  %v2788_v50 = vpop.permute.xlu2 %2787 }
 0x7b8   : > { %2864 = vmax.xlane.f32.xlu0 %v2863_v62  ;;  %vm2465_vm11 = vmor %vm2463_vm10, %vm2464_vm7 }
 0x7b9   : > { %v2460_v60 = vsub.f32 1.0, %v2459_v9 }
 0x7bb   : > { %6318 = vmatmul.msk.f32.vlgmr.msra.gmra.mxu2 %vm662_vm0, %v8067_v11  ;;  %v2461_v11 = vmul.f32 %v6844_v56, %v2460_v60 }
 0x7bd   : > { %v2462_v18 = vadd.f32 %v6844_v56, %v2461_v11 }
 0x7bf   : > { %v2786_v35 = vpop.permute.xlu1 %2785  ;;  %v2466_v54 = vsel %vm2465_vm11, %v6844_v56, %v2462_v18  ;;  %v2481_v56 = vand.u32 2147483647, %v2373_v15 }
 0x7c1   : > { %vm2482_vm2 = vcmp.eq.f32.partialorder %v2481_v56, 8.507059e+37 }
 0x7c3   : > { %6319 = vmatmul.msk.f32.gmra.mxu2 %vm662_vm0, %v2749_v14  ;;  %v2469_v14 = vand.u32 2147483648, %v2370_v17 }
 0x7cc   : > { %6650 = vrot.lane.b32.xlu0 %v7792_v23, %s9752_s12  ;;  %s9849_s12 = smov 96  }
 0x7d5   : > { %v2361_v55 = vpop.xlane.xlu0 %2360 }
 0x7d6   : > { %6845 = vrcp.f32 %v2361_v55  ;;  %v2427_v48 = vand.u32 2147483648, %v2361_v55  ;;  %v2425_v52 = vand.u32 2147483647, %v2361_v55  ;;  %vm2421_vm6 = vweird.f32 %v2361_v55 }
 0x7d7   : > { %6847 = vrcp.f32 %v2373_v15 }
 0x7d8   : > { %v2428_v7 = vor.u32 1.1754944e-38, %v2427_v48  ;;  %vm2426_vm9 = vcmp.eq.f32.partialorder %v2425_v52, 8.507059e+37 }
 0x7dc   : > { %v6846_v33 = vpop.eup %6845 }
 0x7dd   : > { %v2417_v49 = vmul.f32 %v6846_v33, %v2361_v55  ;;  %v6848_v38 = vpop.eup %6847  ;;  %vm2422_vm5 = vweird.f32 %v6846_v33  ;;  %v2470_v55 = vor.u32 1.1754944e-38, %v2469_v14 }
 0x7de   : > { %v2473_v27 = vmul.f32 %v6848_v38, %v2373_v15  ;;  %vm2423_vm8 = vmor %vm2421_vm6, %vm2422_vm5  ;;  %vm2478_vm13 = vweird.f32 %v6848_v38 }
 0x7df   : > { %v2418_v37 = vsub.f32 1.0, %v2417_v49  ;;  %v2467_v49 = vand.u32 2147483647, %v2370_v17  ;;  %v2483_v17 = vand.u32 2147483648, %v2373_v15  ;;  %vm2479_vm15 = vmor %vm2477_vm14, %vm2478_vm13 }
 0x7e0   : > { %v2474_v28 = vsub.f32 1.0, %v2473_v27 }
 0x7e1   : > { %v2419_v61 = vmul.f32 %v6846_v33, %v2418_v37  ;;  %vm2468_vm12 = vcmp.eq.f32.partialorder %v2467_v49, 8.507059e+37  ;;  %v2484_v18 = vor.u32 1.1754944e-38, %v2483_v17 }
 0x7e2   : > { %v2471_v48 = vsel %vm2468_vm12, %v2470_v55, %v2466_v54 }
 0x7e3   : > { %v2420_v10 = vadd.f32 %v6846_v33, %v2419_v61  ;;  %v2475_v61 = vmul.f32 %v6848_v38, %v2474_v28 }
 0x7e5   : > { %v2424_v62 = vsel %vm2423_vm8, %v6846_v33, %v2420_v10  ;;  %v2476_v52 = vadd.f32 %v6848_v38, %v2475_v61 }
 0x7e6   : > { %v2429_v9 = vsel %vm2426_vm9, %v2428_v7, %v2424_v62 }
 0x7e7   : > { %v2489_v60 = vmul.f32 %v8121_v34, %v2429_v9  ;;  %v2492_v34 = vmul.f32 %v8089_v45, %v2471_v48  ;;  %v2480_v7 = vsel %vm2479_vm15, %v6848_v38, %v2476_v52  ;;  %v2743_v48 = vpop.f32.mrf.mxu1 }
 0x7e8   : > { %v2790_v37 = vpop.permute.xlu0 %2789  ;;  %v2485_v54 = vsel %vm2482_vm2, %v2484_v18, %v2480_v7 }
 0x7e9   : > { %6299 = vmatmul.msk.f32.gmra.mxu3 %vm1195_vm4, %v2489_v60  ;;  %v2493_v15 = vmul.f32 %v8097_v13, %v2485_v54 }
 0x7ea   : > { %6321 = vmatpush.xpose.msk.msrb.mxu3 %vm662_vm0, %v2790_v37  ;;  %v1689_v11 = vpop.xlane.xlu1 %1688  ;;  %v949_v37 = vmul.f32 %v8134_v26, %v8189_v51 }
 0x7eb   : > { %v1709_v33 = vsub.f32 %v8152_v40, %v1689_v11  ;;  %v2829_v40 = vpop.permute.xlu2 %2828 }
 0x7ec   : > { %v957_v61 = vadd.f32 %v949_v37, %v7708_v30 }
 0x7ed   : > { %v1718_v27 = vmul.f32 1.442695, %v1709_v33 }
 0x7ee   : > { %v8257_v33 = vsub.f32 %v957_v61, %v8206_v58 }
 0x7ef   : > { %6849 = vpow2.f32 %v1718_v27 }
 0x7f0   : > { %v2831_v10 = vpop.permute.xlu0 %2830  ;;  %v2744_v26 = vadd.f32 %v2743_v48, %v8257_v33 }
 0x7f1   : > { %6302 = vmatmul.msk.f32.vlgmr.msra.gmra.mxu3 %vm1195_vm4, %v2492_v34  ;;  %6324 = vmatpush.xpose.msk.msra.mxu1 %vm662_vm0, %v2831_v10 }
 0x7f2   : > { %v2866_v52 = vsel %vm1195_vm4, %v2744_v26, -inf }
 0x7f3   : > { %v2827_v38 = vpop.permute.xlu2 %2826 }
 0x7f5   : > { %v8232_v28 = vpop.eup %6849  ;;  %6325 = vmatpush.xpose.msk.msra.mxu1 %vm662_vm0, %v2829_v40 }
 0x7f6   : > { %v1735_v45 = vsel %vm1195_vm4, %v8232_v28, 0.0 }
 0x7f7   : > { %1736 = vadd.xlane.f32.xlu1 %v1735_v45  ;;  %v8243_v14 = vpop.f32.mrf.mxu2 }
 0x7f8   : > { %v2825_v62 = vpop.permute.xlu0 %2824 }
 0x7f9   : > { %6303 = vmatmul.msk.f32.gmra.mxu3 %vm1195_vm4, %v2493_v15  ;;  %6326 = vmatmul.msk.f32.vlgmr.msra.gmra.mxu1 %vm662_vm0, %v2825_v62  ;;  %v8282_v62 = vpop.f32.mrf.mxu3 }
 0x7ff   : > { %v8246_v60 = vpop.f32.mrf.mxu2 }
 0x801   : > { %6322 = vmatmul.msk.f32.vlgmr.msrb.gmra.mxu3 %vm662_vm0, %v2786_v35  ;;  %6327 = vmatmul.msk.f32.gmra.mxu1 %vm662_vm0, %v2827_v38 }
 0x809   : > { %6323 = vmatmul.msk.f32.gmra.mxu3 %vm662_vm0, %v2788_v50 }
 0x823   : > { %v1686_v9 = vpop.xlane.xlu0 %1685 }
 0x824   : > { %v1708_v49 = vsub.f32 %v8202_v47, %v1686_v9 }
 0x826   : > { %v1716_v13 = vmul.f32 1.442695, %v1708_v49 }
 0x828   : > { %6851 = vpow2.f32 %v1716_v13  ;;  %v955_v13 = vmul.f32 %v7967_v31, %v8189_v51 }
 0x82b   : > { %v2865_v55 = vpop.xlane.xlu0 %2864 }
 0x82c   : > { %v2887_v11 = vsub.f32 %v8215_v8, %v2865_v55  ;;  %v951_v8 = vmul.f32 %v7942_v41, %v8189_v51 }
 0x82e   : > { %v8251_v35 = vpop.eup %6851  ;;  %v8254_v50 = vpop.f32.mrf.mxu2  ;;  %v2895_v27 = vmul.f32 1.442695, %v2887_v11  ;;  %v959_v18 = vadd.f32 %v951_v8, %v7587_v3  ;;  %v954_v3 = vmul.f32 %v7934_v32, %v8189_v51  ;;  %v963_v11 = vadd.f32 %v955_v13, %v7510_v2 }
 0x82f   : > { %v1732_v47 = vsel %vm1195_vm4, %v8251_v35, 0.0 }
 0x830   : > { %1733 = vadd.xlane.f32.xlu2 %v1732_v47  ;;  %6853 = vpow2.f32 %v2895_v27  ;;  %v8275_v54 = vsub.f32 %v959_v18, %v8206_v58  ;;  %v962_v9 = vadd.f32 %v954_v3, %v7475_v36  ;;  %v8303_v36 = vsub.f32 %v963_v11, %v8206_v58 }
 0x832   : > { %9821 = vst [vmem:[#allocation42_spill] sm:$0xff] %v8275_v54  ;;  %v8290_v49 = vsub.f32 %v962_v9, %v8206_v58 }
 0x833   : > { %9823 = vst [vmem:[#allocation44_spill] sm:$0xff] %v8303_v36 }
 0x834   : > { %9822 = vst [vmem:[#allocation43_spill] sm:$0xff] %v8290_v49 }
 0x836   : > { %v8262_v30 = vpop.f32.mrf.mxu2  ;;  %v8267_v17 = vpop.eup %6853 }
 0x837   : > { %v2911_v7 = vsel %vm1195_vm4, %v8267_v17, 0.0 }
 0x838   : > { %2867 = vmax.xlane.f32.xlu2 %v2866_v52  ;;  %v953_v52 = vmul.f32 %v8017_v39, %v8189_v51 }
 0x83a   : > { %v961_v8 = vadd.f32 %v953_v52, %v7459_v25 }
 0x83e   : > { %v8269_v34 = vpop.f32.mrf.mxu2  ;;  %v6651_v56 = vpop.permute.xlu0 %6650 }
 0x83f   : > { %v6652_v10 = vunpack.i.l.bf16 %v6651_v56  ;;  %v6653_v40 = vunpack.i.h.bf16 %v6651_v56  ;;  %v8316_v56 = vsub.f32 %v961_v8, %v8206_v58 }
 0x840   : > { %2912 = vadd.xlane.f32.xlu2 %v2911_v7 }
 0x841   : > { %1902 = vmatpush.msra.mxu0 %v6652_v10 }
 0x843   : > { %1903 = vmatpush.msra.mxu0 %v6653_v40 }
 0x846   : > { %v2782_v45 = vpop.f32.mrf.mxu2 }
 0x847   : > { %v8278_v41 = vadd.f32 %v2782_v45, %v8275_v54 }
 0x849   : > { %v2872_v15 = vsel %vm1195_vm4, %v8278_v41, -inf }
 0x84a   : > { %2873 = vmax.xlane.f32.xlu2 %v2872_v15 }
 0x86a   : > { %v1737_v40 = vpop.xlane.xlu1 %1736 }
 0x86b   : > { %6855 = vrcp.f32 %v1737_v40  ;;  %vm1775_vm9 = vweird.f32 %v1737_v40 }
 0x86c   : > { %v8286_v38 = vpop.f32.mrf.mxu3 }
 0x871   : > { %v6856_v39 = vpop.eup %6855 }
 0x872   : > { %v1771_v15 = vmul.f32 %v6856_v39, %v1737_v40  ;;  %vm1776_vm8 = vweird.f32 %v6856_v39 }
 0x873   : > { %vm1777_vm10 = vmor %vm1775_vm9, %vm1776_vm8 }
 0x874   : > { %v8294_v37 = vpop.f32.mrf.mxu3  ;;  %v1772_v13 = vsub.f32 1.0, %v1771_v15 }
 0x876   : > { %v2857_v61 = vpop.f32.mrf.mxu1 }
 0x877   : > { %v8297_v55 = vadd.f32 %v2857_v61, %v8290_v49 }
 0x879   : > { %v2881_v32 = vsel %vm1195_vm4, %v8297_v55, -inf }
 0x87a   : > { %2882 = vmax.xlane.f32.xlu1 %v2881_v32 }
 0x87c   : > { %v8305_v47 = vpop.f32.mrf.mxu3 }
 0x87e   : > { %v2860_v48 = vpop.f32.mrf.mxu1 }
 0x87f   : > { %v8308_v31 = vadd.f32 %v2860_v48, %v8303_v36  ;;  %v950_v48 = vmul.f32 %v7925_v21, %v8189_v51 }
 0x881   : > { %v2884_v27 = vsel %vm1195_vm4, %v8308_v31, -inf  ;;  %v958_v49 = vadd.f32 %v950_v48, %v7536_v22 }
 0x882   : > { %2885 = vmax.xlane.f32.xlu0 %v2884_v27 }
 0x884   : > { %v2818_v2 = vpop.f32.mrf.mxu3 }
 0x88c   : > { %v2821_v10 = vpop.f32.mrf.mxu3 }
 0x88d   : > { %v8319_v7 = vadd.f32 %v2821_v10, %v8316_v56  ;;  %v1773_v10 = vmul.f32 %v6856_v39, %v1772_v13  ;;  %v8330_v13 = vsub.f32 %v958_v49, %v8206_v58 }
 0x88f   : > { %v2878_v18 = vsel %vm1195_vm4, %v8319_v7, -inf }
 0x890   : > { %2879 = vmax.xlane.f32.xlu2 %v2878_v18 }
 0x8a3   : > { %v1734_v45 = vpop.xlane.xlu2 %1733 }
 0x8a4   : > { %6857 = vrcp.f32 %v1734_v45  ;;  %v1767_v52 = vand.u32 2147483648, %v1734_v45  ;;  %v1765_v8 = vand.u32 2147483647, %v1734_v45  ;;  %vm1761_vm5 = vweird.f32 %v1734_v45 }
 0x8a6   : > { %v1768_v54 = vor.u32 1.1754944e-38, %v1767_v52  ;;  %vm1766_vm7 = vcmp.eq.f32.partialorder %v1765_v8, 8.507059e+37 }
 0x8aa   : > { %v6858_v3 = vpop.eup %6857 }
 0x8ab   : > { %v1757_v9 = vmul.f32 %v6858_v3, %v1734_v45  ;;  %v2868_v25 = vpop.xlane.xlu2 %2867  ;;  %vm1762_vm3 = vweird.f32 %v6858_v3  ;;  %v952_v45 = vmul.f32 %v8007_v24, %v8189_v51 }
 0x8ac   : > { %v2888_v61 = vsub.f32 %v2744_v26, %v2868_v25  ;;  %vm1763_vm6 = vmor %vm1761_vm5, %vm1762_vm3  ;;  %v1774_v26 = vadd.f32 %v6856_v39, %v1773_v10 }
 0x8ad   : > { %v1758_v11 = vsub.f32 1.0, %v1757_v9  ;;  %v1781_v9 = vand.u32 2147483648, %v1737_v40 }
 0x8ae   : > { %v2897_v32 = vmul.f32 1.442695, %v2888_v61  ;;  %v1779_v61 = vand.u32 2147483647, %v1737_v40  ;;  %v960_v40 = vadd.f32 %v952_v45, %v7441_v16 }
 0x8af   : > { %v1759_v27 = vmul.f32 %v6858_v3, %v1758_v11 }
 0x8b0   : > { %6859 = vpow2.f32 %v2897_v32  ;;  %vm1780_vm11 = vcmp.eq.f32.partialorder %v1779_v61, 8.507059e+37  ;;  %v8342_v24 = vsub.f32 %v960_v40, %v8206_v58 }
 0x8b1   : > { %v1760_v18 = vadd.f32 %v6858_v3, %v1759_v27  ;;  %v1044_v27 = vld [vmem:[%s9687_s11 + $0x8] sm:$0xff] }
 0x8b2   : > { %2055 = vmatpush.msrb.mxu0 %v1044_v27 }
 0x8b3   : > { %v1764_v36 = vsel %vm1763_vm6, %v6858_v3, %v1760_v18  ;;  %v8350_v16 = vpop.xlane.xlu2 %2912 }
 0x8b4   : > { %v1769_v15 = vsel %vm1766_vm7, %v1768_v54, %v1764_v36  ;;  %v1778_v54 = vsel %vm1777_vm10, %v6856_v39, %v1774_v26  ;;  %v1782_v36 = vor.u32 1.1754944e-38, %v1781_v9  ;;  %v2819_v39 = vadd.f32 %v2818_v2, %v8342_v24 }
 0x8b5   : > { %v1868_v21 = vmul.f32 %v8251_v35, %v1769_v15  ;;  %v2780_v35 = vadd.f32 %v8269_v34, %v8330_v13  ;;  %vm2940_vm13 = vweird.f32 %v8350_v16 }
 0x8b6   : > { %v8326_v25 = vpop.eup %6859  ;;  %v1783_v49 = vsel %vm1780_vm11, %v1782_v36, %v1778_v54  ;;  %v2875_v11 = vsel %vm1195_vm4, %v2819_v39, -inf }
 0x8b7   : > { %v2914_v22 = vsel %vm1195_vm4, %v8326_v25, 0.0  ;;  %6256 = vmatmul.msk.f32.vlgmr.msra.gmra.mxu0 %vm1195_vm4, %v1868_v21  ;;  %v1869_v3 = vmul.f32 %v8232_v28, %v1783_v49  ;;  %v2869_v51 = vsel %vm1195_vm4, %v2780_v35, -inf }
 0x8b8   : > { %2915 = vadd.xlane.f32.xlu1 %v2914_v22 }
 0x8bd   : > { %v2874_v28 = vpop.xlane.xlu2 %2873 }
 0x8be   : > { %v2890_v18 = vsub.f32 %v8278_v41, %v2874_v28 }
 0x8bf   : > { %6257 = vmatmul.msk.f32.gmra.mxu0 %vm1195_vm4, %v1869_v3 }
 0x8c0   : > { %2870 = vmax.xlane.f32.xlu1 %v2869_v51  ;;  %v2901_v9 = vmul.f32 1.442695, %v2890_v18 }
 0x8c8   : > { %2876 = vmax.xlane.f32.xlu1 %v2875_v11 }
 0x8e1   : > { %6655 = vrot.lane.b32.xlu1 %v7792_v23, %s9744_s24 }
 0x8ed   : > { %v8360_v23 = vpop.xlane.xlu1 %2882 }
 0x8f5   : > { %v2886_v15 = vpop.xlane.xlu0 %2885 }
 0x8f6   : > { %v2894_v61 = vsub.f32 %v8308_v31, %v2886_v15 }
 0x903   : > { %v2880_v34 = vpop.xlane.xlu2 %2879 }
 0x904   : > { %v2892_v58 = vsub.f32 %v8319_v7, %v2880_v34 }
 0x906   : > { %v2905_v32 = vmul.f32 1.442695, %v2892_v58 }
 0x908   : > { %6861 = vpow2.f32 %v2905_v32 }
 0x909   : > { %6863 = vrcp.f32 %v8350_v16 }
 0x90e   : > { %v8353_v48 = vpop.eup %6861 }
 0x90f   : > { %v2926_v2 = vsel %vm1195_vm4, %v8353_v48, 0.0 }
 0x910   : > { %2927 = vadd.xlane.f32.xlu0 %v2926_v2 }
 0x924   : > { %6665 = vrot.lane.b32.xlu0 %v7499_v63, %s9744_s24  ;;  %v6864_v63 = vpop.eup %6863 }
 0x925   : > { %v2936_v40 = vmul.f32 %v6864_v63, %v8350_v16  ;;  %vm2941_vm12 = vweird.f32 %v6864_v63 }
 0x926   : > { %vm2942_vm14 = vmor %vm2940_vm13, %vm2941_vm12 }
 0x927   : > { %v2937_v3 = vsub.f32 1.0, %v2936_v40 }
 0x929   : > { %v2938_v28 = vmul.f32 %v6864_v63, %v2937_v3 }
 0x92b   : > { %v8364_v52 = vpop.xlane.xlu1 %2915  ;;  %v2939_v32 = vadd.f32 %v6864_v63, %v2938_v28 }
 0x92c   : > { %vm2954_vm3 = vweird.f32 %v8364_v52 }
 0x933   : > { %v2871_v7 = vpop.xlane.xlu1 %2870 }
 0x934   : > { %v2889_v8 = vsub.f32 %v2780_v35, %v2871_v7  ;;  %v1905_v10 = vpop.f32.mrf.mxu0  ;;  %v2909_v35 = vmul.f32 1.442695, %v2894_v61  ;;  %v1045_v7 = vld [vmem:[%s9687_s11 + $0x10] sm:$0xff]  ;;  %v2960_v61 = vand.u32 2147483648, %v8364_v52 }
 0x935   : > { %6264 = vmatmul.msk.f32.vlgmr.msrb.gmra.mxu0 %vm662_vm0, %v1905_v10  ;;  %v2943_v10 = vsel %vm2942_vm14, %v6864_v63, %v2939_v32  ;;  %v2958_v63 = vand.u32 2147483647, %v8364_v52 }
 0x936   : > { %v2899_v26 = vmul.f32 1.442695, %v2889_v8  ;;  %v2944_v8 = vand.u32 2147483647, %v8350_v16  ;;  %2673 = vmatpush.msra.mxu0 %v1045_v7 }
 0x937   : > { %vm2959_vm6 = vcmp.eq.f32.partialorder %v2958_v63, 8.507059e+37 }
 0x938   : > { %6865 = vpow2.f32 %v2899_v26  ;;  %vm2945_vm15 = vcmp.eq.f32.partialorder %v2944_v8, 8.507059e+37 }
 0x939   : > { %6867 = vpow2.f32 %v2901_v9 }
 0x93a   : > { %6869 = vrcp.f32 %v8364_v52 }
 0x93b   : > { %v2877_v21 = vpop.xlane.xlu1 %2876 }
 0x93c   : > { %v2891_v45 = vsub.f32 %v2819_v39, %v2877_v21  ;;  %v1908_v22 = vpop.f32.mrf.mxu0 }
 0x93d   : > { %6265 = vmatmul.msk.f32.gmra.mxu0 %vm662_vm0, %v1908_v22 }
 0x93e   : > { %v8370_v54 = vpop.eup %6865  ;;  %v2903_v36 = vmul.f32 1.442695, %v2891_v45 }
 0x93f   : > { %v2917_v41 = vsel %vm1195_vm4, %v8370_v54, 0.0  ;;  %v8377_v31 = vpop.eup %6867 }
 0x940   : > { %6871 = vpow2.f32 %v2903_v36  ;;  %2918 = vadd.xlane.f32.xlu2 %v2917_v41  ;;  %v6870_v49 = vpop.eup %6869  ;;  %v2920_v11 = vsel %vm1195_vm4, %v8377_v31, 0.0  ;;  %v2961_v36 = vor.u32 1.1754944e-38, %v2960_v61 }
 0x941   : > { %6873 = vpow2.f32 %v2909_v35  ;;  %v2950_v34 = vmul.f32 %v6870_v49, %v8364_v52  ;;  %vm2955_vm2 = vweird.f32 %v6870_v49 }
 0x942   : > { %vm2956_vm5 = vmor %vm2954_vm3, %vm2955_vm2 }
 0x943   : > { %v2951_v2 = vsub.f32 1.0, %v2950_v34 }
 0x945   : > { %6266 = vmatmul.msk.f32.gmra.mxu0 %vm662_vm0, %v8107_v20  ;;  %v2946_v20 = vand.u32 2147483648, %v8350_v16  ;;  %v2952_v18 = vmul.f32 %v6870_v49, %v2951_v2 }
 0x946   : > { %v8379_v51 = vpop.eup %6871 }
 0x947   : > { %v2923_v39 = vsel %vm1195_vm4, %v8379_v51, 0.0  ;;  %v8388_v58 = vpop.eup %6873  ;;  %v2947_v26 = vor.u32 1.1754944e-38, %v2946_v20 }
 0x948   : > { %2924 = vadd.xlane.f32.xlu1 %v2923_v39  ;;  %2921 = vadd.xlane.f32.xlu2 %v2920_v11  ;;  %v2932_v27 = vsel %vm1195_vm4, %v8388_v58, 0.0 }
 0x949   : > { %v2948_v9 = vsel %vm2945_vm15, %v2947_v26, %v2943_v10 }
 0x94a   : > { %v3047_v16 = vmul.f32 %v8267_v17, %v2948_v9 }
 0x94d   : > { %6267 = vmatmul.msk.f32.gmra.mxu0 %vm662_vm0, %v8114_v6  ;;  %v2953_v6 = vadd.f32 %v6870_v49, %v2952_v18 }
 0x94e   : > { %2933 = vadd.xlane.f32.xlu0 %v2932_v27 }
 0x94f   : > { %v2957_v22 = vsel %vm2956_vm5, %v6870_v49, %v2953_v6 }
 0x950   : > { %v2962_v41 = vsel %vm2959_vm6, %v2961_v36, %v2957_v22 }
 0x953   : > { %v6656_v15 = vpop.permute.xlu1 %6655 }
 0x954   : > { %v6657_v21 = vunpack.i.l.bf16 %v6656_v15  ;;  %v6658_v45 = vunpack.i.h.bf16 %v6656_v15 }
 0x955   : > { %6268 = vmatmul.msk.f32.gmra.mxu0 %vm662_vm0, %v7879_v46  ;;  %v3048_v46 = vmul.f32 %v8326_v25, %v2962_v41 }
 0x956   : > { %3081 = vmatpush.msrb.mxu2 %v6657_v21 }
 0x958   : > { %3082 = vmatpush.msrb.mxu2 %v6658_v45 }
 0x959   : > { %6328 = vmatmul.msk.f32.vlgmr.msrb.gmra.mxu2 %vm1195_vm4, %v3047_v16  ;;  %v1046_v16 = vld [vmem:[%s9687_s11 + $0x18] sm:$0xff] }
 0x95d   : > { %6269 = vmatmul.msk.f32.gmra.mxu0 %vm662_vm0, %v7885_v0  ;;  %v2893_v0 = vsub.f32 %v8297_v55, %v8360_v23 }
 0x95f   : > { %v2907_v17 = vmul.f32 1.442695, %v2893_v0 }
 0x960   : > { %6660 = vrot.lane.b32.xlu2 %v7556_v12, %s9744_s24 }
 0x961   : > { %6670 = vrot.lane.b32.xlu1 %v7493_v53, %s9744_s24  ;;  %6329 = vmatmul.msk.f32.gmra.mxu2 %vm1195_vm4, %v3048_v46  ;;  %6875 = vpow2.f32 %v2907_v17  ;;  %s8470_s24 = scalar_lea.vmem %s9824_s3, %s7270_s21 }
 0x965   : > { %6270 = vmatmul.msk.f32.gmra.mxu0 %vm662_vm0, %v7906_v29 }
 0x967   : > { %v8425_v53 = vpop.eup %6875 }
 0x968   : > { %v2929_v12 = vsel %vm1195_vm4, %v8425_v53, 0.0 }
 0x96d   : > { %6271 = vmatmul.msk.f32.gmra.mxu0 %vm662_vm0, %v7912_v5 }
 0x975   : > { %6304 = vmatmul.msk.f32.vlgmr.msra.gmra.mxu0 %vm662_vm0, %v8243_v14 }
 0x97d   : > { %6305 = vmatmul.msk.f32.gmra.mxu0 %vm662_vm0, %v8246_v60 }
 0x983   : > { %v8431_v29 = vpop.xlane.xlu0 %2927 }
 0x984   : > { %v3016_v0 = vand.u32 2147483648, %v8431_v29 }
 0x985   : > { %6306 = vmatmul.msk.f32.gmra.mxu0 %vm662_vm0, %v8282_v62 }
 0x989   : > { %2930 = vadd.xlane.f32.xlu2 %v2929_v12 }
 0x98d   : > { %6307 = vmatmul.msk.f32.gmra.mxu0 %vm662_vm0, %v8286_v38 }
 0x995   : > { %6308 = vmatmul.msk.f32.gmra.mxu0 %vm662_vm0, %v8254_v50 }
 0x996   : > { %v6666_v5 = vpop.permute.xlu0 %6665 }
 0x997   : > { %v6667_v14 = vunpack.i.l.bf16 %v6666_v5  ;;  %v6668_v60 = vunpack.i.h.bf16 %v6666_v5 }
 0x999   : > { %3151 = vmatpush.msrb.mxu1 %v6667_v14 }
 0x99b   : > { %3152 = vmatpush.msrb.mxu1 %v6668_v60  ;;  %v3014_v60 = vand.u32 2147483647, %v8431_v29 }
 0x99d   : > { %6309 = vmatmul.msk.f32.gmra.mxu0 %vm662_vm0, %v8262_v30 }
 0x9a5   : > { %6310 = vmatmul.msk.f32.gmra.mxu0 %vm662_vm0, %v8294_v37 }
 0x9ad   : > { %6311 = vmatmul.msk.f32.gmra.mxu0 %vm662_vm0, %v8305_v47 }
 0x9b3   : > { %v2919_v62 = vpop.xlane.xlu2 %2918 }
 0x9b4   : > { %6877 = vrcp.f32 %v2919_v62  ;;  %v2974_v35 = vand.u32 2147483648, %v2919_v62  ;;  %v2972_v47 = vand.u32 2147483647, %v2919_v62  ;;  %vm2968_vm8 = vweird.f32 %v2919_v62 }
 0x9b5   : > { %6879 = vrcp.f32 %v8431_v29 }
 0x9b6   : > { %v2975_v28 = vor.u32 1.1754944e-38, %v2974_v35  ;;  %vm2973_vm10 = vcmp.eq.f32.partialorder %v2972_v47, 8.507059e+37  ;;  %v802_v35 = vld [vmem:[%s8470_s24] sm:$0xff] }
 0x9ba   : > { %v6878_v38 = vpop.eup %6877 }
 0x9bb   : > { %v8444_v50 = vpop.eup %6879  ;;  %v2964_v55 = vmul.f32 %v6878_v38, %v2919_v62  ;;  %v2925_v25 = vpop.xlane.xlu1 %2924  ;;  %vm2969_vm7 = vweird.f32 %v6878_v38 }
 0x9bc   : > { %6881 = vrcp.f32 %v2925_v25  ;;  %v2922_v23 = vpop.xlane.xlu2 %2921  ;;  %v3006_v30 = vmul.f32 %v8444_v50, %v8431_v29  ;;  %vm2970_vm9 = vmor %vm2968_vm8, %vm2969_vm7  ;;  %v3000_v10 = vand.u32 2147483647, %v2925_v25  ;;  %v3002_v18 = vand.u32 2147483648, %v2925_v25 }
 0x9bd   : > { %v2965_v52 = vsub.f32 1.0, %v2964_v55  ;;  %6883 = vrcp.f32 %v2922_v23  ;;  %v2988_v9 = vand.u32 2147483648, %v2922_v23  ;;  %v2986_v45 = vand.u32 2147483647, %v2922_v23 }
 0x9be   : > { %v3007_v3 = vsub.f32 1.0, %v3006_v30  ;;  %vm2996_vm13 = vweird.f32 %v2925_v25  ;;  %vm3011_vm14 = vweird.f32 %v8444_v50  ;;  %v3003_v22 = vor.u32 1.1754944e-38, %v3002_v18 }
 0x9bf   : > { %v2966_v37 = vmul.f32 %v6878_v38, %v2965_v52  ;;  %vm2982_vm2 = vweird.f32 %v2922_v23  ;;  %vm3001_vm3 = vcmp.eq.f32.partialorder %v3000_v10, 8.507059e+37  ;;  %vm2987_vm6 = vcmp.eq.f32.partialorder %v2986_v45, 8.507059e+37 }
 0x9c0   : > { %v3008_v8 = vmul.f32 %v8444_v50, %v3007_v3  ;;  %vm3010_vm7 = vweird.f32 %v8431_v29 }
 0x9c1   : > { %v2967_v40 = vadd.f32 %v6878_v38, %v2966_v37  ;;  %vm3012_vm8 = vmor %vm3010_vm7, %vm3011_vm14  ;;  %v2934_v47 = vpop.xlane.xlu0 %2933 }
 0x9c2   : > { %v6882_v49 = vpop.eup %6881  ;;  %v3009_v46 = vadd.f32 %v8444_v50, %v3008_v8  ;;  %6885 = vrcp.f32 %v2934_v47 }
 0x9c3   : > { %v6884_v39 = vpop.eup %6883  ;;  %v2971_v11 = vsel %vm2970_vm9, %v6878_v38, %v2967_v40  ;;  %v2992_v34 = vmul.f32 %v6882_v49, %v2925_v25  ;;  %vm2997_vm11 = vweird.f32 %v6882_v49  ;;  %v3017_v38 = vor.u32 1.1754944e-38, %v3016_v0  ;;  %v806_v0 = vld [vmem:[%s8470_s24 + $0x20] sm:$0xff] }
 0x9c4   : > { %v2978_v32 = vmul.f32 %v6884_v39, %v2922_v23  ;;  %v6661_v2 = vpop.permute.xlu2 %6660  ;;  %v2976_v7 = vsel %vm2973_vm10, %v2975_v28, %v2971_v11  ;;  %vm2983_vm12 = vweird.f32 %v6884_v39  ;;  %vm2998_vm15 = vmor %vm2996_vm13, %vm2997_vm11  ;;  %v3013_v62 = vsel %vm3012_vm8, %v8444_v50, %v3009_v46  ;;  %v803_v23 = vld [vmem:[%s8470_s24 + $0x8] sm:$0xff] }
 0x9c5   : > { %v2993_v27 = vsub.f32 1.0, %v2992_v34  ;;  %v6662_v20 = vunpack.i.l.bf16 %v6661_v2  ;;  %v6663_v21 = vunpack.i.h.bf16 %v6661_v2  ;;  %v3049_v61 = vmul.f32 %v8370_v54, %v2976_v7  ;;  %vm2984_vm5 = vmor %vm2982_vm2, %vm2983_vm12  ;;  %v6345_v46 = vld [vmem:[%s9686_s10 + $0x28] sm:$0xff] }
 0x9c6   : > { %v2979_v26 = vsub.f32 1.0, %v2978_v32  ;;  %v2989_v54 = vor.u32 1.1754944e-38, %v2988_v9  ;;  %vm3015_vm9 = vcmp.eq.f32.partialorder %v3014_v60, 8.507059e+37  ;;  %v7116_v50 = vmov 0   ;;  %v808_v60 = vld [vmem:[%s8470_s24 + $0x30] sm:$0xff] }
 0x9c7   : > { %v2994_v15 = vmul.f32 %v6882_v49, %v2993_v27  ;;  %3116 = vmatpush.msra.mxu3 %v6662_v20  ;;  %6675 = vset.pattern.permute.xlu1 %v7116_v50  ;;  %v2057_v20 = vpop.f32.mrf.mxu0 }
 0x9c8   : > { %v2980_v6 = vmul.f32 %v6884_v39, %v2979_v26  ;;  %6674 = vset.pattern.permute.xlu2 %v7116_v50  ;;  %3283 = vperm.xlu1 %6675, %v803_v23   ;;  %v6886_v40 = vpop.eup %6885  ;;  %v3044_v26 = vand.u32 2147483648, %v2934_v47  ;;  %v809_v23 = vld [vmem:[%s8470_s24 + $0x38] sm:$0xff] }
 0x9c9   : > { %v2995_v63 = vadd.f32 %v6882_v49, %v2994_v15  ;;  %3117 = vmatpush.msra.mxu3 %v6663_v21  ;;  %6676 = vset.pattern.permute.xlu0 %v7116_v50  ;;  %vm3039_vm13 = vweird.f32 %v6886_v40  ;;  %v3042_v21 = vand.u32 2147483647, %v2934_v47 }
 0x9ca   : > { %6330 = vmatmul.msk.f32.vlgmr.msra.gmra.mxu3 %vm1195_vm4, %v3049_v61  ;;  %v2981_v36 = vadd.f32 %v6884_v39, %v2980_v6  ;;  %3278 = vperm.xlu2 %6674, %v802_v35   ;;  %v3045_v61 = vor.u32 1.1754944e-38, %v3044_v26 }
 0x9cb   : > { %v2999_v41 = vsel %vm2998_vm15, %v6882_v49, %v2995_v63  ;;  %3234 = vmatpush.msrb.mxu3 %v1046_v16  ;;  %v3034_v49 = vmul.f32 %v6886_v40, %v2934_v47  ;;  %vm3038_vm15 = vweird.f32 %v2934_v47  ;;  %v9827_v47 = vld [vmem:[#allocation9_spill] sm:$0xff] }
 0x9cc   : > { %v3004_v17 = vsel %vm3001_vm3, %v3003_v22, %v2999_v41  ;;  %v2985_v12 = vsel %vm2984_vm5, %v6884_v39, %v2981_v36  ;;  %vm3040_vm2 = vmor %vm3038_vm15, %vm3039_vm13  ;;  %vm3043_vm3 = vcmp.eq.f32.partialorder %v3042_v21, 8.507059e+37 }
 0x9cd   : > { %v3051_v5 = vmul.f32 %v8379_v51, %v3004_v17  ;;  %v2990_v14 = vsel %vm2987_vm6, %v2989_v54, %v2985_v12  ;;  %v3018_v51 = vsel %vm3015_vm9, %v3017_v38, %v3013_v62  ;;  %v3035_v39 = vsub.f32 1.0, %v3034_v49  ;;  %v6347_v54 = vld [vmem:[%s9686_s10 + $0x38] sm:$0xff]  ;;  %v6344_v12 = vld [vmem:[%s9686_s10 + $0x20] sm:$0xff]  ;;  %v804_v62 = vld [vmem:[%s8470_s24 + $0x10] sm:$0xff] }
 0x9ce   : > { %v3050_v55 = vmul.f32 %v8377_v31, %v2990_v14  ;;  %v3052_v52 = vmul.f32 %v8353_v48, %v3018_v51  ;;  %3365 = vmatpush.msra.mxu1 %v6347_v54 }
 0x9cf   : > { %6332 = vmatmul.msk.f32.vlgmr.msrb.gmra.mxu1 %vm1195_vm4, %v3051_v5  ;;  %v3036_v32 = vmul.f32 %v6886_v40, %v3035_v39  ;;  %v2060_v16 = vpop.f32.mrf.mxu0  ;;  %v805_v5 = vld [vmem:[%s8470_s24 + $0x18] sm:$0xff] }
 0x9d0   : > { %3298 = vperm.xlu1 %6675, %v806_v0   ;;  %3293 = vperm.xlu0 %6676, %v805_v5   ;;  %v2126_v49 = vadd.f32 %v8140_v42, %v2060_v16 }
 0x9d1   : > { %v3037_v18 = vadd.f32 %v6886_v40, %v3036_v32 }
 0x9d2   : > { %6331 = vmatmul.msk.f32.gmra.mxu3 %vm1195_vm4, %v3050_v55  ;;  %3288 = vperm.xlu2 %6674, %v804_v62   ;;  %v807_v55 = vld [vmem:[%s8470_s24 + $0x28] sm:$0xff]  ;;  %v9838_v62 = vld [vmem:[#allocation13_spill] sm:$0xff]  ;;  %s9861_s24 = smov 56  }
 0x9d3   : > { %v6671_v29 = vpop.permute.xlu1 %6670  ;;  %v3041_v6 = vsel %vm3040_vm2, %v6886_v40, %v3037_v18 }
 0x9d4   : > { %v6672_v25 = vunpack.i.l.bf16 %v6671_v29  ;;  %v6673_v31 = vunpack.i.h.bf16 %v6671_v29  ;;  %v3046_v45 = vsel %vm3043_vm3, %v3045_v61, %v3041_v6  ;;  %v9832_v6 = vld [vmem:[#allocation11_spill] sm:$0xff] }
 0x9d5   : > { %v3054_v63 = vmul.f32 %v8388_v58, %v3046_v45  ;;  %v6346_v58 = vld [vmem:[%s9686_s10 + $0x30] sm:$0xff] }
 0x9d6   : > { %3186 = vmatpush.msra.mxu2 %v6672_v25  ;;  %3366 = vmatpush.msra.mxu1 %v6346_v58 }
 0x9d7   : > { %6333 = vmatmul.msk.f32.gmra.mxu1 %vm1195_vm4, %v3052_v52  ;;  %v2063_v22 = vpop.f32.mrf.mxu0  ;;  %v9825_v52 = vld [vmem:[#allocation39_spill] sm:$0xff] }
 0x9d8   : > { %3187 = vmatpush.msra.mxu2 %v6673_v31  ;;  %3367 = vmatpush.msra.mxu1 %v6345_v46  ;;  %v2123_v50 = vadd.f32 %v9825_v52, %v2057_v20  ;;  %v9835_v46 = vld [vmem:[#allocation12_spill] sm:$0xff]  ;;  %v9840_v52 = vld [vmem:[#allocation14_spill] sm:$0xff] }
 0x9d9   : > { %3308 = vperm.xlu1 %6675, %v808_v60  }
 0x9da   : > { %3368 = vmatpush.msra.mxu1 %v6344_v12  ;;  %3303 = vperm.xlu2 %6674, %v807_v55  }
 0x9dc   : > { %v3084_v30 = vpop.f32.mrf.mxu2 }
 0x9dd   : > { %6336 = vmatmul.msk.f32.vlgmr.msrb.gmra.mxu3 %vm662_vm0, %v3084_v30 }
 0x9df   : > { %v8483_v36 = vpop.f32.mrf.mxu0 }
 0x9e0   : > { %v2132_v45 = vadd.f32 %v8171_v4, %v8483_v36 }
 0x9e2   : > { %3313 = vperm.xlu2 %6674, %v809_v23  }
 0x9e4   : > { %v3087_v37 = vpop.f32.mrf.mxu2 }
 0x9e5   : > { %6337 = vmatmul.msk.f32.gmra.mxu3 %vm662_vm0, %v3087_v37 }
 0x9e7   : > { %v8485_v41 = vpop.f32.mrf.mxu0 }
 0x9e8   : > { %v2135_v12 = vadd.f32 %v8177_v59, %v8485_v41 }
 0x9fc   : > { %v2931_v48 = vpop.xlane.xlu2 %2930 }
 0x9fd   : > { %6887 = vrcp.f32 %v2931_v48  ;;  %v3030_v34 = vand.u32 2147483648, %v2931_v48  ;;  %v3028_v27 = vand.u32 2147483647, %v2931_v48  ;;  %vm3024_vm11 = vweird.f32 %v2931_v48 }
 0x9ff   : > { %v3031_v8 = vor.u32 1.1754944e-38, %v3030_v34  ;;  %vm3029_vm14 = vcmp.eq.f32.partialorder %v3028_v27, 8.507059e+37 }
 0xa03   : > { %v6888_v3 = vpop.eup %6887 }
 0xa04   : > { %v3020_v11 = vmul.f32 %v6888_v3, %v2931_v48  ;;  %vm3025_vm10 = vweird.f32 %v6888_v3 }
 0xa05   : > { %vm3026_vm12 = vmor %vm3024_vm11, %vm3025_vm10 }
 0xa06   : > { %v3021_v28 = vsub.f32 1.0, %v3020_v11 }
 0xa08   : > { %v3022_v2 = vmul.f32 %v6888_v3, %v3021_v28 }
 0xa0a   : > { %v3023_v7 = vadd.f32 %v6888_v3, %v3022_v2  ;;  %v9830_v2 = vld [vmem:[#allocation10_spill] sm:$0xff] }
 0xa0c   : > { %v3027_v10 = vsel %vm3026_vm12, %v6888_v3, %v3023_v7 }
 0xa0d   : > { %v3032_v15 = vsel %vm3029_vm14, %v3031_v8, %v3027_v10  ;;  %v2129_v10 = vadd.f32 %v8157_v43, %v2063_v22 }
 0xa0e   : > { %v3053_v9 = vmul.f32 %v8425_v53, %v3032_v15  ;;  %v8487_v53 = vpop.f32.mrf.mxu0 }
 0xa10   : > { %6334 = vmatmul.msk.f32.vlgmr.msra.gmra.mxu2 %vm1195_vm4, %v3053_v9 }
 0xa16   : > { %v8499_v17 = vpop.f32.mrf.mxu0 }
 0xa18   : > { %6335 = vmatmul.msk.f32.gmra.mxu2 %vm1195_vm4, %v3054_v63 }
 0xa1e   : > { %v8508_v38 = vpop.f32.mrf.mxu0 }
 0xa24   : > { %v8515_v35 = vpop.permute.xlu2 %3278 }
 0xa25   : > { %9826 = vst [vmem:[#allocation39_spill] sm:$0xff] %v8515_v35 }
 0xa26   : > { %v2675_v29 = vpop.f32.mrf.mxu0 }
 0xa27   : > { %v2699_v31 = vadd.f32 %v2675_v29, %v2123_v50  ;;  %v2138_v29 = vadd.f32 %v8179_v44, %v8487_v53  ;;  %v2141_v53 = vadd.f32 %v8183_v57, %v8499_v17  ;;  %v9846_v17 = vld [vmem:[#allocation16_spill] sm:$0xff] }
 0xa2c   : > { %v8536_v21 = vpop.permute.xlu2 %3288 }
 0xa2d   : > { %9831 = vst [vmem:[#allocation10_spill] sm:$0xff] %v8536_v21 }
 0xa2e   : > { %v2678_v40 = vpop.f32.mrf.mxu0 }
 0xa2f   : > { %v2700_v11 = vadd.f32 %v2678_v40, %v2126_v49  ;;  %v9843_v40 = vld [vmem:[#allocation15_spill] sm:$0xff] }
 0xa36   : > { %v2681_v8 = vpop.f32.mrf.mxu0 }
 0xa37   : > { %v2701_v18 = vadd.f32 %v2681_v8, %v2129_v10 }
 0xa3a   : > { %v8525_v32 = vpop.permute.xlu1 %3283 }
 0xa3b   : > { %9829 = vst [vmem:[#allocation45_spill] sm:$0xff] %v8525_v32 }
 0xa3e   : > { %v2684_v26 = vpop.f32.mrf.mxu0 }
 0xa3f   : > { %v2702_v63 = vadd.f32 %v2684_v26, %v2132_v45 }
 0xa42   : > { %v8546_v58 = vpop.permute.xlu0 %3293  ;;  %v8556_v60 = vpop.permute.xlu1 %3298 }
 0xa43   : > { %9834 = vst [vmem:[#allocation46_spill] sm:$0xff] %v8546_v58 }
 0xa44   : > { %9837 = vst [vmem:[#allocation47_spill] sm:$0xff] %v8556_v60 }
 0xa46   : > { %v2687_v22 = vpop.f32.mrf.mxu0 }
 0xa47   : > { %v2703_v4 = vadd.f32 %v2687_v22, %v2135_v12 }
 0xa4c   : > { %v3154_v25 = vpop.f32.mrf.mxu1 }
 0xa4d   : > { %v3119_v14 = vpop.f32.mrf.mxu3 }
 0xa4e   : > { %6338 = vmatmul.msk.f32.gmra.mxu3 %vm662_vm0, %v3119_v14 }
 0xa54   : > { %v3157_v3 = vpop.f32.mrf.mxu1 }
 0xa55   : > { %v3122_v51 = vpop.f32.mrf.mxu3 }
 0xa56   : > { %6339 = vmatmul.msk.f32.gmra.mxu3 %vm662_vm0, %v3122_v51  ;;  %v2690_v51 = vpop.f32.mrf.mxu0 }
 0xa57   : > { %v2704_v59 = vadd.f32 %v2690_v51, %v2138_v29  ;;  %v9851_v29 = vld [vmem:[#allocation20_spill] sm:$0xff] }
 0xa5e   : > { %6340 = vmatmul.msk.f32.gmra.mxu3 %vm662_vm0, %v3154_v25  ;;  %v2693_v44 = vpop.f32.mrf.mxu0 }
 0xa60   : > { %v3236_v30 = vpop.f32.mrf.mxu3 }
 0xa61   : > { %v3260_v37 = vadd.f32 %v3236_v30, %v2699_v31  ;;  %v8567_v31 = vpop.permute.xlu2 %3303 }
 0xa62   : > { %9841 = vst [vmem:[#allocation14_spill] sm:$0xff] %v8567_v31 }
 0xa63   : > { %v3268_v48 = vadd.f32 %v3260_v37, %v9827_v47  ;;  %v2705_v37 = vadd.f32 %v2693_v44, %v2141_v53 }
 0xa65   : > { %v8520_v39 = vmul.f32 %v8515_v35, %v3268_v48 }
 0xa66   : > { %6341 = vmatmul.msk.f32.gmra.mxu3 %vm662_vm0, %v3157_v3  ;;  %v2696_v3 = vpop.f32.mrf.mxu0 }
 0xa67   : > { %9828 = vst [vmem:[#allocation9_spill] sm:$0xff] %v8520_v39  ;;  %6348 = vmatmul.msk.f32.vlgmr.msra.gmra.mxu1 %vm736_vm1, %v8520_v39 }
 0xa68   : > { %v3239_v28 = vpop.f32.mrf.mxu3 }
 0xa69   : > { %v3261_v34 = vadd.f32 %v3239_v28, %v2700_v11  ;;  %v8577_v11 = vpop.permute.xlu1 %3308  ;;  %v2144_v28 = vadd.f32 %v8194_v19, %v8508_v38 }
 0xa6a   : > { %9844 = vst [vmem:[#allocation15_spill] sm:$0xff] %v8577_v11 }
 0xa6b   : > { %v3269_v27 = vadd.f32 %v3261_v34, %v9830_v2  ;;  %v2706_v2 = vadd.f32 %v2696_v3, %v2144_v28 }
 0xa6d   : > { %v8529_v20 = vmul.f32 %v8525_v32, %v3269_v27 }
 0xa6f   : > { %6349 = vmatmul.msk.f32.gmra.mxu1 %vm736_vm1, %v8529_v20 }
 0xa93   : > { %v3189_v42 = vpop.f32.mrf.mxu2 }
 0xa94   : > { %6342 = vmatmul.msk.f32.gmra.mxu3 %vm662_vm0, %v3189_v42 }
 0xa9b   : > { %v3192_v7 = vpop.f32.mrf.mxu2 }
 0xa9c   : > { %6343 = vmatmul.msk.f32.gmra.mxu3 %vm662_vm0, %v3192_v7  ;;  %v8587_v7 = vpop.permute.xlu2 %3313 }
 0xa9d   : > { %9847 = vst [vmem:[#allocation16_spill] sm:$0xff] %v8587_v7 }
 0xad1   : > { %v3242_v15 = vpop.f32.mrf.mxu3 }
 0xad2   : > { %v3262_v9 = vadd.f32 %v3242_v15, %v2701_v18 }
 0xad4   : > { %v3270_v61 = vadd.f32 %v3262_v9, %v9832_v6 }
 0xad6   : > { %v8542_v16 = vmul.f32 %v8536_v21, %v3270_v61 }
 0xad8   : > { %9833 = vst [vmem:[#allocation11_spill] sm:$0xff] %v8542_v16  ;;  %6350 = vmatmul.msk.f32.gmra.mxu1 %vm736_vm1, %v8542_v16 }
 0xad9   : > { %v3245_v54 = vpop.f32.mrf.mxu3 }
 0xada   : > { %v3263_v43 = vadd.f32 %v3245_v54, %v2702_v63 }
 0xadc   : > { %v3271_v0 = vadd.f32 %v3263_v43, %v9835_v46 }
 0xade   : > { %v8552_v5 = vmul.f32 %v8546_v58, %v3271_v0 }
 0xae0   : > { %9836 = vst [vmem:[#allocation12_spill] sm:$0xff] %v8552_v5  ;;  %6351 = vmatmul.msk.f32.gmra.mxu1 %vm736_vm1, %v8552_v5 }
 0xae1   : > { %v3248_v36 = vpop.f32.mrf.mxu3 }
 0xae2   : > { %v3264_v14 = vadd.f32 %v3248_v36, %v2703_v4 }
 0xae4   : > { %v3272_v55 = vadd.f32 %v3264_v14, %v9838_v62  ;;  %v8594_v19 = vpop.f32.mrf.mxu1  ;;  %v9850_v14 = vld [vmem:[#allocation19_spill] sm:$0xff] }
 0xae6   : > { %v8562_v25 = vmul.f32 %v8556_v60, %v3272_v55 }
 0xae8   : > { %9839 = vst [vmem:[#allocation13_spill] sm:$0xff] %v8562_v25  ;;  %6352 = vmatmul.msk.f32.gmra.mxu1 %vm736_vm1, %v8562_v25 }
 0xae9   : > { %v3251_v41 = vpop.f32.mrf.mxu3 }
 0xaea   : > { %v3265_v23 = vadd.f32 %v3251_v41, %v2704_v59 }
 0xaec   : > { %v3273_v50 = vadd.f32 %v3265_v23, %v9840_v52  ;;  %v8596_v38 = vpop.f32.mrf.mxu1  ;;  %v9852_v52 = vld [vmem:[#allocation28_spill] sm:$0xff] }
 0xaee   : > { %v8570_v30 = vmul.f32 %v8567_v31, %v3273_v50 }
 0xaf0   : > { %9842 = vst [vmem:[#allocation48_spill] sm:$0xff] %v8570_v30  ;;  %6353 = vmatmul.msk.f32.gmra.mxu1 %vm736_vm1, %v8570_v30 }
 0xb17   : > { %v3254_v47 = vpop.f32.mrf.mxu3 }
 0xb18   : > { %v3266_v48 = vadd.f32 %v3254_v47, %v2705_v37  ;;  %v9854_v47 = vld [vmem:[#allocation27_spill] sm:$0xff] }
 0xb1a   : > { %v3274_v49 = vadd.f32 %v3266_v48, %v9843_v40 }
 0xb1c   : > { %v8582_v34 = vmul.f32 %v8577_v11, %v3274_v49 }
 0xb1e   : > { %9845 = vst [vmem:[#allocation49_spill] sm:$0xff] %v8582_v34  ;;  %6354 = vmatmul.msk.f32.gmra.mxu1 %vm736_vm1, %v8582_v34 }
 0xb1f   : > { %v3257_v27 = vpop.f32.mrf.mxu3 }
 0xb20   : > { %v3267_v57 = vadd.f32 %v3257_v27, %v2706_v2 }
 0xb22   : > { %v3275_v42 = vadd.f32 %v3267_v57, %v9846_v17 }
 0xb24   : > { %v8590_v8 = vmul.f32 %v8587_v7, %v3275_v42 }
 0xb26   : > { %9848 = vst [vmem:[#allocation50_spill] sm:$0xff] %v8590_v8  ;;  %6355 = vmatmul.msk.f32.gmra.mxu1 %vm736_vm1, %v8590_v8 }
 0xb55   : > { %v8598_v10 = vpop.f32.mrf.mxu1 }
 0xb56   : > { %3438 = vrot.lane.b32.xlu2 %v8598_v10, %s9849_s12 }
 0xb5d   : > { %v8602_v18 = vpop.f32.mrf.mxu1 }
 0xb5e   : > { %3440 = vrot.lane.b32.xlu1 %v8602_v18, %s9849_s12 }
 0xb65   : > { %v8606_v26 = vpop.f32.mrf.mxu1 }
 0xb6d   : > { %v8608_v15 = vpop.f32.mrf.mxu1 }
 0xb6e   : > { %3477 = vrot.lane.b32.xlu0 %v8608_v15, %s9849_s12 }
 0xb9b   : > { %v8612_v9 = vpop.f32.mrf.mxu1 }
 0xb9c   : > { %3512 = vrot.lane.b32.xlu2 %v8612_v9, %s9849_s12 }
 0xba3   : > { %v8616_v6 = vpop.f32.mrf.mxu1 }
 0xba4   : > { %3401 = vrot.lane.b32.xlu2 %v8594_v19, %s9849_s12  ;;  %3514 = vrot.lane.b32.xlu1 %v8616_v6, %s9849_s12  ;;  %v8664_v53 = vpack.i.bf16 %v8612_v9, %v8616_v6 }
 0xbac   : > { %3403 = vrot.lane.b32.xlu1 %v8596_v38, %s9849_s12 }
 0xbb0   : > { %v3439_v45 = vpop.permute.xlu2 %3438 }
 0xbb4   : > { %3475 = vrot.lane.b32.xlu1 %v8606_v26, %s9849_s12  ;;  %s9883_s12 = smov 40  }
 0xbd0   : > { %v3441_v61 = vpop.permute.xlu1 %3440 }
 0xbd1   : > { %6364 = vmatpush.xpose.msk.msrb.mxu0 %vm662_vm0, %v3441_v61 }
 0xbd5   : > { %6365 = vmatpush.xpose.msk.msrb.mxu0 %vm662_vm0, %v3439_v45 }
 0xbd8   : > { %6366 = vmatmul.msk.f32.vlgmr.msrb.gmra.mxu0 %vm662_vm0, %v8598_v10 }
 0xbe0   : > { %6367 = vmatmul.msk.f32.gmra.mxu0 %vm662_vm0, %v8602_v18  ;;  %v3478_v46 = vpop.permute.xlu0 %3477 }
 0xbf6   : > { %v3513_v54 = vpop.permute.xlu2 %3512 }
 0xbfe   : > { %v3402_v22 = vpop.permute.xlu2 %3401 }
 0xc16   : > { %v3515_v63 = vpop.permute.xlu1 %3514 }
 0xc17   : > { %6372 = vmatpush.xpose.msk.msra.mxu0 %vm662_vm0, %v3515_v63 }
 0xc1b   : > { %6373 = vmatpush.xpose.msk.msra.mxu0 %vm662_vm0, %v3513_v54 }
 0xc1e   : > { %6374 = vmatmul.msk.f32.vlgmr.msra.gmra.mxu0 %vm662_vm0, %v8612_v9  ;;  %v3404_v43 = vpop.permute.xlu1 %3403 }
 0xc1f   : > { %6360 = vmatpush.xpose.msk.msrb.mxu2 %vm662_vm0, %v3404_v43 }
 0xc23   : > { %6361 = vmatpush.xpose.msk.msrb.mxu2 %vm662_vm0, %v3402_v22 }
 0xc26   : > { %6362 = vmatmul.msk.f32.vlgmr.msrb.gmra.mxu2 %vm662_vm0, %v8594_v19  ;;  %6375 = vmatmul.msk.f32.gmra.mxu0 %vm662_vm0, %v8616_v6  ;;  %v3476_v0 = vpop.permute.xlu1 %3475 }
 0xc27   : > { %6368 = vmatpush.xpose.msk.msra.mxu2 %vm662_vm0, %v3478_v46 }
 0xc2b   : > { %6369 = vmatpush.xpose.msk.msra.mxu2 %vm662_vm0, %v3476_v0 }
 0xc2e   : > { %6363 = vmatmul.msk.f32.gmra.mxu2 %vm662_vm0, %v8596_v38 }
 0xc36   : > { %6370 = vmatmul.msk.f32.vlgmr.msra.gmra.mxu2 %vm662_vm0, %v8606_v26 }
 0xc3e   : > { %6371 = vmatmul.msk.f32.gmra.mxu2 %vm662_vm0, %v8608_v15 }
 0xc55   : > { %v8650_v12 = vpop.f32.mrf.mxu0 }
 0xc5d   : > { %v8652_v4 = vpop.f32.mrf.mxu0 }
 0xc9b   : > { %v3541_v36 = vpop.f32.mrf.mxu0 }
 0xc9c   : > { %v3542_v62 = vadd.f32 %v3541_v36, %v9850_v14 }
 0xc9e   : > { %v3565_v55 = vsel %vm1195_vm4, %v3542_v62, -inf }
 0xc9f   : > { %3566 = vmax.xlane.f32.xlu2 %v3565_v55 }
 0xca3   : > { %v3544_v51 = vpop.f32.mrf.mxu0 }
 0xca4   : > { %v3545_v59 = vadd.f32 %v3544_v51, %v9851_v29  ;;  %v9855_v29 = vld [vmem:[#allocation17_spill] sm:$0xff] }
 0xca6   : > { %v3568_v41 = vsel %vm1195_vm4, %v3545_v59, -inf }
 0xca7   : > { %3569 = vmax.xlane.f32.xlu0 %v3568_v41 }
 0xca9   : > { %v3430_v23 = vpop.f32.mrf.mxu2 }
 0xcaa   : > { %v3431_v50 = vadd.f32 %v3430_v23, %v9852_v52 }
 0xcac   : > { %v3547_v44 = vsel %vm1195_vm4, %v3431_v50, -inf }
 0xcad   : > { %3548 = vmax.xlane.f32.xlu1 %v3547_v44  ;;  %v9856_v44 = vld [vmem:[#allocation18_spill] sm:$0xff] }
 0xcb1   : > { %v3433_v37 = vpop.f32.mrf.mxu2 }
 0xcb2   : > { %v3434_v48 = vadd.f32 %v3433_v37, %v9854_v47 }
 0xcb4   : > { %v3550_v40 = vsel %vm1195_vm4, %v3434_v48, -inf }
 0xcb7   : > { %4002 = vrot.lane.b32.xlu2 %v8616_v6, %s9809_s28 }
 0xcb9   : > { %v3504_v55 = vpop.f32.mrf.mxu2 }
 0xcbb   : > { %6678 = vrot.lane.b32.xlu0 %v8664_v53, %s9853_s27 }
 0xcc1   : > { %v3507_v41 = vpop.f32.mrf.mxu2 }
 0xcc2   : > { %v8695_v37 = vadd.f32 %v3507_v41, %v9856_v44 }
 0xcc3   : > { %3996 = vrot.lane.b32.xlu0 %v8612_v9, %s9815_s30 }
 0xced   : > { %3551 = vmax.xlane.f32.xlu0 %v3550_v40  ;;  %v3562_v40 = vsel %vm1195_vm4, %v8695_v37, -inf }
 0xd12   : > { %v3567_v49 = vpop.xlane.xlu2 %3566 }
 0xd13   : > { %v3577_v3 = vsub.f32 %v3542_v62, %v3567_v49 }
 0xd15   : > { %v3591_v28 = vmul.f32 1.442695, %v3577_v3 }
 0xd17   : > { %6889 = vpow2.f32 %v3591_v28 }
 0xd1a   : > { %v3570_v2 = vpop.xlane.xlu0 %3569  ;;  %v4003_v62 = vpop.permute.xlu2 %4002 }
 0xd1b   : > { %v3578_v27 = vsub.f32 %v3545_v59, %v3570_v2  ;;  %v8690_v59 = vadd.f32 %v3504_v55, %v9855_v29 }
 0xd1d   : > { %v8672_v57 = vpop.eup %6889  ;;  %v3593_v17 = vmul.f32 1.442695, %v3578_v27 }
 0xd1e   : > { %v3613_v42 = vsel %vm1195_vm4, %v8672_v57, 0.0 }
 0xd1f   : > { %6891 = vpow2.f32 %v3593_v17  ;;  %3614 = vadd.xlane.f32.xlu1 %v3613_v42 }
 0xd20   : > { %v3549_v61 = vpop.xlane.xlu1 %3548 }
 0xd21   : > { %v3571_v45 = vsub.f32 %v3431_v50, %v3549_v61  ;;  %v3559_v50 = vsel %vm1195_vm4, %v8690_v59, -inf }
 0xd23   : > { %v3579_v63 = vmul.f32 1.442695, %v3571_v45 }
 0xd25   : > { %v8676_v54 = vpop.eup %6891  ;;  %6893 = vpow2.f32 %v3579_v63 }
 0xd26   : > { %v3616_v43 = vsel %vm1195_vm4, %v8676_v54, 0.0 }
 0xd27   : > { %3617 = vadd.xlane.f32.xlu2 %v3616_v43 }
 0xd2b   : > { %v8680_v22 = vpop.eup %6893 }
 0xd2c   : > { %v3595_v46 = vsel %vm1195_vm4, %v8680_v22, 0.0 }
 0xd2d   : > { %v6679_v0 = vpop.permute.xlu0 %6678  ;;  %3596 = vadd.xlane.f32.xlu0 %v3595_v46 }
 0xd2e   : > { %v6680_v36 = vunpack.i.l.bf16 %v6679_v0  ;;  %v6681_v14 = vunpack.i.h.bf16 %v6679_v0 }
 0xd30   : > { %3870 = vmatpush.msra.mxu3 %v6680_v36 }
 0xd32   : > { %3871 = vmatpush.msra.mxu3 %v6681_v14 }
 0xd34   : > { %6396 = vmatpush.xpose.msk.msrb.mxu3 %vm662_vm0, %v4003_v62 }
 0xd35   : > { %v3997_v51 = vpop.permute.xlu0 %3996 }
 0xd38   : > { %4000 = vrot.lane.b32.xlu1 %v8612_v9, %s9809_s28 }
 0xd3f   : > { %3998 = vrot.lane.b32.xlu2 %v8616_v6, %s9815_s30 }
 0xd60   : > { %v3552_v23 = vpop.xlane.xlu0 %3551 }
 0xd61   : > { %v3572_v52 = vsub.f32 %v3434_v48, %v3552_v23  ;;  %v8705_v48 = vpack.i.bf16 %v8594_v19, %v8596_v38 }
 0xd62   : > { %3560 = vmax.xlane.f32.xlu1 %v3559_v50 }
 0xd63   : > { %v3581_v47 = vmul.f32 1.442695, %v3572_v52 }
 0xd65   : > { %6895 = vpow2.f32 %v3581_v47 }
 0xd68   : > { %3563 = vmax.xlane.f32.xlu2 %v3562_v40 }
 0xd6b   : > { %v8699_v49 = vpop.eup %6895 }
 0xd6c   : > { %v3598_v3 = vsel %vm1195_vm4, %v8699_v49, 0.0 }
 0xd6d   : > { %3599 = vadd.xlane.f32.xlu1 %v3598_v3 }
 0xd80   : > { %6683 = vrot.lane.b32.xlu2 %v8705_v48, %s9853_s27 }
 0xd88   : > { %3961 = vrot.lane.b32.xlu2 %v8606_v26, %s9809_s28 }
 0xd90   : > { %3959 = vrot.lane.b32.xlu2 %v8608_v15, %s9815_s30 }
 0xd92   : > { %v3615_v28 = vpop.xlane.xlu1 %3614 }
 0xd93   : > { %6897 = vrcp.f32 %v3615_v28  ;;  %v3714_v61 = vand.u32 2147483648, %v3615_v28  ;;  %v3712_v63 = vand.u32 2147483647, %v3615_v28  ;;  %vm3708_vm6 = vweird.f32 %v3615_v28 }
 0xd95   : > { %v3715_v0 = vor.u32 1.1754944e-38, %v3714_v61  ;;  %vm3713_vm8 = vcmp.eq.f32.partialorder %v3712_v63, 8.507059e+37 }
 0xd99   : > { %v6898_v2 = vpop.eup %6897 }
 0xd9a   : > { %v3704_v27 = vmul.f32 %v6898_v2, %v3615_v28  ;;  %v3618_v17 = vpop.xlane.xlu2 %3617  ;;  %vm3709_vm5 = vweird.f32 %v6898_v2 }
 0xd9b   : > { %6899 = vrcp.f32 %v3618_v17  ;;  %vm3710_vm7 = vmor %vm3708_vm6, %vm3709_vm5  ;;  %v3728_v41 = vand.u32 2147483648, %v3618_v17  ;;  %v3726_v52 = vand.u32 2147483647, %v3618_v17  ;;  %vm3722_vm10 = vweird.f32 %v3618_v17 }
 0xd9c   : > { %v3705_v42 = vsub.f32 1.0, %v3704_v27 }
 0xd9d   : > { %v3729_v44 = vor.u32 1.1754944e-38, %v3728_v41  ;;  %vm3727_vm12 = vcmp.eq.f32.partialorder %v3726_v52, 8.507059e+37 }
 0xd9e   : > { %v3706_v45 = vmul.f32 %v6898_v2, %v3705_v42 }
 0xda0   : > { %v3707_v43 = vadd.f32 %v6898_v2, %v3706_v45 }
 0xda1   : > { %v6900_v46 = vpop.eup %6899 }
 0xda2   : > { %v3711_v36 = vsel %vm3710_vm7, %v6898_v2, %v3707_v43  ;;  %v3718_v14 = vmul.f32 %v6900_v46, %v3618_v17  ;;  %vm3723_vm9 = vweird.f32 %v6900_v46  ;;  %v3597_v2 = vpop.xlane.xlu0 %3596 }
 0xda3   : > { %v3716_v62 = vsel %vm3713_vm8, %v3715_v0, %v3711_v36  ;;  %vm3724_vm11 = vmor %vm3722_vm10, %vm3723_vm9  ;;  %6901 = vrcp.f32 %v3597_v2  ;;  %vm3624_vm14 = vweird.f32 %v3597_v2 }
 0xda4   : > { %v3737_v55 = vmul.f32 %v8672_v57, %v3716_v62  ;;  %v3719_v29 = vsub.f32 1.0, %v3718_v14  ;;  %v3999_v57 = vpop.permute.xlu2 %3998  ;;  %v3628_v14 = vand.u32 2147483647, %v3597_v2 }
 0xda6   : > { %v3720_v23 = vmul.f32 %v6900_v46, %v3719_v29  ;;  %6382 = vmatmul.msk.f32.vlgmr.msra.gmra.mxu3 %vm1195_vm4, %v3737_v55  ;;  %vm3629_vm2 = vcmp.eq.f32.partialorder %v3628_v14, 8.507059e+37 }
 0xda8   : > { %v3721_v50 = vadd.f32 %v6900_v46, %v3720_v23 }
 0xda9   : > { %v6902_v27 = vpop.eup %6901 }
 0xdaa   : > { %v4001_v47 = vpop.permute.xlu1 %4000  ;;  %v3725_v40 = vsel %vm3724_vm11, %v6900_v46, %v3721_v50  ;;  %v3620_v17 = vmul.f32 %v6902_v27, %v3597_v2  ;;  %vm3625_vm13 = vweird.f32 %v6902_v27 }
 0xdab   : > { %6397 = vmatpush.xpose.msk.msrb.mxu3 %vm662_vm0, %v4001_v47  ;;  %v3730_v3 = vsel %vm3727_vm12, %v3729_v44, %v3725_v40  ;;  %vm3626_vm15 = vmor %vm3624_vm14, %vm3625_vm13 }
 0xdac   : > { %v3738_v28 = vmul.f32 %v8676_v54, %v3730_v3  ;;  %v3621_v42 = vsub.f32 1.0, %v3620_v17 }
 0xdae   : > { %6383 = vmatmul.msk.f32.gmra.mxu3 %vm1195_vm4, %v3738_v28  ;;  %v3622_v43 = vmul.f32 %v6902_v27, %v3621_v42 }
 0xdb0   : > { %v3623_v0 = vadd.f32 %v6902_v27, %v3622_v43  ;;  %v8736_v43 = vpack.i.bf16 %v8606_v26, %v8608_v15 }
 0xdb2   : > { %v3627_v29 = vsel %vm3626_vm15, %v6902_v27, %v3623_v0  ;;  %v9857_v0 = vld [vmem:[#allocation25_spill] sm:$0xff] }
 0xdb6   : > { %6398 = vmatmul.msk.f32.vlgmr.msrb.gmra.mxu3 %vm662_vm0, %v3997_v51  ;;  %v3630_v51 = vand.u32 2147483648, %v3597_v2 }
 0xdbe   : > { %6399 = vmatmul.msk.f32.gmra.mxu3 %vm662_vm0, %v3999_v57 }
 0xdd5   : > { %v3561_v61 = vpop.xlane.xlu1 %3560 }
 0xdd6   : > { %v3575_v45 = vsub.f32 %v8690_v59, %v3561_v61  ;;  %v3631_v59 = vor.u32 1.1754944e-38, %v3630_v51 }
 0xdd8   : > { %v3587_v63 = vmul.f32 1.442695, %v3575_v45  ;;  %v3632_v23 = vsel %vm3629_vm2, %v3631_v59, %v3627_v29 }
 0xdd9   : > { %v3731_v40 = vmul.f32 %v8680_v22, %v3632_v23 }
 0xdda   : > { %6903 = vpow2.f32 %v3587_v63 }
 0xddb   : > { %v3564_v46 = vpop.xlane.xlu2 %3563 }
 0xddc   : > { %v3576_v54 = vsub.f32 %v8695_v37, %v3564_v46 }
 0xdde   : > { %v3589_v36 = vmul.f32 1.442695, %v3576_v54 }
 0xde0   : > { %v8722_v62 = vpop.eup %6903  ;;  %6905 = vpow2.f32 %v3589_v36  ;;  %v3600_v55 = vpop.xlane.xlu1 %3599 }
 0xde1   : > { %6907 = vrcp.f32 %v3600_v55  ;;  %v3607_v41 = vsel %vm1195_vm4, %v8722_v62, 0.0  ;;  %v3644_v2 = vand.u32 2147483648, %v3600_v55  ;;  %v3642_v17 = vand.u32 2147483647, %v3600_v55 }
 0xde2   : > { %3608 = vadd.xlane.f32.xlu0 %v3607_v41  ;;  %vm3638_vm5 = vweird.f32 %v3600_v55 }
 0xde3   : > { %v6684_v37 = vpop.permute.xlu2 %6683  ;;  %v3645_v61 = vor.u32 1.1754944e-38, %v3644_v2  ;;  %vm3643_vm7 = vcmp.eq.f32.partialorder %v3642_v17, 8.507059e+37 }
 0xde4   : > { %v6685_v52 = vunpack.i.l.bf16 %v6684_v37  ;;  %v6686_v44 = vunpack.i.h.bf16 %v6684_v37 }
 0xde6   : > { %v8726_v50 = vpop.eup %6905  ;;  %3765 = vmatpush.msrb.mxu2 %v6685_v52 }
 0xde7   : > { %v6908_v47 = vpop.eup %6907  ;;  %v3610_v3 = vsel %vm1195_vm4, %v8726_v50, 0.0 }
 0xde8   : > { %v3634_v28 = vmul.f32 %v6908_v47, %v3600_v55  ;;  %3766 = vmatpush.msrb.mxu2 %v6686_v44  ;;  %3611 = vadd.xlane.f32.xlu1 %v3610_v3  ;;  %vm3639_vm3 = vweird.f32 %v6908_v47  ;;  %v9858_v55 = vld [vmem:[#allocation26_spill] sm:$0xff] }
 0xde9   : > { %6376 = vmatmul.msk.f32.vlgmr.msrb.gmra.mxu2 %vm1195_vm4, %v3731_v40  ;;  %vm3640_vm6 = vmor %vm3638_vm5, %vm3639_vm3 }
 0xdea   : > { %v3635_v57 = vsub.f32 1.0, %v3634_v28 }
 0xdec   : > { %v3636_v27 = vmul.f32 %v6908_v47, %v3635_v57 }
 0xdee   : > { %v3637_v42 = vadd.f32 %v6908_v47, %v3636_v27 }
 0xdf0   : > { %v3641_v45 = vsel %vm3640_vm6, %v6908_v47, %v3637_v42 }
 0xdf1   : > { %v3646_v22 = vsel %vm3643_vm7, %v3645_v61, %v3641_v45 }
 0xdf2   : > { %v3732_v63 = vmul.f32 %v8699_v49, %v3646_v22 }
 0xdf4   : > { %6377 = vmatmul.msk.f32.gmra.mxu2 %vm1195_vm4, %v3732_v63 }
 0xdf6   : > { %6688 = vrot.lane.b32.xlu0 %v8736_v43, %s9853_s27 }
 0xdfe   : > { %3957 = vrot.lane.b32.xlu0 %v8606_v26, %s9815_s30 }
 0xe01   : > { %3963 = vrot.lane.b32.xlu1 %v8608_v15, %s9809_s28 }
 0xe29   : > { %v8744_v46 = vpop.f32.mrf.mxu3 }
 0xe31   : > { %v8746_v54 = vpop.f32.mrf.mxu3 }
 0xe39   : > { %v4029_v49 = vpop.f32.mrf.mxu3 }
 0xe3a   : > { %v8749_v51 = vadd.f32 %v4029_v49, %v9857_v0 }
 0xe3c   : > { %v4053_v36 = vsel %vm1195_vm4, %v8749_v51, -inf }
 0xe3d   : > { %4054 = vmax.xlane.f32.xlu0 %v4053_v36 }
 0xe41   : > { %v4032_v14 = vpop.f32.mrf.mxu3 }
 0xe42   : > { %v8754_v29 = vadd.f32 %v4032_v14, %v9858_v55 }
 0xe44   : > { %v4056_v59 = vsel %vm1195_vm4, %v8754_v29, -inf }
 0xe45   : > { %4057 = vmax.xlane.f32.xlu1 %v4056_v59 }
 0xe51   : > { %4540 = vrot.lane.b32.xlu0 %v8598_v10, %s9859_s23 }
 0xe55   : > { %v3609_v41 = vpop.xlane.xlu0 %3608 }
 0xe56   : > { %6909 = vrcp.f32 %v3609_v41  ;;  %v3686_v57 = vand.u32 2147483648, %v3609_v41  ;;  %vm3680_vm9 = vweird.f32 %v3609_v41  ;;  %v3684_v2 = vand.u32 2147483647, %v3609_v41 }
 0xe58   : > { %v3687_v61 = vor.u32 1.1754944e-38, %v3686_v57  ;;  %vm3685_vm11 = vcmp.eq.f32.partialorder %v3684_v2, 8.507059e+37 }
 0xe59   : > { %4536 = vrot.lane.b32.xlu0 %v8598_v10, %s9860_s6 }
 0xe5b   : > { %v3612_v37 = vpop.xlane.xlu1 %3611 }
 0xe5c   : > { %6911 = vrcp.f32 %v3612_v37  ;;  %v6910_v23 = vpop.eup %6909  ;;  %v3700_v0 = vand.u32 2147483648, %v3612_v37  ;;  %vm3694_vm13 = vweird.f32 %v3612_v37  ;;  %v3698_v55 = vand.u32 2147483647, %v3612_v37 }
 0xe5d   : > { %v3676_v52 = vmul.f32 %v6910_v23, %v3609_v41  ;;  %vm3681_vm8 = vweird.f32 %v6910_v23 }
 0xe5e   : > { %6693 = vrot.lane.b32.xlu1 %v8664_v53, %s9861_s24  ;;  %vm3682_vm10 = vmor %vm3680_vm9, %vm3681_vm8  ;;  %v3701_v41 = vor.u32 1.1754944e-38, %v3700_v0  ;;  %vm3699_vm15 = vcmp.eq.f32.partialorder %v3698_v55, 8.507059e+37 }
 0xe5f   : > { %v3677_v44 = vsub.f32 1.0, %v3676_v52 }
 0xe61   : > { %4620 = vrot.lane.b32.xlu0 %v8616_v6, %s9859_s23  ;;  %v3678_v40 = vmul.f32 %v6910_v23, %v3677_v44 }
 0xe62   : > { %v6912_v47 = vpop.eup %6911 }
 0xe63   : > { %v3690_v3 = vmul.f32 %v6912_v47, %v3612_v37  ;;  %v3679_v28 = vadd.f32 %v6910_v23, %v3678_v40  ;;  %vm3695_vm12 = vweird.f32 %v6912_v47  ;;  %v3962_v37 = vpop.permute.xlu2 %3961 }
 0xe64   : > { %vm3696_vm14 = vmor %vm3694_vm13, %vm3695_vm12 }
 0xe65   : > { %v3691_v27 = vsub.f32 1.0, %v3690_v3  ;;  %v3683_v17 = vsel %vm3682_vm10, %v6910_v23, %v3679_v28 }
 0xe66   : > { %4538 = vrot.lane.b32.xlu1 %v8602_v18, %s9860_s6  ;;  %v3688_v22 = vsel %vm3685_vm11, %v3687_v61, %v3683_v17 }
 0xe67   : > { %v3692_v42 = vmul.f32 %v6912_v47, %v3691_v27  ;;  %v3735_v14 = vmul.f32 %v8722_v62, %v3688_v22 }
 0xe68   : > { %v6689_v45 = vpop.permute.xlu0 %6688 }
 0xe69   : > { %4614 = vrot.lane.b32.xlu0 %v8612_v9, %s9860_s6  ;;  %v6690_v63 = vunpack.i.l.bf16 %v6689_v45  ;;  %v3693_v49 = vadd.f32 %v6912_v47, %v3692_v42  ;;  %v6691_v36 = vunpack.i.h.bf16 %v6689_v45 }
 0xe6b   : > { %3835 = vmatpush.msra.mxu2 %v6690_v63  ;;  %v3697_v59 = vsel %vm3696_vm14, %v6912_v47, %v3693_v49  ;;  %v3960_v47 = vpop.permute.xlu2 %3959 }
 0xe6c   : > { %v3702_v23 = vsel %vm3699_vm15, %v3701_v41, %v3697_v59 }
 0xe6d   : > { %3836 = vmatpush.msra.mxu2 %v6691_v36  ;;  %v3736_v62 = vmul.f32 %v8726_v50, %v3702_v23  ;;  %v8804_v36 = vpop.f32.mrf.mxu2 }
 0xe6e   : > { %4618 = vrot.lane.b32.xlu1 %v8612_v9, %s9859_s23  ;;  %6380 = vmatmul.msk.f32.vlgmr.msra.gmra.mxu2 %vm1195_vm4, %v3735_v14 }
 0xe70   : > { %v3958_v44 = vpop.permute.xlu0 %3957 }
 0xe71   : > { %4616 = vrot.lane.b32.xlu0 %v8616_v6, %s9860_s6 }
 0xe73   : > { %v3964_v52 = vpop.permute.xlu1 %3963 }
 0xe74   : > { %6392 = vmatpush.xpose.msk.msrb.mxu2 %vm662_vm0, %v3964_v52 }
 0xe76   : > { %6381 = vmatmul.msk.f32.gmra.mxu2 %vm1195_vm4, %v3736_v62 }
 0xe77   : > { %v8808_v55 = vpop.f32.mrf.mxu2 }
 0xe78   : > { %6393 = vmatpush.xpose.msk.msrb.mxu2 %vm662_vm0, %v3962_v37  ;;  %v9862_v37 = vld [vmem:[#allocation23_spill] sm:$0xff] }
 0xe79   : > { %3924 = vrot.lane.b32.xlu0 %v8602_v18, %s9809_s28 }
 0xe7e   : > { %6394 = vmatmul.msk.f32.vlgmr.msrb.gmra.mxu2 %vm662_vm0, %v3958_v44 }
 0xe81   : > { %3922 = vrot.lane.b32.xlu0 %v8598_v10, %s9809_s28 }
 0xe86   : > { %6395 = vmatmul.msk.f32.gmra.mxu2 %vm662_vm0, %v3960_v47 }
 0xeb0   : > { %v4055_v40 = vpop.xlane.xlu0 %4054 }
 0xeb1   : > { %v4065_v50 = vsub.f32 %v8749_v51, %v4055_v40 }
 0xeb3   : > { %v4079_v3 = vmul.f32 1.442695, %v4065_v50  ;;  %v9863_v50 = vld [vmem:[#allocation24_spill] sm:$0xff] }
 0xeb5   : > { %6913 = vpow2.f32 %v4079_v3 }
 0xeb8   : > { %v4058_v28 = vpop.xlane.xlu1 %4057 }
 0xeb9   : > { %v4066_v57 = vsub.f32 %v8754_v29, %v4058_v28 }
 0xebb   : > { %v8788_v2 = vpop.eup %6913  ;;  %v4081_v27 = vmul.f32 1.442695, %v4066_v57 }
 0xebc   : > { %v4101_v17 = vsel %vm1195_vm4, %v8788_v2, 0.0 }
 0xebd   : > { %6915 = vpow2.f32 %v4081_v27  ;;  %4102 = vadd.xlane.f32.xlu2 %v4101_v17 }
 0xec3   : > { %v8792_v42 = vpop.eup %6915  ;;  %v4541_v61 = vpop.permute.xlu0 %4540 }
 0xec4   : > { %v4104_v45 = vsel %vm1195_vm4, %v8792_v42, 0.0 }
 0xec5   : > { %4105 = vadd.xlane.f32.xlu0 %v4104_v45 }
 0xecb   : > { %v8796_v51 = vpop.permute.xlu0 %4536 }
 0xed0   : > { %v6694_v22 = vpop.permute.xlu1 %6693 }
 0xed1   : > { %v6695_v63 = vunpack.i.l.bf16 %v6694_v22  ;;  %v6696_v29 = vunpack.i.h.bf16 %v6694_v22 }
 0xed3   : > { %v4621_v49 = vpop.permute.xlu0 %4620  ;;  %4358 = vmatpush.msra.mxu3 %v6695_v63 }
 0xed5   : > { %4542 = vrot.lane.b32.xlu2 %v8602_v18, %s9859_s23  ;;  %4359 = vmatpush.msra.mxu3 %v6696_v29 }
 0xed9   : > { %3920 = vrot.lane.b32.xlu0 %v8602_v18, %s9815_s30 }
 0xedb   : > { %v8802_v0 = vpop.permute.xlu0 %4614 }
 0xee3   : > { %v8806_v14 = vpop.permute.xlu0 %4616 }
 0xeeb   : > { %v3925_v59 = vpop.permute.xlu0 %3924 }
 0xeec   : > { %6388 = vmatpush.xpose.msk.msrb.mxu1 %vm662_vm0, %v3925_v59 }
 0xef1   : > { %v8811_v41 = vpop.f32.mrf.mxu2 }
 0xef3   : > { %v3923_v23 = vpop.permute.xlu0 %3922 }
 0xef4   : > { %6389 = vmatpush.xpose.msk.msrb.mxu1 %vm662_vm0, %v3923_v23 }
 0xef9   : > { %v8814_v52 = vpop.f32.mrf.mxu2 }
 0xf01   : > { %v3990_v62 = vpop.f32.mrf.mxu2 }
 0xf02   : > { %v8817_v44 = vadd.f32 %v3990_v62, %v9862_v37  ;;  %v4539_v62 = vpop.permute.xlu1 %4538 }
 0xf04   : > { %v4047_v47 = vsel %vm1195_vm4, %v8817_v44, -inf }
 0xf05   : > { %4048 = vmax.xlane.f32.xlu2 %v4047_v47 }
 0xf09   : > { %v3993_v40 = vpop.f32.mrf.mxu2 }
 0xf0a   : > { %v8822_v3 = vadd.f32 %v3993_v40, %v9863_v50 }
 0xf0c   : > { %v4050_v28 = vsel %vm1195_vm4, %v8822_v3, -inf }
 0xf0d   : > { %4051 = vmax.xlane.f32.xlu1 %v4050_v28 }
 0xf1d   : > { %3918 = vrot.lane.b32.xlu2 %v8598_v10, %s9815_s30 }
 0xf25   : > { %6698 = vrot.lane.b32.xlu2 %v8736_v43, %s9861_s24 }
 0xf30   : > { %v4103_v57 = vpop.xlane.xlu2 %4102 }
 0xf31   : > { %6917 = vrcp.f32 %v4103_v57  ;;  %v4202_v29 = vand.u32 2147483648, %v4103_v57  ;;  %v4200_v23 = vand.u32 2147483647, %v4103_v57  ;;  %vm4196_vm3 = vweird.f32 %v4103_v57 }
 0xf33   : > { %v4203_v40 = vor.u32 1.1754944e-38, %v4202_v29  ;;  %vm4201_vm6 = vcmp.eq.f32.partialorder %v4200_v23, 8.507059e+37  ;;  %v4619_v29 = vpop.permute.xlu1 %4618 }
 0xf37   : > { %v6918_v27 = vpop.eup %6917 }
 0xf38   : > { %v4192_v17 = vmul.f32 %v6918_v27, %v4103_v57  ;;  %v4543_v45 = vpop.permute.xlu2 %4542  ;;  %v4106_v22 = vpop.xlane.xlu0 %4105  ;;  %vm4197_vm2 = vweird.f32 %v6918_v27 }
 0xf39   : > { %6919 = vrcp.f32 %v4106_v22  ;;  %6428 = vmatpush.xpose.msk.msrb.mxu3 %vm662_vm0, %v4543_v45  ;;  %vm4198_vm5 = vmor %vm4196_vm3, %vm4197_vm2  ;;  %vm4210_vm8 = vweird.f32 %v4106_v22 }
 0xf3a   : > { %v4193_v63 = vsub.f32 1.0, %v4192_v17  ;;  %v4216_v17 = vand.u32 2147483648, %v4106_v22 }
 0xf3c   : > { %v4194_v59 = vmul.f32 %v6918_v27, %v4193_v63  ;;  %v4214_v63 = vand.u32 2147483647, %v4106_v22  ;;  %v4217_v57 = vor.u32 1.1754944e-38, %v4216_v17 }
 0xf3d   : > { %6429 = vmatpush.xpose.msk.msrb.mxu3 %vm662_vm0, %v4541_v61 }
 0xf3e   : > { %v4195_v37 = vadd.f32 %v6918_v27, %v4194_v59  ;;  %vm4215_vm10 = vcmp.eq.f32.partialorder %v4214_v63, 8.507059e+37 }
 0xf3f   : > { %v6920_v47 = vpop.eup %6919 }
 0xf40   : > { %v4199_v50 = vsel %vm4198_vm5, %v6918_v27, %v4195_v37  ;;  %v4206_v28 = vmul.f32 %v6920_v47, %v4106_v22  ;;  %vm4211_vm7 = vweird.f32 %v6920_v47 }
 0xf41   : > { %v4204_v11 = vsel %vm4201_vm6, %v4203_v40, %v4199_v50  ;;  %vm4212_vm9 = vmor %vm4210_vm8, %vm4211_vm7 }
 0xf42   : > { %v4225_v7 = vmul.f32 %v8788_v2, %v4204_v11  ;;  %v4207_v45 = vsub.f32 1.0, %v4206_v28  ;;  %v9864_v11 = vld [vmem:[#allocation21_spill] sm:$0xff] }
 0xf43   : > { %v3468_v2 = vadd.f32 %v8650_v12, %v9864_v11 }
 0xf44   : > { %v4208_v34 = vmul.f32 %v6920_v47, %v4207_v45  ;;  %6406 = vmatmul.msk.f32.vlgmr.msra.gmra.mxu3 %vm1195_vm4, %v4225_v7 }
 0xf45   : > { %6436 = vmatpush.xpose.msk.msra.mxu3 %vm662_vm0, %v4621_v49  ;;  %v3553_v7 = vsel %vm1195_vm4, %v3468_v2, -inf }
 0xf46   : > { %v4209_v61 = vadd.f32 %v6920_v47, %v4208_v34  ;;  %v8854_v34 = vpack.i.bf16 %v8598_v10, %v8602_v18 }
 0xf48   : > { %v4213_v27 = vsel %vm4212_vm9, %v6920_v47, %v4209_v61 }
 0xf49   : > { %6437 = vmatpush.xpose.msk.msra.mxu3 %vm662_vm0, %v4619_v29  ;;  %v4218_v59 = vsel %vm4215_vm10, %v4217_v57, %v4213_v27 }
 0xf4a   : > { %v4226_v23 = vmul.f32 %v8792_v42, %v4218_v59  ;;  %v9865_v59 = vld [vmem:[#allocation22_spill] sm:$0xff] }
 0xf4b   : > { %v3921_v47 = vpop.permute.xlu0 %3920  ;;  %v8892_v11 = vadd.f32 %v8652_v4, %v9865_v59 }
 0xf4c   : > { %6407 = vmatmul.msk.f32.gmra.mxu3 %vm1195_vm4, %v4226_v23 }
 0xf4e   : > { %3554 = vmax.xlane.f32.xlu2 %v3553_v7  ;;  %v9866_v7 = vld [vmem:[#allocation33_spill] sm:$0xff] }
 0xf54   : > { %6430 = vmatmul.msk.f32.vlgmr.msrb.gmra.mxu3 %vm662_vm0, %v8796_v51 }
 0xf5c   : > { %6431 = vmatmul.msk.f32.gmra.mxu3 %vm662_vm0, %v4539_v62 }
 0xf64   : > { %6438 = vmatmul.msk.f32.vlgmr.msra.gmra.mxu3 %vm662_vm0, %v8802_v0 }
 0xf66   : > { %4499 = vrot.lane.b32.xlu2 %v8596_v38, %s9860_s6 }
 0xf6c   : > { %6439 = vmatmul.msk.f32.gmra.mxu3 %vm662_vm0, %v8806_v14 }
 0xf6e   : > { %4577 = vrot.lane.b32.xlu2 %v8608_v15, %s9860_s6 }
 0xf76   : > { %6703 = vrot.lane.b32.xlu2 %v8854_v34, %s9853_s27  ;;  %s6071_s27 = sshll.u32 %s6067_s5, 4  ;;  %s7057_s5 = scalar_lea.hbm %s9694_s18, 16  ;;  %s6072_s27 = int_to_ptr.hbm [resolvable:$true] %s6071_s27 }
 0xf77   : > { %s7051_s29 = sshra.s32 %s6072_s27, 4  ;;  %s7052_s29 = int_to_ptr.hbm [resolvable:$true] %s7051_s29 }
 0xf78   : > { %v4049_v12 = vpop.xlane.xlu2 %4048  ;;  %p7058_p0 = scmp.lt.s32.totalorder %s7052_s29, %s9694_s18 }
 0xf79   : > { %v4063_v42 = vsub.f32 %v8817_v44, %v4049_v12 }
 0xf7b   : > { %v4075_v51 = vmul.f32 1.442695, %v4063_v42  ;;  %v3556_v42 = vsel %vm1195_vm4, %v8892_v11, -inf }
 0xf7d   : > { %6921 = vpow2.f32 %v4075_v51 }
 0xf80   : > { %v3919_v49 = vpop.permute.xlu2 %3918  ;;  %v4052_v0 = vpop.xlane.xlu1 %4051 }
 0xf81   : > { %v4064_v22 = vsub.f32 %v8822_v3, %v4052_v0  ;;  %6390 = vmatmul.msk.f32.vlgmr.msrb.gmra.mxu1 %vm662_vm0, %v3919_v49 }
 0xf83   : > { %v8861_v14 = vpop.eup %6921  ;;  %v4077_v62 = vmul.f32 1.442695, %v4064_v22 }
 0xf84   : > { %v4095_v37 = vsel %vm1195_vm4, %v8861_v14, 0.0 }
 0xf85   : > { %6923 = vpow2.f32 %v4077_v62  ;;  %4096 = vadd.xlane.f32.xlu0 %v4095_v37 }
 0xf88   : > { %v6699_v40 = vpop.permute.xlu2 %6698 }
 0xf89   : > { %v6700_v50 = vunpack.i.l.bf16 %v6699_v40  ;;  %6391 = vmatmul.msk.f32.gmra.mxu1 %vm662_vm0, %v3921_v47  ;;  %v6701_v28 = vunpack.i.h.bf16 %v6699_v40 }
 0xf8b   : > { %v8866_v44 = vpop.eup %6923  ;;  %4323 = vmatpush.msra.mxu2 %v6700_v50 }
 0xf8c   : > { %v4098_v3 = vsel %vm1195_vm4, %v8866_v44, 0.0 }
 0xf8d   : > { %4324 = vmatpush.msra.mxu2 %v6701_v28  ;;  %4099 = vadd.xlane.f32.xlu1 %v4098_v3 }
 0xf99   : > { %4497 = vrot.lane.b32.xlu0 %v8594_v19, %s9860_s6 }
 0xfa1   : > { %4581 = vrot.lane.b32.xlu0 %v8608_v15, %s9859_s23 }
 0xfa6   : > { %4503 = vrot.lane.b32.xlu1 %v8596_v38, %s9859_s23 }
 0xfa9   : > { %4579 = vrot.lane.b32.xlu0 %v8606_v26, %s9859_s23 }
 0xfae   : > { %4501 = vrot.lane.b32.xlu1 %v8594_v19, %s9859_s23 }
 0xfb1   : > { %4575 = vrot.lane.b32.xlu0 %v8606_v26, %s9860_s6  ;;  %s615_s6 = sand.u32 1, %s7093_s19  }
 0xfb2   : > { %s6057_s23 = scalar_lea.sflag [#allocation5], %s615_s6 }
 0xfc1   : > { %v3555_v45 = vpop.xlane.xlu2 %3554 }
 0xfc2   : > { %v3573_v61 = vsub.f32 %v3468_v2, %v3555_v45 }
 0xfc4   : > { %v3583_v27 = vmul.f32 1.442695, %v3573_v61 }
 0xfc6   : > { %6925 = vpow2.f32 %v3583_v27 }
 0xfc7   : > { %v8882_v17 = vpop.f32.mrf.mxu3 }
 0xfc9   : > { %v8884_v63 = vpop.permute.xlu2 %4499 }
 0xfcc   : > { %v8901_v0 = vpop.eup %6925 }
 0xfcd   : > { %v3601_v4 = vsel %vm1195_vm4, %v8901_v0, 0.0 }
 0xfcf   : > { %v8886_v57 = vpop.f32.mrf.mxu3 }
 0xfd1   : > { %v8888_v29 = vpop.permute.xlu2 %4577 }
 0xfd7   : > { %v4569_v23 = vpop.f32.mrf.mxu3 }
 0xfd8   : > { %v8895_v12 = vadd.f32 %v4569_v23, %v9866_v7  ;;  %3557 = vmax.xlane.f32.xlu1 %v3556_v42 }
 0xfd9   : > { %v6704_v51 = vpop.permute.xlu2 %6703 }
 0xfda   : > { %v4659_v2 = vsel %vm1195_vm4, %v8895_v12, -inf  ;;  %v6705_v49 = vunpack.i.l.bf16 %v6704_v51  ;;  %v6706_v22 = vunpack.i.h.bf16 %v6704_v51 }
 0xfdb   : > { %4660 = vmax.xlane.f32.xlu2 %v4659_v2 }
 0xfdc   : > { %3800 = vmatpush.msrb.mxu0 %v6705_v49 }
 0xfde   : > { %3801 = vmatpush.msrb.mxu0 %v6706_v22 }
 0xfdf   : > { %v8909_v47 = vpop.f32.mrf.mxu3 }
 0xfe0   : > { %3602 = vadd.xlane.f32.xlu1 %v3601_v4 }
 0xfe7   : > { %v8913_v51 = vpop.f32.mrf.mxu3 }
 0xff3   : > { %6713 = vrot.lane.b32.xlu2 %v8664_v53, %s9867_s2 }
 0xff8   : > { %v4097_v62 = vpop.xlane.xlu0 %4096 }
 0xff9   : > { %6927 = vrcp.f32 %v4097_v62  ;;  %3885 = vrot.lane.b32.xlu1 %v8596_v38, %s9809_s28  ;;  %v4174_v3 = vand.u32 2147483648, %v4097_v62  ;;  %v4172_v61 = vand.u32 2147483647, %v4097_v62  ;;  %vm4168_vm12 = vweird.f32 %v4097_v62 }
 0xffb   : > { %v4175_v23 = vor.u32 1.1754944e-38, %v4174_v3  ;;  %vm4173_vm14 = vcmp.eq.f32.partialorder %v4172_v61, 8.507059e+37 }
 0xfff   : > { %v6928_v37 = vpop.eup %6927 }
0x1000   : > { %v4164_v40 = vmul.f32 %v6928_v37, %v4097_v62  ;;  %v4100_v50 = vpop.xlane.xlu1 %4099  ;;  %vm4169_vm11 = vweird.f32 %v6928_v37 }
0x1001   : > { %6929 = vrcp.f32 %v4100_v50  ;;  %3883 = vrot.lane.b32.xlu1 %v8594_v19, %s9809_s28  ;;  %vm4170_vm13 = vmor %vm4168_vm12, %vm4169_vm11  ;;  %v4188_v4 = vand.u32 2147483648, %v4100_v50  ;;  %vm4182_vm2 = vweird.f32 %v4100_v50  ;;  %s9873_s28 = smov 72  }
0x1002   : > { %v4165_v28 = vsub.f32 1.0, %v4164_v40 }
0x1004   : > { %v4166_v45 = vmul.f32 %v6928_v37, %v4165_v28  ;;  %v4186_v28 = vand.u32 2147483647, %v4100_v50 }
0x1006   : > { %v4167_v27 = vadd.f32 %v6928_v37, %v4166_v45  ;;  %vm4187_vm5 = vcmp.eq.f32.partialorder %v4186_v28, 8.507059e+37 }
0x1007   : > { %v6930_v59 = vpop.eup %6929 }
0x1008   : > { %v4171_v7 = vsel %vm4170_vm13, %v6928_v37, %v4167_v27  ;;  %v4178_v42 = vmul.f32 %v6930_v59, %v4100_v50  ;;  %vm4183_vm15 = vweird.f32 %v6930_v59  ;;  %v4189_v37 = vor.u32 1.1754944e-38, %v4188_v4  ;;  %v4650_v27 = vpop.f32.mrf.mxu3  ;;  %v9869_v4 = vld [vmem:[#allocation29_spill] sm:$0xff] }
0x1009   : > { %v4176_v2 = vsel %vm4173_vm14, %v4175_v23, %v4171_v7  ;;  %3879 = vrot.lane.b32.xlu1 %v8594_v19, %s9815_s30  ;;  %vm4184_vm3 = vmor %vm4182_vm2, %vm4183_vm15  ;;  %v9868_v23 = vld [vmem:[#allocation36_spill] sm:$0xff] }
0x100a   : > { %v4223_v49 = vmul.f32 %v8861_v14, %v4176_v2  ;;  %v4179_v22 = vsub.f32 1.0, %v4178_v42  ;;  %v8924_v7 = vadd.f32 %v4650_v27, %v9868_v23  ;;  %v9870_v23 = vld [vmem:[#allocation30_spill] sm:$0xff] }
0x100b   : > { %v4498_v45 = vpop.permute.xlu0 %4497 }
0x100c   : > { %v4180_v40 = vmul.f32 %v6930_v59, %v4179_v22  ;;  %6404 = vmatmul.msk.f32.vlgmr.msra.gmra.mxu2 %vm1195_vm4, %v4223_v49  ;;  %v4674_v50 = vsel %vm1195_vm4, %v8924_v7, -inf  ;;  %v3951_v49 = vpop.f32.mrf.mxu1 }
0x100e   : > { %v4181_v62 = vadd.f32 %v6930_v59, %v4180_v40  ;;  %v3952_v40 = vadd.f32 %v3951_v49, %v9869_v4 }
0x1010   : > { %v4185_v3 = vsel %vm4184_vm3, %v6930_v59, %v4181_v62  ;;  %v4041_v28 = vsel %vm1195_vm4, %v3952_v40, -inf }
0x1011   : > { %3881 = vrot.lane.b32.xlu1 %v8596_v38, %s9815_s30  ;;  %v4190_v61 = vsel %vm4187_vm5, %v4189_v37, %v4185_v3  ;;  %s9875_s30 = smov 104  }
0x1012   : > { %v4224_v14 = vmul.f32 %v8866_v44, %v4190_v61 }
0x1013   : > { %v4582_v59 = vpop.permute.xlu0 %4581 }
0x1014   : > { %6405 = vmatmul.msk.f32.gmra.mxu2 %vm1195_vm4, %v4224_v14  ;;  %v3954_v14 = vpop.f32.mrf.mxu1 }
0x1018   : > { %v4504_v42 = vpop.permute.xlu1 %4503 }
0x1019   : > { %6424 = vmatpush.xpose.msk.msrb.mxu2 %vm662_vm0, %v4504_v42  ;;  %v3955_v42 = vadd.f32 %v3954_v14, %v9870_v23 }
0x101b   : > { %v4580_v44 = vpop.permute.xlu0 %4579 }
0x101c   : > { %4675 = vmax.xlane.f32.xlu2 %v4674_v50 }
0x1020   : > { %v4502_v2 = vpop.permute.xlu1 %4501 }
0x1021   : > { %6425 = vmatpush.xpose.msk.msrb.mxu2 %vm662_vm0, %v4502_v2 }
0x1023   : > { %v4576_v22 = vpop.permute.xlu0 %4575 }
0x1024   : > { %6426 = vmatmul.msk.f32.vlgmr.msrb.gmra.mxu2 %vm662_vm0, %v4498_v45 }
0x1025   : > { %6432 = vmatpush.xpose.msk.msra.mxu2 %vm662_vm0, %v4582_v59 }
0x1029   : > { %6433 = vmatpush.xpose.msk.msra.mxu2 %vm662_vm0, %v4580_v44  ;;  %v4044_v44 = vsel %vm1195_vm4, %v3955_v42, -inf }
0x102c   : > { %6427 = vmatmul.msk.f32.gmra.mxu2 %vm662_vm0, %v8884_v63 }
0x1034   : > { %6434 = vmatmul.msk.f32.vlgmr.msra.gmra.mxu2 %vm662_vm0, %v4576_v22 }
0x103b   : > { %4042 = vmax.xlane.f32.xlu1 %v4041_v28 }
0x103c   : > { %6435 = vmatmul.msk.f32.gmra.mxu2 %vm662_vm0, %v8888_v29 }
0x104b   : > { %v3558_v62 = vpop.xlane.xlu1 %3557 }
0x104c   : > { %v3574_v37 = vsub.f32 %v8892_v11, %v3558_v62 }
0x104e   : > { %v3585_v3 = vmul.f32 1.442695, %v3574_v37 }
0x1050   : > { %6931 = vpow2.f32 %v3585_v3 }
0x1053   : > { %v3603_v45 = vpop.xlane.xlu1 %3602 }
0x1054   : > { %6933 = vrcp.f32 %v3603_v45  ;;  %v3658_v29 = vand.u32 2147483648, %v3603_v45  ;;  %v3656_v11 = vand.u32 2147483647, %v3603_v45  ;;  %vm3652_vm7 = vweird.f32 %v3603_v45 }
0x1056   : > { %v8941_v63 = vpop.eup %6931  ;;  %v3659_v22 = vor.u32 1.1754944e-38, %v3658_v29  ;;  %vm3657_vm9 = vcmp.eq.f32.partialorder %v3656_v11, 8.507059e+37 }
0x1057   : > { %v3604_v61 = vsel %vm1195_vm4, %v8941_v63, 0.0 }
0x1058   : > { %3605 = vadd.xlane.f32.xlu0 %v3604_v61 }
0x105a   : > { %v6934_v27 = vpop.eup %6933 }
0x105b   : > { %v3648_v50 = vmul.f32 %v6934_v27, %v3603_v45  ;;  %vm3653_vm6 = vweird.f32 %v6934_v27 }
0x105c   : > { %vm3654_vm8 = vmor %vm3652_vm7, %vm3653_vm6 }
0x105d   : > { %v3649_v59 = vsub.f32 1.0, %v3648_v50 }
0x105f   : > { %v3650_v2 = vmul.f32 %v6934_v27, %v3649_v59 }
0x1060   : > { %4045 = vmax.xlane.f32.xlu0 %v4044_v44 }
0x1061   : > { %v3651_v49 = vadd.f32 %v6934_v27, %v3650_v2 }
0x1063   : > { %v3655_v4 = vsel %vm3654_vm8, %v6934_v27, %v3651_v49 }
0x1064   : > { %v3660_v28 = vsel %vm3657_vm9, %v3659_v22, %v3655_v4  ;;  %v9872_v22 = vld [vmem:[#allocation35_spill] sm:$0xff] }
0x1065   : > { %v3733_v62 = vmul.f32 %v8901_v0, %v3660_v28  ;;  %v9871_v0 = vld [vmem:[#allocation31_spill] sm:$0xff]  ;;  %v8970_v4 = vadd.f32 %v8909_v47, %v9872_v22 }
0x1067   : > { %6378 = vmatmul.msk.f32.vlgmr.msrb.gmra.mxu0 %vm1195_vm4, %v3733_v62  ;;  %v4662_v28 = vsel %vm1195_vm4, %v8970_v4, -inf }
0x106b   : > { %v3886_v37 = vpop.permute.xlu1 %3885 }
0x106c   : > { %6384 = vmatpush.xpose.msk.msra.mxu0 %vm662_vm0, %v3886_v37 }
0x1073   : > { %v3884_v3 = vpop.permute.xlu1 %3883 }
0x1074   : > { %6708 = vrot.lane.b32.xlu0 %v8854_v34, %s9867_s2  ;;  %6385 = vmatpush.xpose.msk.msra.mxu0 %vm662_vm0, %v3884_v3 }
0x107b   : > { %v3880_v45 = vpop.permute.xlu1 %3879 }
0x1083   : > { %v8957_v27 = vpop.permute.xlu1 %3881 }
0x108f   : > { %v8953_v61 = vpop.f32.mrf.mxu2 }
0x1097   : > { %v8955_v14 = vpop.f32.mrf.mxu2 }
0x10a7   : > { %v4530_v23 = vpop.f32.mrf.mxu2 }
0x10a8   : > { %v8960_v50 = vadd.f32 %v4530_v23, %v9871_v0  ;;  %v4661_v23 = vpop.xlane.xlu2 %4660 }
0x10aa   : > { %v4653_v59 = vsel %vm1195_vm4, %v8960_v50, -inf }
0x10ab   : > { %4654 = vmax.xlane.f32.xlu1 %v4653_v59 }
0x10ae   : > { %v4043_v29 = vpop.xlane.xlu1 %4042 }
0x10af   : > { %v4061_v2 = vsub.f32 %v3952_v40, %v4043_v29  ;;  %v9874_v40 = vld [vmem:[#allocation34_spill] sm:$0xff] }
0x10b0   : > { %v8978_v62 = vadd.f32 %v8913_v51, %v9874_v40 }
0x10b1   : > { %v4071_v11 = vmul.f32 1.442695, %v4061_v2 }
0x10b2   : > { %v4671_v37 = vsel %vm1195_vm4, %v8978_v62, -inf }
0x10b3   : > { %6935 = vpow2.f32 %v4071_v11  ;;  %v4679_v11 = vsub.f32 %v8895_v12, %v4661_v23 }
0x10b9   : > { %v8964_v44 = vpop.eup %6935 }
0x10ba   : > { %v4089_v49 = vsel %vm1195_vm4, %v8964_v44, 0.0 }
0x10bb   : > { %4090 = vadd.xlane.f32.xlu0 %v4089_v49 }
0x10c3   : > { %4663 = vmax.xlane.f32.xlu0 %v4662_v28 }
0x10c4   : > { %5142 = vrot.lane.b32.xlu1 %v8608_v15, %s9873_s28 }
0x10cb   : > { %v3606_v3 = vpop.xlane.xlu0 %3605  ;;  %4672 = vmax.xlane.f32.xlu0 %v4671_v37  ;;  %v4689_v37 = vmul.f32 1.442695, %v4679_v11 }
0x10cc   : > { %6937 = vrcp.f32 %v3606_v3  ;;  %5140 = vrot.lane.b32.xlu1 %v8606_v26, %s9873_s28  ;;  %v3672_v49 = vand.u32 2147483648, %v3606_v3  ;;  %v3670_v28 = vand.u32 2147483647, %v3606_v3  ;;  %vm3666_vm11 = vweird.f32 %v3606_v3 }
0x10ce   : > { %v3673_v8 = vor.u32 1.1754944e-38, %v3672_v49  ;;  %vm3671_vm13 = vcmp.eq.f32.partialorder %v3670_v28, 8.507059e+37 }
0x10d2   : > { %v6938_v47 = vpop.eup %6937 }
0x10d3   : > { %v3662_v0 = vmul.f32 %v6938_v47, %v3606_v3  ;;  %v4046_v59 = vpop.xlane.xlu0 %4045  ;;  %vm3667_vm10 = vweird.f32 %v6938_v47 }
0x10d4   : > { %v4062_v29 = vsub.f32 %v3955_v42, %v4046_v59  ;;  %vm3668_vm12 = vmor %vm3666_vm11, %vm3667_vm10 }
0x10d5   : > { %v3663_v2 = vsub.f32 1.0, %v3662_v0  ;;  %v6714_v0 = vpop.permute.xlu2 %6713 }
0x10d6   : > { %v4073_v51 = vmul.f32 1.442695, %v4062_v29 }
0x10d7   : > { %v3664_v22 = vmul.f32 %v6938_v47, %v3663_v2 }
0x10d8   : > { %6939 = vpow2.f32 %v4073_v51 }
0x10d9   : > { %v3665_v40 = vadd.f32 %v6938_v47, %v3664_v22  ;;  %6941 = vpow2.f32 %v4689_v37 }
0x10db   : > { %v3669_v60 = vsel %vm3668_vm12, %v6938_v47, %v3665_v40 }
0x10dc   : > { %v3674_v31 = vsel %vm3671_vm13, %v3673_v8, %v3669_v60  ;;  %v6716_v8 = vunpack.i.h.bf16 %v6714_v0 }
0x10dd   : > { %v3734_v25 = vmul.f32 %v8941_v63, %v3674_v31  ;;  %v9876_v63 = vld [vmem:[#allocation32_spill] sm:$0xff]  ;;  %v4676_v37 = vpop.xlane.xlu2 %4675 }
0x10de   : > { %v8986_v42 = vpop.eup %6939 }
0x10df   : > { %6379 = vmatmul.msk.f32.gmra.mxu0 %vm1195_vm4, %v3734_v25  ;;  %5136 = vrot.lane.b32.xlu0 %v8606_v26, %s9875_s30  ;;  %v4092_v12 = vsel %vm1195_vm4, %v8986_v42, 0.0  ;;  %v8993_v3 = vpop.eup %6941  ;;  %v6715_v25 = vunpack.i.l.bf16 %v6714_v0  ;;  %v4533_v26 = vpop.f32.mrf.mxu2  ;;  %v4684_v0 = vsub.f32 %v8924_v7, %v4676_v37 }
0x10e0   : > { %4093 = vadd.xlane.f32.xlu2 %v4092_v12  ;;  %v4707_v60 = vsel %vm1195_vm4, %v8993_v3, 0.0  ;;  %v4534_v59 = vadd.f32 %v4533_v26, %v9876_v63 }
0x10e2   : > { %v4656_v29 = vsel %vm1195_vm4, %v4534_v59, -inf }
0x10e6   : > { %v6709_v23 = vpop.permute.xlu0 %6708 }
0x10e7   : > { %v6710_v47 = vunpack.i.l.bf16 %v6709_v23  ;;  %6386 = vmatmul.msk.f32.vlgmr.msra.gmra.mxu0 %vm662_vm0, %v3880_v45  ;;  %v6711_v31 = vunpack.i.h.bf16 %v6709_v23 }
0x10e8   : > { %4708 = vadd.xlane.f32.xlu2 %v4707_v60 }
0x10e9   : > { %4906 = vmatpush.msrb.mxu3 %v6710_v47 }
0x10eb   : > { %4907 = vmatpush.msrb.mxu3 %v6711_v31  ;;  %v4699_v31 = vmul.f32 1.442695, %v4684_v0 }
0x10ed   : > { %4976 = vmatpush.msra.mxu3 %v6715_v25 }
0x10ef   : > { %4977 = vmatpush.msra.mxu3 %v6716_v8  ;;  %6387 = vmatmul.msk.f32.gmra.mxu0 %vm662_vm0, %v8957_v27 }
0x10f6   : > { %4657 = vmax.xlane.f32.xlu1 %v4656_v29 }
0x111e   : > { %v4655_v45 = vpop.xlane.xlu1 %4654 }
0x111f   : > { %v4677_v2 = vsub.f32 %v8960_v50, %v4655_v45 }
0x1121   : > { %v4685_v11 = vmul.f32 1.442695, %v4677_v2 }
0x1123   : > { %6943 = vpow2.f32 %v4685_v11 }
0x1129   : > { %v9003_v49 = vpop.eup %6943 }
0x112a   : > { %v4701_v51 = vsel %vm1195_vm4, %v9003_v49, 0.0 }
0x112b   : > { %4702 = vadd.xlane.f32.xlu1 %v4701_v51 }
0x112e   : > { %v9007_v22 = vpop.xlane.xlu0 %4090 }
0x112f   : > { %vm4140_vm9 = vweird.f32 %v9007_v22 }
0x1136   : > { %v4664_v28 = vpop.xlane.xlu0 %4663  ;;  %v5143_v26 = vpop.permute.xlu1 %5142 }
0x1137   : > { %v4680_v27 = vsub.f32 %v8970_v4, %v4664_v28 }
0x1139   : > { %v4691_v40 = vmul.f32 1.442695, %v4680_v27 }
0x113b   : > { %6945 = vpow2.f32 %v4691_v40 }
0x113e   : > { %v4673_v12 = vpop.xlane.xlu0 %4672  ;;  %v5141_v29 = vpop.permute.xlu1 %5140 }
0x113f   : > { %v4683_v23 = vsub.f32 %v8978_v62, %v4673_v12 }
0x1141   : > { %v9011_v50 = vpop.eup %6945  ;;  %v4697_v47 = vmul.f32 1.442695, %v4683_v23 }
0x1142   : > { %v4710_v60 = vsel %vm1195_vm4, %v9011_v50, 0.0 }
0x1143   : > { %6947 = vpow2.f32 %v4697_v47  ;;  %4711 = vadd.xlane.f32.xlu0 %v4710_v60 }
0x1144   : > { %6949 = vpow2.f32 %v4699_v31 }
0x1149   : > { %v9016_v25 = vpop.eup %6947 }
0x114a   : > { %v4719_v4 = vsel %vm1195_vm4, %v9016_v25, 0.0  ;;  %v9020_v8 = vpop.eup %6949 }
0x114b   : > { %4720 = vadd.xlane.f32.xlu2 %v4719_v4  ;;  %v4722_v62 = vsel %vm1195_vm4, %v9020_v8, 0.0  ;;  %v9038_v4 = vpop.f32.mrf.mxu0 }
0x1153   : > { %4723 = vadd.xlane.f32.xlu2 %v4722_v62  ;;  %v9024_v7 = vpop.xlane.xlu2 %4093  ;;  %v4608_v62 = vpop.f32.mrf.mxu2 }
0x1157   : > { %5138 = vrot.lane.b32.xlu0 %v8608_v15, %s9875_s30 }
0x115b   : > { %v4709_v63 = vpop.xlane.xlu2 %4708 }
0x115c   : > { %6951 = vrcp.f32 %v4709_v63  ;;  %v4764_v51 = vand.u32 2147483648, %v4709_v63  ;;  %v4762_v27 = vand.u32 2147483647, %v4709_v63  ;;  %vm4758_vm15 = vweird.f32 %v4709_v63 }
0x115e   : > { %v4765_v12 = vor.u32 1.1754944e-38, %v4764_v51  ;;  %vm4763_vm3 = vcmp.eq.f32.partialorder %v4762_v27, 8.507059e+37 }
0x1162   : > { %v6952_v45 = vpop.eup %6951 }
0x1163   : > { %v4754_v2 = vmul.f32 %v6952_v45, %v4709_v63  ;;  %vm4759_vm14 = vweird.f32 %v6952_v45  ;;  %v9877_v63 = vld [vmem:[#allocation37_spill] sm:$0xff] }
0x1164   : > { %vm4760_vm2 = vmor %vm4758_vm15, %vm4759_vm14 }
0x1165   : > { %v4755_v11 = vsub.f32 1.0, %v4754_v2 }
0x1167   : > { %v4756_v28 = vmul.f32 %v6952_v45, %v4755_v11  ;;  %v4611_v11 = vpop.f32.mrf.mxu2 }
0x1169   : > { %v4757_v40 = vadd.f32 %v6952_v45, %v4756_v28  ;;  %v4658_v37 = vpop.xlane.xlu1 %4657 }
0x116a   : > { %v4678_v23 = vsub.f32 %v4534_v59, %v4658_v37 }
0x116b   : > { %v4761_v0 = vsel %vm4760_vm2, %v6952_v45, %v4757_v40  ;;  %6718 = vrot.lane.b32.xlu2 %v8854_v34, %s9861_s24  ;;  %v9041_v45 = vadd.f32 %v4608_v62, %v9877_v63 }
0x116c   : > { %v4766_v15 = vsel %vm4763_vm3, %v4765_v12, %v4761_v0  ;;  %v4687_v47 = vmul.f32 1.442695, %v4678_v23  ;;  %v9059_v12 = vpop.permute.xlu0 %5136 }
0x116d   : > { %v4839_v60 = vmul.f32 %v8993_v3, %v4766_v15  ;;  %v9043_v3 = vpop.f32.mrf.mxu0  ;;  %v4665_v2 = vsel %vm1195_vm4, %v9041_v45, -inf }
0x116e   : > { %6953 = vpow2.f32 %v4687_v47 }
0x116f   : > { %6442 = vmatmul.msk.f32.vlgmr.msrb.gmra.mxu3 %vm1195_vm4, %v4839_v60  ;;  %6955 = vrcp.f32 %v9007_v22 }
0x1170   : > { %6464 = vmatpush.xpose.msk.msrb.mxu3 %vm662_vm0, %v5143_v26 }
0x1174   : > { %v9033_v31 = vpop.eup %6953  ;;  %6465 = vmatpush.xpose.msk.msrb.mxu3 %vm662_vm0, %v5141_v29  ;;  %v9878_v29 = vld [vmem:[#allocation38_spill] sm:$0xff] }
0x1175   : > { %v4704_v59 = vsel %vm1195_vm4, %v9033_v31, 0.0  ;;  %v9047_v26 = vpop.f32.mrf.mxu0  ;;  %v9050_v51 = vadd.f32 %v4611_v11, %v9878_v29  ;;  %v6956_v23 = vpop.eup %6955 }
0x1176   : > { %4705 = vadd.xlane.f32.xlu1 %v4704_v59  ;;  %v4136_v15 = vmul.f32 %v6956_v23, %v9007_v22  ;;  %vm4141_vm7 = vweird.f32 %v6956_v23 }
0x1177   : > { %v4668_v28 = vsel %vm1195_vm4, %v9050_v51, -inf  ;;  %vm4142_vm11 = vmor %vm4140_vm9, %vm4141_vm7 }
0x1178   : > { %v4137_v47 = vsub.f32 1.0, %v4136_v15  ;;  %v4146_v15 = vand.u32 2147483648, %v9007_v22 }
0x117a   : > { %v4147_v32 = vor.u32 1.1754944e-38, %v4146_v15 }
0x117d   : > { %v3915_v27 = vpop.f32.mrf.mxu0 }
0x117e   : > { %v9055_v40 = vadd.f32 %v3915_v27, %v8146_v1 }
0x1180   : > { %v4038_v37 = vsel %vm1195_vm4, %v9055_v40, -inf }
0x1181   : > { %4666 = vmax.xlane.f32.xlu0 %v4665_v2  ;;  %v4138_v2 = vmul.f32 %v6956_v23, %v4137_v47  ;;  %v4144_v47 = vand.u32 2147483647, %v9007_v22 }
0x1183   : > { %vm4145_vm13 = vcmp.eq.f32.partialorder %v4144_v47, 8.507059e+37 }
0x1194   : > { %4669 = vmax.xlane.f32.xlu2 %v4668_v28 }
0x119c   : > { %4039 = vmax.xlane.f32.xlu2 %v4038_v37 }
0x11b4   : > { %5064 = vrot.lane.b32.xlu2 %v8596_v38, %s9873_s28 }
0x11b6   : > { %v4712_v0 = vpop.xlane.xlu0 %4711 }
0x11b7   : > { %6957 = vrcp.f32 %v4712_v0  ;;  %v4778_v29 = vand.u32 2147483648, %v4712_v0  ;;  %v4776_v28 = vand.u32 2147483647, %v4712_v0  ;;  %vm4772_vm6 = vweird.f32 %v4712_v0 }
0x11b8   : > { %6959 = vrcp.f32 %v9024_v7 }
0x11b9   : > { %v4779_v21 = vor.u32 1.1754944e-38, %v4778_v29  ;;  %vm4777_vm10 = vcmp.eq.f32.partialorder %v4776_v28, 8.507059e+37 }
0x11bc   : > { %5060 = vrot.lane.b32.xlu2 %v8596_v38, %s9875_s30  ;;  %v4139_v38 = vadd.f32 %v6956_v23, %v4138_v2 }
0x11bd   : > { %v6958_v1 = vpop.eup %6957 }
0x11be   : > { %v4768_v60 = vmul.f32 %v6958_v1, %v4712_v0  ;;  %v4721_v59 = vpop.xlane.xlu2 %4720  ;;  %v9068_v63 = vpop.eup %6959  ;;  %vm4773_vm5 = vweird.f32 %v6958_v1  ;;  %v4143_v5 = vsel %vm4142_vm11, %v6956_v23, %v4139_v38 }
0x11bf   : > { %6961 = vrcp.f32 %v4721_v59  ;;  %v4150_v27 = vmul.f32 %v9068_v63, %v9024_v7  ;;  %vm4774_vm8 = vmor %vm4772_vm6, %vm4773_vm5  ;;  %v4820_v2 = vand.u32 2147483648, %v4721_v59  ;;  %v4818_v29 = vand.u32 2147483647, %v4721_v59 }
0x11c0   : > { %v4769_v62 = vsub.f32 1.0, %v4768_v60  ;;  %vm4814_vm14 = vweird.f32 %v4721_v59  ;;  %vm4155_vm3 = vweird.f32 %v9068_v63  ;;  %vm4154_vm5 = vweird.f32 %v9024_v7 }
0x11c1   : > { %vm4819_vm2 = vcmp.eq.f32.partialorder %v4818_v29, 8.507059e+37  ;;  %vm9088_vm7 = vmor %vm4154_vm5, %vm4155_vm3 }
0x11c2   : > { %v4770_v11 = vmul.f32 %v6958_v1, %v4769_v62  ;;  %v4151_v62 = vsub.f32 1.0, %v4150_v27  ;;  %v4821_v27 = vor.u32 1.1754944e-38, %v4820_v2 }
0x11c4   : > { %v4771_v37 = vadd.f32 %v6958_v1, %v4770_v11  ;;  %v4152_v22 = vmul.f32 %v9068_v63, %v4151_v62  ;;  %v6356_v62 = vld [vmem:[%s9687_s11 + $0x20] sm:$0xff] }
0x11c5   : > { %v6962_v30 = vpop.eup %6961 }
0x11c6   : > { %v4810_v60 = vmul.f32 %v6962_v30, %v4721_v59  ;;  %v4724_v58 = vpop.xlane.xlu2 %4723  ;;  %v4775_v16 = vsel %vm4774_vm8, %v6958_v1, %v4771_v37  ;;  %vm4815_vm12 = vweird.f32 %v6962_v30  ;;  %v4148_v1 = vsel %vm4145_vm13, %v4147_v32, %v4143_v5 }
0x11c7   : > { %6963 = vrcp.f32 %v4724_v58  ;;  %v4780_v0 = vsel %vm4777_vm10, %v4779_v21, %v4775_v16  ;;  %vm4816_vm15 = vmor %vm4814_vm14, %vm4815_vm12  ;;  %v4834_v5 = vand.u32 2147483648, %v4724_v58  ;;  %v4158_v59 = vand.u32 2147483647, %v9024_v7 }
0x11c8   : > { %v4811_v11 = vsub.f32 1.0, %v4810_v60  ;;  %v4840_v35 = vmul.f32 %v9011_v50, %v4780_v0  ;;  %v4221_v50 = vmul.f32 %v8964_v44, %v4148_v1  ;;  %v4153_v60 = vadd.f32 %v9068_v63, %v4152_v22 }
0x11c9   : > { %v4832_v44 = vand.u32 2147483647, %v4724_v58  ;;  %vm4828_vm8 = vweird.f32 %v4724_v58  ;;  %v4835_v2 = vor.u32 1.1754944e-38, %v4834_v5  ;;  %vm4159_vm10 = vcmp.eq.f32.partialorder %v4158_v59, 8.507059e+37 }
0x11ca   : > { %v4812_v39 = vmul.f32 %v6962_v30, %v4811_v11  ;;  %6443 = vmatmul.msk.f32.gmra.mxu3 %vm1195_vm4, %v4840_v35 }
0x11cb   : > { %vm4833_vm11 = vcmp.eq.f32.partialorder %v4832_v44, 8.507059e+37 }
0x11cc   : > { %v4813_v28 = vadd.f32 %v6962_v30, %v4812_v39  ;;  %v4160_v39 = vand.u32 2147483648, %v9024_v7  ;;  %v4157_v7 = vsel %vm9088_vm7, %v9068_v63, %v4153_v60 }
0x11cd   : > { %v6964_v37 = vpop.eup %6963 }
0x11ce   : > { %v4817_v21 = vsel %vm4816_vm15, %v6962_v30, %v4813_v28  ;;  %v4824_v16 = vmul.f32 %v6964_v37, %v4724_v58  ;;  %v6719_v23 = vpop.permute.xlu2 %6718  ;;  %vm4829_vm6 = vweird.f32 %v6964_v37  ;;  %v4161_v0 = vor.u32 1.1754944e-38, %v4160_v39  ;;  %v5139_v58 = vpop.permute.xlu0 %5138 }
0x11cf   : > { %v4822_v38 = vsel %vm4819_vm2, %v4821_v27, %v4817_v21  ;;  %v6720_v15 = vunpack.i.l.bf16 %v6719_v23  ;;  %v6721_v30 = vunpack.i.h.bf16 %v6719_v23  ;;  %vm4830_vm9 = vmor %vm4828_vm8, %vm4829_vm6 }
0x11d0   : > { %v4843_v35 = vmul.f32 %v9016_v25, %v4822_v38  ;;  %v4825_v32 = vsub.f32 1.0, %v4824_v16  ;;  %v4162_v22 = vsel %vm4159_vm10, %v4161_v0, %v4157_v7  ;;  %v9881_v16 = vld [vmem:[#allocation40_spill] sm:$0xff] }
0x11d1   : > { %4288 = vmatpush.msra.mxu1 %v6720_v15  ;;  %v4222_v27 = vmul.f32 %v8986_v42, %v4162_v22 }
0x11d2   : > { %v4826_v47 = vmul.f32 %v6964_v37, %v4825_v32  ;;  %6446 = vmatmul.msk.f32.vlgmr.msra.gmra.mxu3 %vm1195_vm4, %v4843_v35 }
0x11d3   : > { %4289 = vmatpush.msra.mxu1 %v6721_v30 }
0x11d4   : > { %v4827_v25 = vadd.f32 %v6964_v37, %v4826_v47  ;;  %6402 = vmatmul.msk.f32.vlgmr.msra.gmra.mxu1 %vm1195_vm4, %v4221_v50 }
0x11d5   : > { %4471 = vmatpush.msrb.mxu1 %v6356_v62 }
0x11d6   : > { %v4831_v29 = vsel %vm4830_vm9, %v6964_v37, %v4827_v25 }
0x11d7   : > { %v4836_v1 = vsel %vm4833_vm11, %v4835_v2, %v4831_v29 }
0x11d8   : > { %v4844_v28 = vmul.f32 %v9020_v8, %v4836_v1 }
0x11da   : > { %6447 = vmatmul.msk.f32.gmra.mxu3 %vm1195_vm4, %v4844_v28 }
0x11dc   : > { %6403 = vmatmul.msk.f32.gmra.mxu1 %vm1195_vm4, %v4222_v27 }
0x11e2   : > { %6466 = vmatmul.msk.f32.vlgmr.msrb.gmra.mxu3 %vm662_vm0, %v9059_v12 }
0x11e4   : > { %6416 = vmatmul.msk.f32.vlgmr.msrb.gmra.mxu1 %vm662_vm0, %v8804_v36 }
0x11ea   : > { %6467 = vmatmul.msk.f32.gmra.mxu3 %vm662_vm0, %v5139_v58 }
0x11ec   : > { %6417 = vmatmul.msk.f32.gmra.mxu1 %vm662_vm0, %v8808_v55 }
0x11f4   : > { %v4667_v63 = vpop.xlane.xlu0 %4666  ;;  %6418 = vmatmul.msk.f32.gmra.mxu1 %vm662_vm0, %v9038_v4 }
0x11f5   : > { %v4681_v42 = vsub.f32 %v9041_v45, %v4667_v63 }
0x11f7   : > { %v4693_v8 = vmul.f32 1.442695, %v4681_v42 }
0x11f9   : > { %6965 = vpow2.f32 %v4693_v8 }
0x11fc   : > { %6419 = vmatmul.msk.f32.gmra.mxu1 %vm662_vm0, %v9043_v3 }
0x11ff   : > { %v9113_v12 = vpop.eup %6965 }
0x1200   : > { %v4713_v36 = vsel %vm1195_vm4, %v9113_v12, 0.0 }
0x1201   : > { %4714 = vadd.xlane.f32.xlu1 %v4713_v36 }
0x1204   : > { %6420 = vmatmul.msk.f32.gmra.mxu1 %vm662_vm0, %v8811_v41  ;;  %v9130_v41 = vadd.f32 %v9047_v26, %v9881_v16 }
0x1207   : > { %v4670_v55 = vpop.xlane.xlu2 %4669 }
0x1208   : > { %v4682_v37 = vsub.f32 %v9050_v51, %v4670_v55 }
0x120a   : > { %v4695_v4 = vmul.f32 1.442695, %v4682_v37 }
0x120c   : > { %6967 = vpow2.f32 %v4695_v4  ;;  %6421 = vmatmul.msk.f32.gmra.mxu1 %vm662_vm0, %v8814_v52  ;;  %v4035_v52 = vsel %vm1195_vm4, %v9130_v41, -inf }
0x120f   : > { %v4040_v45 = vpop.xlane.xlu2 %4039 }
0x1212   : > { %v9122_v21 = vpop.eup %6967 }
0x1213   : > { %v4716_v3 = vsel %vm1195_vm4, %v9122_v21, 0.0 }
0x1214   : > { %4717 = vadd.xlane.f32.xlu0 %v4716_v3  ;;  %6422 = vmatmul.msk.f32.gmra.mxu1 %vm662_vm0, %v8744_v46 }
0x1217   : > { %v5065_v51 = vpop.permute.xlu2 %5064 }
0x1218   : > { %6456 = vmatpush.xpose.msk.msra.mxu1 %vm662_vm0, %v5065_v51 }
0x121a   : > { %6723 = vrot.lane.b32.xlu1 %v8705_v48, %s9867_s2 }
0x121c   : > { %4036 = vmax.xlane.f32.xlu0 %v4035_v52  ;;  %6423 = vmatmul.msk.f32.gmra.mxu1 %vm662_vm0, %v8746_v54  ;;  %v9160_v54 = vpop.f32.mrf.mxu3 }
0x1222   : > { %5062 = vrot.lane.b32.xlu1 %v8594_v19, %s9873_s28 }
0x122a   : > { %5058 = vrot.lane.b32.xlu1 %v8594_v19, %s9875_s30  ;;  %v4060_v19 = vsub.f32 %v9055_v40, %v4040_v45 }
0x122c   : > { %v4069_v46 = vmul.f32 1.442695, %v4060_v19 }
0x122e   : > { %6969 = vpow2.f32 %v4069_v46 }
0x1230   : > { %6728 = vrot.lane.b32.xlu0 %v8736_v43, %s9867_s2  ;;  %s9889_s2 = sld [smem:[#allocation57_spill]] }
0x1232   : > { %5101 = vrot.lane.b32.xlu1 %v8598_v10, %s9873_s28 }
0x1234   : > { %v9162_v26 = vpop.eup %6969 }
0x1238   : > { %5103 = vrot.lane.b32.xlu0 %v8602_v18, %s9873_s28 }
0x123a   : > { %5099 = vrot.lane.b32.xlu1 %v8602_v18, %s9875_s30  ;;  %v4086_v18 = vsel %vm1195_vm4, %v9162_v26, 0.0 }
0x1240   : > { %5097 = vrot.lane.b32.xlu0 %v8598_v10, %s9875_s30 }
0x1248   : > { %5181 = vrot.lane.b32.xlu0 %v8616_v6, %s9873_s28 }
0x124d   : > { %v9166_v10 = vpop.f32.mrf.mxu3 }
0x1250   : > { %5179 = vrot.lane.b32.xlu0 %v8612_v9, %s9873_s28  ;;  %s7053_s28 = scalar_lea.hbm %s7052_s29, 4 }
0x1251   : > { %p7054_p11 = scmp.ne.s32.totalorder %s7052_s29, %s7053_s28  ;;  %p7059_p1 = scmp.lt.s32.totalorder %s7057_s5, %s7053_s28 }
0x1253   : > { %p7055_p12 = pnand %p7054_p11, %p7250_p5  ;;  %p7060_p2 = por %p7059_p1, %p7058_p0 }
0x1255   : > { %v9172_v40 = vpop.f32.mrf.mxu3  ;;  %p7056_p13 = pneg %p7055_p12 }
0x1257   : > { %p7061_p3 = pnand %p7060_p2, %p7056_p13 }
0x1258   : > { %5175 = vrot.lane.b32.xlu0 %v8612_v9, %s9875_s30  ;;  %v4703_v9 = vpop.xlane.xlu1 %4702 }
0x1259   : > { %6971 = vrcp.f32 %v4703_v9  ;;  %vm4730_vm13 = vweird.f32 %v4703_v9  ;;  %v4734_v44 = vand.u32 2147483647, %v4703_v9 }
0x125b   : > { %vm4735_vm15 = vcmp.eq.f32.partialorder %v4734_v44, 8.507059e+37 }
0x125d   : > { %v9174_v38 = vpop.f32.mrf.mxu3 }
0x125f   : > { %v6972_v23 = vpop.eup %6971 }
0x1260   : > { %6733 = vrot.lane.b32.xlu0 %v8705_v48, %s9861_s24  ;;  %v4706_v50 = vpop.xlane.xlu1 %4705  ;;  %v4726_v15 = vmul.f32 %v6972_v23, %v4703_v9  ;;  %vm4731_vm12 = vweird.f32 %v6972_v23  ;;  %s6177_s24 = sshll.u32 %s615_s6, 2 }
0x1261   : > { %6973 = vrcp.f32 %v4706_v50  ;;  %vm4732_vm14 = vmor %vm4730_vm13, %vm4731_vm12  ;;  %v4750_v63 = vand.u32 2147483648, %v4706_v50  ;;  %vm4744_vm3 = vweird.f32 %v4706_v50  ;;  %v4748_v36 = vand.u32 2147483647, %v4706_v50  ;;  %s617_s21 = scalar_lea.vmem [#allocation4], %s6177_s24 }
0x1262   : > { %v4727_v60 = vsub.f32 1.0, %v4726_v15 }
0x1263   : > { %v4751_v45 = vor.u32 1.1754944e-38, %v4750_v63  ;;  %vm4749_vm6 = vcmp.eq.f32.partialorder %v4748_v36, 8.507059e+37 }
0x1264   : > { %4087 = vadd.xlane.f32.xlu1 %v4086_v18  ;;  %v4728_v39 = vmul.f32 %v6972_v23, %v4727_v60 }
0x1265   : > { %v9176_v32 = vpop.f32.mrf.mxu3 }
0x1266   : > { %v4729_v59 = vadd.f32 %v6972_v23, %v4728_v39 }
0x1267   : > { %v6974_v35 = vpop.eup %6973 }
0x1268   : > { %5177 = vrot.lane.b32.xlu0 %v8616_v6, %s9875_s30  ;;  %v4740_v5 = vmul.f32 %v6974_v35, %v4706_v50  ;;  %v4736_v6 = vand.u32 2147483648, %v4703_v9  ;;  %v4733_v11 = vsel %vm4732_vm14, %v6972_v23, %v4729_v59  ;;  %vm4745_vm2 = vweird.f32 %v6974_v35 }
0x1269   : > { %vm4746_vm5 = vmor %vm4744_vm3, %vm4745_vm2 }
0x126a   : > { %v4741_v47 = vsub.f32 1.0, %v4740_v5  ;;  %v4737_v25 = vor.u32 1.1754944e-38, %v4736_v6 }
0x126c   : > { %v4742_v7 = vmul.f32 %v6974_v35, %v4741_v47  ;;  %v4738_v2 = vsel %vm4735_vm15, %v4737_v25, %v4733_v11  ;;  %v5061_v25 = vpop.permute.xlu2 %5060 }
0x126d   : > { %v5172_v0 = vpop.f32.mrf.mxu3  ;;  %v4837_v58 = vmul.f32 %v9003_v49, %v4738_v2 }
0x126e   : > { %v9184_v22 = vadd.f32 %v5172_v0, %v8316_v56  ;;  %v4743_v27 = vadd.f32 %v6974_v35, %v4742_v7 }
0x1270   : > { %v5229_v56 = vsel %vm1195_vm4, %v9184_v22, -inf  ;;  %v4747_v49 = vsel %vm4746_vm5, %v6974_v35, %v4743_v27  ;;  %v9207_v35 = vadd.f32 %v9176_v32, %v8342_v24 }
0x1271   : > { %v4752_v52 = vsel %vm4749_vm6, %v4751_v45, %v4747_v49 }
0x1272   : > { %v4838_v46 = vmul.f32 %v9033_v31, %v4752_v52  ;;  %v5226_v11 = vsel %vm1195_vm4, %v9207_v35, -inf }
0x1274   : > { %v9178_v30 = vpop.xlane.xlu1 %4714 }
0x1275   : > { %6975 = vrcp.f32 %v9178_v30  ;;  %v4792_v60 = vand.u32 2147483648, %v9178_v30  ;;  %vm4786_vm8 = vweird.f32 %v9178_v30  ;;  %v4790_v31 = vand.u32 2147483647, %v9178_v30 }
0x1277   : > { %v4793_v59 = vor.u32 1.1754944e-38, %v4792_v60  ;;  %vm4791_vm10 = vcmp.eq.f32.partialorder %v4790_v31, 8.507059e+37 }
0x127b   : > { %v6976_v1 = vpop.eup %6975 }
0x127c   : > { %v4782_v55 = vmul.f32 %v6976_v1, %v9178_v30  ;;  %vm4787_vm7 = vweird.f32 %v6976_v1 }
0x127d   : > { %vm4788_vm9 = vmor %vm4786_vm8, %vm4787_vm7 }
0x127e   : > { %v4783_v3 = vsub.f32 1.0, %v4782_v55 }
0x1287   : > { %v9181_v62 = vpop.xlane.xlu0 %4717 }
0x1288   : > { %6977 = vrcp.f32 %v9181_v62  ;;  %v4806_v30 = vand.u32 2147483648, %v9181_v62  ;;  %vm4800_vm12 = vweird.f32 %v9181_v62  ;;  %v4804_v32 = vand.u32 2147483647, %v9181_v62 }
0x128a   : > { %vm4805_vm14 = vcmp.eq.f32.partialorder %v4804_v32, 8.507059e+37 }
0x128c   : > { %v6724_v29 = vpop.permute.xlu1 %6723 }
0x128d   : > { %v6725_v28 = vunpack.i.l.bf16 %v6724_v29  ;;  %v6726_v42 = vunpack.i.h.bf16 %v6724_v29  ;;  %v4807_v29 = vor.u32 1.1754944e-38, %v4806_v30 }
0x128e   : > { %v6978_v51 = vpop.eup %6977 }
0x128f   : > { %4871 = vmatpush.msrb.mxu2 %v6725_v28  ;;  %v4037_v8 = vpop.xlane.xlu0 %4036  ;;  %v4796_v19 = vmul.f32 %v6978_v51, %v9181_v62  ;;  %vm4801_vm11 = vweird.f32 %v6978_v51  ;;  %v9221_v62 = vpop.f32.mrf.mxu1 }
0x1290   : > { %v4059_v37 = vsub.f32 %v9130_v41, %v4037_v8  ;;  %v4784_v41 = vmul.f32 %v6976_v1, %v4783_v3  ;;  %vm4802_vm13 = vmor %vm4800_vm12, %vm4801_vm11 }
0x1291   : > { %4872 = vmatpush.msrb.mxu2 %v6726_v42  ;;  %v4797_v50 = vsub.f32 1.0, %v4796_v19 }
0x1292   : > { %v4067_v4 = vmul.f32 1.442695, %v4059_v37  ;;  %6440 = vmatmul.msk.f32.vlgmr.msrb.gmra.mxu2 %vm1195_vm4, %v4837_v58  ;;  %5230 = vmax.xlane.f32.xlu0 %v5229_v56  ;;  %v4785_v23 = vadd.f32 %v6976_v1, %v4784_v41 }
0x1293   : > { %v4798_v5 = vmul.f32 %v6978_v51, %v4797_v50 }
0x1294   : > { %6979 = vpow2.f32 %v4067_v4  ;;  %v5063_v16 = vpop.permute.xlu1 %5062  ;;  %v4789_v39 = vsel %vm4788_vm9, %v6976_v1, %v4785_v23 }
0x1295   : > { %6457 = vmatpush.xpose.msk.msra.mxu1 %vm662_vm0, %v5063_v16  ;;  %v4794_v47 = vsel %vm4791_vm10, %v4793_v59, %v4789_v39  ;;  %v4799_v7 = vadd.f32 %v6978_v51, %v4798_v5 }
0x1296   : > { %v4841_v24 = vmul.f32 %v9113_v12, %v4794_v47 }
0x1297   : > { %v4803_v2 = vsel %vm4802_vm13, %v6978_v51, %v4799_v7  ;;  %v9226_v8 = vpop.f32.mrf.mxu1 }
0x1298   : > { %v4808_v28 = vsel %vm4805_vm14, %v4807_v29, %v4803_v2  ;;  %v9882_v29 = vld [vmem:[#allocation41_spill] sm:$0xff] }
0x1299   : > { %v4842_v58 = vmul.f32 %v9122_v21, %v4808_v28 }
0x129a   : > { %v9196_v18 = vpop.eup %6979  ;;  %6441 = vmatmul.msk.f32.gmra.mxu2 %vm1195_vm4, %v4838_v46 }
0x129b   : > { %v4083_v9 = vsel %vm1195_vm4, %v9196_v18, 0.0 }
0x129c   : > { %v5059_v15 = vpop.permute.xlu1 %5058  ;;  %4084 = vadd.xlane.f32.xlu2 %v4083_v9 }
0x129d   : > { %6458 = vmatmul.msk.f32.vlgmr.msra.gmra.mxu1 %vm662_vm0, %v5059_v15 }
0x129f   : > { %v9230_v55 = vpop.f32.mrf.mxu1 }
0x12a2   : > { %v6729_v6 = vpop.permute.xlu0 %6728 }
0x12a3   : > { %v6730_v44 = vunpack.i.l.bf16 %v6729_v6  ;;  %v6731_v0 = vunpack.i.h.bf16 %v6729_v6 }
0x12a4   : > { %5227 = vmax.xlane.f32.xlu2 %v5226_v11  ;;  %v5102_v27 = vpop.permute.xlu1 %5101 }
0x12a5   : > { %4941 = vmatpush.msra.mxu2 %v6730_v44  ;;  %6459 = vmatmul.msk.f32.gmra.mxu1 %vm662_vm0, %v5061_v25 }
0x12a7   : > { %4942 = vmatpush.msra.mxu2 %v6731_v0  ;;  %v9232_v49 = vpop.f32.mrf.mxu1 }
0x12a8   : > { %6444 = vmatmul.msk.f32.vlgmr.msra.gmra.mxu2 %vm1195_vm4, %v4841_v24 }
0x12aa   : > { %v5104_v1 = vpop.permute.xlu0 %5103 }
0x12ab   : > { %6460 = vmatpush.xpose.msk.msrb.mxu2 %vm662_vm0, %v5104_v1 }
0x12ac   : > { %v5100_v42 = vpop.permute.xlu1 %5099 }
0x12af   : > { %6461 = vmatpush.xpose.msk.msrb.mxu2 %vm662_vm0, %v5102_v27  ;;  %v9235_v3 = vpop.f32.mrf.mxu1 }
0x12b0   : > { %6445 = vmatmul.msk.f32.gmra.mxu2 %vm1195_vm4, %v4842_v58 }
0x12b2   : > { %v5098_v12 = vpop.permute.xlu0 %5097 }
0x12b7   : > { %v9237_v16 = vpop.f32.mrf.mxu1 }
0x12b8   : > { %6462 = vmatmul.msk.f32.vlgmr.msrb.gmra.mxu2 %vm662_vm0, %v5098_v12 }
0x12ba   : > { %v5182_v63 = vpop.permute.xlu0 %5181 }
0x12bb   : > { %6468 = vmatpush.xpose.msk.msrb.mxu1 %vm662_vm0, %v5182_v63 }
0x12bf   : > { %v9239_v51 = vpop.f32.mrf.mxu1 }
0x12c0   : > { %6463 = vmatmul.msk.f32.gmra.mxu2 %vm662_vm0, %v5100_v42 }
0x12c2   : > { %v5180_v36 = vpop.permute.xlu0 %5179 }
0x12c3   : > { %6469 = vmatpush.xpose.msk.msrb.mxu1 %vm662_vm0, %v5180_v36 }
0x12c7   : > { %v9241_v52 = vpop.f32.mrf.mxu1 }
0x12ca   : > { %v5176_v21 = vpop.permute.xlu0 %5175 }
0x12cb   : > { %6470 = vmatmul.msk.f32.vlgmr.msrb.gmra.mxu1 %vm662_vm0, %v5176_v21 }
0x12cf   : > { %v9244_v9 = vpop.f32.mrf.mxu1 }
0x12d2   : > { %v6734_v37 = vpop.permute.xlu0 %6733 }
0x12d3   : > { %v6735_v56 = vunpack.i.l.bf16 %v6734_v37  ;;  %v6736_v4 = vunpack.i.h.bf16 %v6734_v37 }
0x12d5   : > { %4253 = vmatpush.msrb.mxu0 %v6735_v56 }
0x12d7   : > { %4254 = vmatpush.msrb.mxu0 %v6736_v4  ;;  %v4088_v19 = vpop.xlane.xlu1 %4087  ;;  %v9250_v39 = vpop.f32.mrf.mxu1 }
0x12d8   : > { %6981 = vrcp.f32 %v4088_v19  ;;  %v4132_v63 = vand.u32 2147483648, %v4088_v19  ;;  %vm4126_vm7 = vweird.f32 %v4088_v19  ;;  %v4130_v36 = vand.u32 2147483647, %v4088_v19 }
0x12da   : > { %v5178_v45 = vpop.permute.xlu0 %5177  ;;  %vm4131_vm9 = vcmp.eq.f32.partialorder %v4130_v36, 8.507059e+37 }
0x12db   : > { %6471 = vmatmul.msk.f32.gmra.mxu1 %vm662_vm0, %v5178_v45 }
0x12de   : > { %v6982_v50 = vpop.eup %6981 }
0x12df   : > { %v4122_v5 = vmul.f32 %v6982_v50, %v4088_v19  ;;  %vm4127_vm5 = vweird.f32 %v6982_v50 }
0x12e0   : > { %vm4128_vm8 = vmor %vm4126_vm7, %vm4127_vm5 }
0x12e1   : > { %v4123_v6 = vsub.f32 1.0, %v4122_v5 }
0x12e3   : > { %v4124_v7 = vmul.f32 %v6982_v50, %v4123_v6 }
0x1305   : > { %v5231_v41 = vpop.xlane.xlu0 %5230 }
0x1306   : > { %v5243_v46 = vsub.f32 %v9184_v22, %v5231_v41 }
0x1308   : > { %v5256_v23 = vmul.f32 1.442695, %v5243_v46 }
0x130a   : > { %6983 = vpow2.f32 %v5256_v23  ;;  %v4133_v23 = vor.u32 1.1754944e-38, %v4132_v63 }
0x130f   : > { %v4085_v15 = vpop.xlane.xlu2 %4084 }
0x1310   : > { %v9246_v60 = vpop.eup %6983  ;;  %6985 = vrcp.f32 %v4085_v15  ;;  %v4118_v30 = vand.u32 2147483648, %v4085_v15  ;;  %v4116_v2 = vand.u32 2147483647, %v4085_v15  ;;  %vm4112_vm2 = vweird.f32 %v4085_v15 }
0x1311   : > { %v5277_v31 = vsel %vm1195_vm4, %v9246_v60, 0.0 }
0x1312   : > { %5278 = vadd.xlane.f32.xlu2 %v5277_v31  ;;  %v4119_v58 = vor.u32 1.1754944e-38, %v4118_v30  ;;  %vm4117_vm6 = vcmp.eq.f32.partialorder %v4116_v2, 8.507059e+37  ;;  %v9886_v30 = vld [vmem:[#allocation43_spill] sm:$0xff] }
0x1315   : > { %v9253_v25 = vpop.f32.mrf.mxu2 }
0x1316   : > { %v6986_v59 = vpop.eup %6985 }
0x1317   : > { %v4108_v22 = vmul.f32 %v6986_v59, %v4085_v15  ;;  %v5228_v47 = vpop.xlane.xlu2 %5227  ;;  %vm4113_vm15 = vweird.f32 %v6986_v59 }
0x1318   : > { %v5242_v44 = vsub.f32 %v9207_v35, %v5228_v47  ;;  %vm4114_vm3 = vmor %vm4112_vm2, %vm4113_vm15  ;;  %v4125_v35 = vadd.f32 %v6982_v50, %v4124_v7  ;;  %v9885_v7 = vld [vmem:[#allocation44_spill] sm:$0xff] }
0x1319   : > { %v4109_v11 = vsub.f32 1.0, %v4108_v22  ;;  %v9884_v22 = vld [vmem:[#allocation42_spill] sm:$0xff] }
0x131a   : > { %v5254_v0 = vmul.f32 1.442695, %v5242_v44  ;;  %v5091_v24 = vpop.f32.mrf.mxu1  ;;  %v4129_v46 = vsel %vm4128_vm8, %v6982_v50, %v4125_v35 }
0x131b   : > { %v4110_v32 = vmul.f32 %v6986_v59, %v4109_v11  ;;  %v5092_v1 = vadd.f32 %v5091_v24, %v9882_v29 }
0x131c   : > { %6987 = vpow2.f32 %v5254_v0 }
0x131d   : > { %v4111_v28 = vadd.f32 %v6986_v59, %v4110_v32  ;;  %v5214_v27 = vsel %vm1195_vm4, %v5092_v1, -inf  ;;  %v9260_v4 = vpop.f32.mrf.mxu2  ;;  %v6357_v32 = vld [vmem:[%s9687_s11 + $0x28] sm:$0xff] }
0x131e   : > { %5215 = vmax.xlane.f32.xlu2 %v5214_v27  ;;  %4406 = vmatpush.msra.mxu0 %v6357_v32 }
0x131f   : > { %v4115_v12 = vsel %vm4114_vm3, %v6986_v59, %v4111_v28 }
0x1320   : > { %v4120_v42 = vsel %vm4117_vm6, %v4119_v58, %v4115_v12 }
0x1321   : > { %v4219_v21 = vmul.f32 %v9196_v18, %v4120_v42  ;;  %v4134_v18 = vsel %vm4131_vm9, %v4133_v23, %v4129_v46  ;;  %vm5703_vm9 = vcmask 392192  }
0x1322   : > { %v9258_v37 = vpop.eup %6987  ;;  %v5094_v56 = vpop.f32.mrf.mxu1  ;;  %v4220_v15 = vmul.f32 %v9162_v26, %v4134_v18 }
0x1323   : > { %v5095_v45 = vadd.f32 %v5094_v56, %v8257_v33  ;;  %6400 = vmatmul.msk.f32.vlgmr.msrb.gmra.mxu0 %vm1195_vm4, %v4219_v21  ;;  %v5274_v41 = vsel %vm1195_vm4, %v9258_v37, 0.0 }
0x1324   : > { %5275 = vadd.xlane.f32.xlu1 %v5274_v41 }
0x1325   : > { %v5217_v19 = vsel %vm1195_vm4, %v5095_v45, -inf }
0x1326   : > { %5218 = vmax.xlane.f32.xlu2 %v5217_v19 }
0x132b   : > { %6401 = vmatmul.msk.f32.gmra.mxu0 %vm1195_vm4, %v4220_v15  ;;  %v9269_v31 = vpop.f32.mrf.mxu2 }
0x1333   : > { %v9271_v33 = vpop.f32.mrf.mxu2 }
0x133b   : > { %v5130_v5 = vpop.f32.mrf.mxu2 }
0x133c   : > { %v9274_v59 = vadd.f32 %v5130_v5, %v8330_v13 }
0x133d   : > { %6738 = vrot.lane.b32.xlu1 %v8736_v43, %s9883_s12 }
0x133e   : > { %v5220_v50 = vsel %vm1195_vm4, %v9274_v59, -inf }
0x133f   : > { %5221 = vmax.xlane.f32.xlu2 %v5220_v50 }
0x1343   : > { %v5133_v6 = vpop.f32.mrf.mxu2 }
0x1344   : > { %v9281_v26 = vadd.f32 %v5133_v6, %v9884_v22 }
0x1346   : > { %v5223_v47 = vsel %vm1195_vm4, %v9281_v26, -inf }
0x1347   : > { %5224 = vmax.xlane.f32.xlu2 %v5223_v47 }
0x1348   : > { %v5208_v44 = vpop.f32.mrf.mxu1 }
0x1349   : > { %v9291_v0 = vadd.f32 %v5208_v44, %v9886_v30 }
0x134b   : > { %v5232_v24 = vsel %vm1195_vm4, %v9291_v0, -inf }
0x1358   : > { %v5211_v11 = vpop.f32.mrf.mxu1 }
0x1359   : > { %v9286_v13 = vadd.f32 %v5211_v11, %v9885_v7 }
0x135b   : > { %v5235_v43 = vsel %vm1195_vm4, %v9286_v13, -inf }
0x135c   : > { %5236 = vmax.xlane.f32.xlu2 %v5235_v43 }
0x1367   : > { %5233 = vmax.xlane.f32.xlu1 %v5232_v24 }
0x1385   : > { %v5279_v2 = vpop.xlane.xlu2 %5278 }
0x1386   : > { %v5367_v32 = vand.u32 2147483648, %v5279_v2  ;;  %vm5361_vm15 = vweird.f32 %v5279_v2 }
0x1391   : > { %v5216_v29 = vpop.xlane.xlu2 %5215 }
0x1392   : > { %v5238_v28 = vsub.f32 %v5092_v1, %v5216_v29 }
0x1394   : > { %v5246_v27 = vmul.f32 1.442695, %v5238_v28 }
0x1396   : > { %6989 = vpow2.f32 %v5246_v27  ;;  %v5365_v27 = vand.u32 2147483647, %v5279_v2 }
0x1397   : > { %v5276_v58 = vpop.xlane.xlu1 %5275 }
0x1398   : > { %6991 = vrcp.f32 %v5276_v58  ;;  %v5353_v6 = vand.u32 2147483648, %v5276_v58  ;;  %vm5347_vm11 = vweird.f32 %v5276_v58  ;;  %v5351_v22 = vand.u32 2147483647, %v5276_v58 }
0x1399   : > { %v5219_v35 = vpop.xlane.xlu2 %5218  ;;  %6993 = vrcp.f32 %v5279_v2  ;;  %vm5366_vm3 = vcmp.eq.f32.partialorder %v5365_v27, 8.507059e+37 }
0x139a   : > { %v5239_v12 = vsub.f32 %v5095_v45, %v5219_v35  ;;  %v5354_v11 = vor.u32 1.1754944e-38, %v5353_v6  ;;  %vm5352_vm13 = vcmp.eq.f32.partialorder %v5351_v22, 8.507059e+37 }
0x139c   : > { %v9298_v63 = vpop.eup %6989  ;;  %v5248_v42 = vmul.f32 1.442695, %v5239_v12 }
0x139d   : > { %v5262_v36 = vsel %vm1195_vm4, %v9298_v63, 0.0 }
0x139e   : > { %v6992_v21 = vpop.eup %6991  ;;  %6995 = vpow2.f32 %v5248_v42  ;;  %5263 = vadd.xlane.f32.xlu0 %v5262_v36  ;;  %v5368_v36 = vor.u32 1.1754944e-38, %v5367_v32 }
0x139f   : > { %v5343_v56 = vmul.f32 %v6992_v21, %v5276_v58  ;;  %v6994_v1 = vpop.eup %6993  ;;  %vm5348_vm10 = vweird.f32 %v6992_v21 }
0x13a0   : > { %v4256_v41 = vpop.f32.mrf.mxu0  ;;  %v5357_v19 = vmul.f32 %v6994_v1, %v5279_v2  ;;  %vm5349_vm12 = vmor %vm5347_vm11, %vm5348_vm10  ;;  %vm5362_vm14 = vweird.f32 %v6994_v1 }
0x13a1   : > { %v5344_v46 = vsub.f32 1.0, %v5343_v56  ;;  %6408 = vmatmul.msk.f32.vlgmr.msra.gmra.mxu0 %vm662_vm0, %v4256_v41  ;;  %vm5363_vm2 = vmor %vm5361_vm15, %vm5362_vm14 }
0x13a2   : > { %v5358_v5 = vsub.f32 1.0, %v5357_v19 }
0x13a3   : > { %v5345_v45 = vmul.f32 %v6992_v21, %v5344_v46 }
0x13a4   : > { %v9303_v23 = vpop.eup %6995  ;;  %v5359_v47 = vmul.f32 %v6994_v1, %v5358_v5 }
0x13a5   : > { %v5265_v18 = vsel %vm1195_vm4, %v9303_v23, 0.0  ;;  %v5346_v50 = vadd.f32 %v6992_v21, %v5345_v45 }
0x13a6   : > { %5266 = vadd.xlane.f32.xlu0 %v5265_v18  ;;  %v5360_v24 = vadd.f32 %v6994_v1, %v5359_v47 }
0x13a7   : > { %v5350_v44 = vsel %vm5349_vm12, %v6992_v21, %v5346_v50 }
0x13a8   : > { %v4259_v15 = vpop.f32.mrf.mxu0  ;;  %v5355_v43 = vsel %vm5352_vm13, %v5354_v11, %v5350_v44  ;;  %v5364_v42 = vsel %vm5363_vm2, %v6994_v1, %v5360_v24  ;;  %v5694_v24 = vld [vmem:[%s9690_s14 + $0x78] sm:$0xff] }
0x13a9   : > { %6409 = vmatmul.msk.f32.gmra.mxu0 %vm662_vm0, %v4259_v15  ;;  %v5402_v58 = vmul.f32 %v9258_v37, %v5355_v43 }
0x13af   : > { %v6739_v7 = vpop.permute.xlu1 %6738 }
0x13b0   : > { %v6740_v30 = vunpack.i.l.bf16 %v6739_v7  ;;  %v6741_v29 = vunpack.i.h.bf16 %v6739_v7 }
0x13b1   : > { %6410 = vmatmul.msk.f32.gmra.mxu0 %vm662_vm0, %v9221_v62  ;;  %v5369_v62 = vsel %vm5366_vm3, %v5368_v36, %v5364_v42 }
0x13b2   : > { %5502 = vmatpush.msra.mxu1 %v6740_v30  ;;  %v5222_v28 = vpop.xlane.xlu2 %5221 }
0x13b3   : > { %v5240_v35 = vsub.f32 %v9274_v59, %v5222_v28  ;;  %v5403_v59 = vmul.f32 %v9246_v60, %v5369_v62 }
0x13b4   : > { %5503 = vmatpush.msra.mxu1 %v6741_v29 }
0x13b5   : > { %v5250_v12 = vmul.f32 1.442695, %v5240_v35  ;;  %6476 = vmatmul.msk.f32.vlgmr.msra.gmra.mxu1 %vm1195_vm4, %v5402_v58 }
0x13b7   : > { %6997 = vpow2.f32 %v5250_v12  ;;  %v5693_v12 = vld [vmem:[%s9690_s14 + $0x70] sm:$0xff] }
0x13b9   : > { %6411 = vmatmul.msk.f32.gmra.mxu0 %vm662_vm0, %v9226_v8  ;;  %v6358_v8 = vld [vmem:[%s9687_s11 + $0x30] sm:$0xff] }
0x13ba   : > { %6743 = vrot.lane.b32.xlu0 %v8705_v48, %s9883_s12  ;;  %v5225_v2 = vpop.xlane.xlu2 %5224  ;;  %5024 = vmatpush.msrb.mxu0 %v6358_v8 }
0x13bb   : > { %v5241_v37 = vsub.f32 %v9281_v26, %v5225_v2 }
0x13bc   : > { %6489 = vmatpush.xpose.msk.msra.mxu0 %vm5703_vm9, %v5694_v24  ;;  %v5685_v24 = vld [vmem:[%s9690_s14 + $0x30] sm:$0xff] }
0x13bd   : > { %v9319_v21 = vpop.eup %6997  ;;  %v5252_v56 = vmul.f32 1.442695, %v5241_v37  ;;  %6477 = vmatmul.msk.f32.gmra.mxu1 %vm1195_vm4, %v5403_v59 }
0x13be   : > { %v5268_v41 = vsel %vm1195_vm4, %v9319_v21, 0.0 }
0x13bf   : > { %6999 = vpow2.f32 %v5252_v56  ;;  %5269 = vadd.xlane.f32.xlu2 %v5268_v41  ;;  %v5691_v41 = vld [vmem:[%s9690_s14 + $0x60] sm:$0xff] }
0x13c0   : > { %6490 = vmatpush.xpose.msk.msra.mxu0 %vm5703_vm9, %v5693_v12 }
0x13c1   : > { %6412 = vmatmul.msk.f32.gmra.mxu0 %vm662_vm0, %v8953_v61 }
0x13c5   : > { %v9329_v48 = vpop.eup %6999 }
0x13c6   : > { %v5271_v60 = vsel %vm1195_vm4, %v9329_v48, 0.0 }
0x13c7   : > { %5272 = vadd.xlane.f32.xlu2 %v5271_v60 }
0x13c9   : > { %6413 = vmatmul.msk.f32.gmra.mxu0 %vm662_vm0, %v8955_v14 }
0x13cf   : > { %v5237_v26 = vpop.xlane.xlu2 %5236 }
0x13d0   : > { %v5245_v46 = vsub.f32 %v9286_v13, %v5237_v26 }
0x13d1   : > { %6414 = vmatmul.msk.f32.gmra.mxu0 %vm662_vm0, %v8882_v17  ;;  %v5640_v17 = vld [vmem:[%s9692_s16 + $0x8] sm:$0xff] }
0x13d2   : > { %v5260_v1 = vmul.f32 1.442695, %v5245_v46  ;;  %5673 = vmatpush.msrb.mxu1 %v5640_v17 }
0x13d4   : > { %7001 = vpow2.f32 %v5260_v1  ;;  %v5690_v1 = vld [vmem:[%s9690_s14 + $0x58] sm:$0xff] }
0x13d9   : > { %6415 = vmatmul.msk.f32.gmra.mxu0 %vm662_vm0, %v8886_v57 }
0x13da   : > { %v9340_v61 = vpop.eup %7001  ;;  %v5234_v19 = vpop.xlane.xlu1 %5233 }
0x13db   : > { %v5244_v45 = vsub.f32 %v9291_v0, %v5234_v19  ;;  %v5283_v18 = vsel %vm1195_vm4, %v9340_v61, 0.0  ;;  %v5656_v0 = vld [vmem:[#allocation1] sm:$0xff] }
0x13dc   : > { %5284 = vadd.xlane.f32.xlu1 %v5283_v18 }
0x13dd   : > { %v5258_v14 = vmul.f32 1.442695, %v5244_v45 }
0x13df   : > { %7003 = vpow2.f32 %v5258_v14  ;;  %6748 = vrot.lane.b32.xlu2 %v8854_v34, %s9883_s12  ;;  %v5639_v34 = vld [vmem:[%s9692_s16] sm:$0xff] }
0x13e0   : > { %5674 = vmatpush.msrb.mxu1 %v5639_v34 }
0x13e1   : > { %6448 = vmatmul.msk.f32.vlgmr.msrb.gmra.mxu0 %vm662_vm0, %v9253_v25  ;;  %6488 = vmatmul.msk.f32.vlgmr.msrb.gmra.mxu1 %vm1195_vm4, %v5656_v0 }
0x13e5   : > { %v9352_v57 = vpop.eup %7003 }
0x13e6   : > { %v5280_v13 = vsel %vm1195_vm4, %v9352_v57, 0.0 }
0x13e7   : > { %5281 = vadd.xlane.f32.xlu0 %v5280_v13  ;;  %v5689_v13 = vld [vmem:[%s9690_s14 + $0x50] sm:$0xff] }
0x13e9   : > { %6449 = vmatmul.msk.f32.gmra.mxu0 %vm662_vm0, %v9260_v4 }
0x13f1   : > { %6450 = vmatmul.msk.f32.gmra.mxu0 %vm662_vm0, %v9160_v54 }
0x13f5   : > { %6753 = vrot.lane.b32.xlu1 %v8664_v53, %s9883_s12  ;;  %s6069_s12 = sshll.u32 %s617_s21, 4  ;;  %s6070_s12 = int_to_ptr.vmem [resolvable:$true] %s6069_s12 }
0x13f9   : > { %6451 = vmatmul.msk.f32.gmra.mxu0 %vm662_vm0, %v9166_v10 }
0x1401   : > { %6452 = vmatmul.msk.f32.gmra.mxu0 %vm662_vm0, %v9269_v31 }
0x1409   : > { %6453 = vmatmul.msk.f32.gmra.mxu0 %vm662_vm0, %v9271_v33 }
0x1411   : > { %6454 = vmatmul.msk.f32.gmra.mxu0 %vm662_vm0, %v9172_v40  ;;  %v5264_v25 = vpop.xlane.xlu0 %5263 }
0x1412   : > { %7005 = vrcp.f32 %v5264_v25  ;;  %v5297_v40 = vand.u32 2147483648, %v5264_v25  ;;  %vm5291_vm6 = vweird.f32 %v5264_v25  ;;  %v5295_v47 = vand.u32 2147483647, %v5264_v25 }
0x1414   : > { %vm5296_vm8 = vcmp.eq.f32.partialorder %v5295_v47, 8.507059e+37 }
0x1418   : > { %v7006_v4 = vpop.eup %7005 }
0x1419   : > { %v5267_v15 = vpop.xlane.xlu0 %5266  ;;  %6455 = vmatmul.msk.f32.gmra.mxu0 %vm662_vm0, %v9174_v38  ;;  %v5287_v53 = vmul.f32 %v7006_v4, %v5264_v25  ;;  %vm5292_vm5 = vweird.f32 %v7006_v4  ;;  %v5298_v38 = vor.u32 1.1754944e-38, %v5297_v40 }
0x141a   : > { %7007 = vrcp.f32 %v5267_v15  ;;  %vm5293_vm7 = vmor %vm5291_vm6, %vm5292_vm5  ;;  %v5311_v28 = vand.u32 2147483648, %v5267_v15  ;;  %vm5305_vm11 = vweird.f32 %v5267_v15  ;;  %v5309_v35 = vand.u32 2147483647, %v5267_v15 }
0x141b   : > { %v5288_v54 = vsub.f32 1.0, %v5287_v53 }
0x141c   : > { %v5312_v62 = vor.u32 1.1754944e-38, %v5311_v28  ;;  %vm5310_vm13 = vcmp.eq.f32.partialorder %v5309_v35, 8.507059e+37  ;;  %v5684_v28 = vld [vmem:[%s9690_s14 + $0x28] sm:$0xff] }
0x141d   : > { %v5289_v31 = vmul.f32 %v7006_v4, %v5288_v54 }
0x141e   : > { %v9376_v10 = vpop.f32.mrf.mxu0 }
0x141f   : > { %v5290_v6 = vadd.f32 %v7006_v4, %v5289_v31  ;;  %v5688_v31 = vld [vmem:[%s9690_s14 + $0x48] sm:$0xff] }
0x1420   : > { %v7008_v5 = vpop.eup %7007 }
0x1421   : > { %v5301_v50 = vmul.f32 %v7008_v5, %v5267_v15  ;;  %v5294_v44 = vsel %vm5293_vm7, %v7006_v4, %v5290_v6  ;;  %vm5306_vm10 = vweird.f32 %v7008_v5 }
0x1422   : > { %v5299_v43 = vsel %vm5296_vm8, %v5298_v38, %v5294_v44  ;;  %vm5307_vm12 = vmor %vm5305_vm11, %vm5306_vm10 }
0x1423   : > { %v5302_v33 = vsub.f32 1.0, %v5301_v50  ;;  %v5398_v58 = vmul.f32 %v9298_v63, %v5299_v43  ;;  %v5692_v63 = vld [vmem:[%s9690_s14 + $0x68] sm:$0xff] }
0x1424   : > { %6491 = vmatpush.xpose.msk.msra.mxu0 %vm5703_vm9, %v5692_v63 }
0x1425   : > { %v5303_v11 = vmul.f32 %v7008_v5, %v5302_v33 }
0x1426   : > { %v9378_v22 = vpop.f32.mrf.mxu0 }
0x1427   : > { %v5304_v32 = vadd.f32 %v7008_v5, %v5303_v11  ;;  %v5687_v11 = vld [vmem:[%s9690_s14 + $0x40] sm:$0xff] }
0x1428   : > { %6492 = vmatpush.xpose.msk.msra.mxu0 %vm5703_vm9, %v5691_v41  ;;  %v5681_v41 = vld [vmem:[%s9690_s14 + $0x10] sm:$0xff] }
0x1429   : > { %v5308_v36 = vsel %vm5307_vm12, %v7008_v5, %v5304_v32 }
0x142a   : > { %v5313_v2 = vsel %vm5310_vm13, %v5312_v62, %v5308_v36  ;;  %v5682_v36 = vld [vmem:[%s9690_s14 + $0x18] sm:$0xff] }
0x142b   : > { %v5399_v59 = vmul.f32 %v9303_v23, %v5313_v2 }
0x142c   : > { %v6744_v7 = vpop.permute.xlu0 %6743  ;;  %6493 = vmatpush.xpose.msk.msra.mxu0 %vm5703_vm9, %v5690_v1 }
0x142d   : > { %v6745_v30 = vunpack.i.l.bf16 %v6744_v7  ;;  %v6746_v27 = vunpack.i.h.bf16 %v6744_v7  ;;  %v5686_v7 = vld [vmem:[%s9690_s14 + $0x38] sm:$0xff] }
0x142e   : > { %v9383_v29 = vpop.f32.mrf.mxu0 }
0x142f   : > { %5432 = vmatpush.msra.mxu2 %v6745_v30 }
0x1430   : > { %6494 = vmatpush.xpose.msk.msra.mxu0 %vm5703_vm9, %v5689_v13 }
0x1431   : > { %5433 = vmatpush.msra.mxu2 %v6746_v27 }
0x1432   : > { %6472 = vmatmul.msk.f32.vlgmr.msra.gmra.mxu2 %vm1195_vm4, %v5398_v58  ;;  %v5270_v42 = vpop.xlane.xlu2 %5269  ;;  %v9444_v27 = vpop.f32.mrf.mxu1  ;;  %v5683_v58 = vld [vmem:[%s9690_s14 + $0x20] sm:$0xff] }
0x1433   : > { %7009 = vrcp.f32 %v5270_v42  ;;  %v5325_v46 = vand.u32 2147483648, %v5270_v42  ;;  %v5323_v23 = vand.u32 2147483647, %v5270_v42  ;;  %vm5319_vm15 = vweird.f32 %v5270_v42 }
0x1434   : > { %6495 = vmatpush.xpose.msk.msra.mxu0 %vm5703_vm9, %v5688_v31 }
0x1435   : > { %v5326_v17 = vor.u32 1.1754944e-38, %v5325_v46  ;;  %vm5324_vm3 = vcmp.eq.f32.partialorder %v5323_v23, 8.507059e+37  ;;  %v5680_v46 = vld [vmem:[%s9690_s14 + $0x8] sm:$0xff] }
0x1436   : > { %v9395_v37 = vpop.f32.mrf.mxu0 }
0x1438   : > { %6496 = vmatpush.xpose.msk.msra.mxu0 %vm5703_vm9, %v5687_v11  ;;  %v9890_v11 = vld [vmem:[#allocation9_spill] sm:$0xff] }
0x1439   : > { %v7010_v56 = vpop.eup %7009 }
0x143a   : > { %v5315_v8 = vmul.f32 %v7010_v56, %v5270_v42  ;;  %6473 = vmatmul.msk.f32.gmra.mxu2 %vm1195_vm4, %v5399_v59  ;;  %v5273_v60 = vpop.xlane.xlu2 %5272  ;;  %vm5320_vm14 = vweird.f32 %v7010_v56  ;;  %v4474_v42 = vadd.f32 %v9230_v55, %v9376_v10  ;;  %v9465_v59 = vpop.f32.mrf.mxu1 }
0x143b   : > { %7011 = vrcp.f32 %v5273_v60  ;;  %vm5321_vm2 = vmor %vm5319_vm15, %vm5320_vm14  ;;  %v5339_v54 = vand.u32 2147483648, %v5273_v60  ;;  %v5337_v33 = vand.u32 2147483647, %v5273_v60  ;;  %vm5333_vm6 = vweird.f32 %v5273_v60 }
0x143c   : > { %v5316_v26 = vsub.f32 1.0, %v5315_v8  ;;  %6497 = vmatpush.xpose.msk.msra.mxu0 %vm5703_vm9, %v5686_v7 }
0x143d   : > { %v5340_v44 = vor.u32 1.1754944e-38, %v5339_v54  ;;  %vm5338_vm8 = vcmp.eq.f32.partialorder %v5337_v33, 8.507059e+37 }
0x143e   : > { %v5317_v19 = vmul.f32 %v7010_v56, %v5316_v26  ;;  %v9407_v45 = vpop.f32.mrf.mxu0 }
0x1440   : > { %v5318_v18 = vadd.f32 %v7010_v56, %v5317_v19  ;;  %6498 = vmatpush.xpose.msk.msra.mxu0 %vm5703_vm9, %v5685_v24 }
0x1441   : > { %v7012_v14 = vpop.eup %7011 }
0x1442   : > { %v5322_v34 = vsel %vm5321_vm2, %v7010_v56, %v5318_v18  ;;  %v5329_v0 = vmul.f32 %v7012_v14, %v5273_v60  ;;  %v6749_v25 = vpop.permute.xlu2 %6748  ;;  %vm5334_vm5 = vweird.f32 %v7012_v14  ;;  %v4477_v60 = vadd.f32 %v9232_v49, %v9378_v22  ;;  %v6759_v49 = vld [vmem:[%s9693_s17] ss:$0 sm:$0xff] }
0x1443   : > { %v5327_v4 = vsel %vm5324_vm3, %v5326_v17, %v5322_v34  ;;  %v6750_v15 = vunpack.i.l.bf16 %v6749_v25  ;;  %v6751_v5 = vunpack.i.h.bf16 %v6749_v25  ;;  %vm5335_vm7 = vmor %vm5333_vm6, %vm5334_vm5  ;;  %vm5889_vm3 = vcmask 388096  }
0x1444   : > { %v5330_v53 = vsub.f32 1.0, %v5329_v0  ;;  %v5400_v50 = vmul.f32 %v9319_v21, %v5327_v4  ;;  %6499 = vmatpush.xpose.msk.msra.mxu0 %vm5703_vm9, %v5684_v28  ;;  %v5679_v4 = vld [vmem:[%s9690_s14] sm:$0xff]  ;;  %vm5902_vm6 = vcmask 519168  }
0x1445   : > { %5467 = vmatpush.msra.mxu3 %v6750_v15 }
0x1446   : > { %v5331_v6 = vmul.f32 %v7012_v14, %v5330_v53  ;;  %v9418_v40 = vpop.f32.mrf.mxu0 }
0x1447   : > { %5468 = vmatpush.msra.mxu3 %v6751_v5  ;;  %v5702_v5 = vld [vmem:[%s9690_s14 + $0xb8] sm:$0xff] }
0x1448   : > { %v5332_v47 = vadd.f32 %v7012_v14, %v5331_v6  ;;  %6474 = vmatmul.msk.f32.vlgmr.msra.gmra.mxu3 %vm1195_vm4, %v5400_v50  ;;  %6500 = vmatpush.xpose.msk.msra.mxu0 %vm5703_vm9, %v5683_v58  ;;  %v6760_v6 = vld [vmem:[%s9691_s15] ss:$0 sm:$0xff]  ;;  %v4483_v58 = vadd.f32 %v9237_v16, %v9395_v37  ;;  %v4486_v16 = vadd.f32 %v9239_v51, %v9407_v45 }
0x1449   : > { %v5695_v45 = vld [vmem:[%s9690_s14 + $0x80] sm:$0xff] }
0x144a   : > { %v5336_v21 = vsel %vm5335_vm7, %v7012_v14, %v5332_v47  ;;  %vm6051_vm7 = vcmask 1043459  }
0x144b   : > { %v5341_v38 = vsel %vm5338_vm8, %v5340_v44, %v5336_v21  ;;  %v4480_v44 = vadd.f32 %v9235_v3, %v9383_v29  ;;  %vm6054_vm8 = vcmask 125952  }
0x144c   : > { %v5401_v30 = vmul.f32 %v9329_v48, %v5341_v38  ;;  %6501 = vmatpush.xpose.msk.msra.mxu0 %vm5703_vm9, %v5682_v36  ;;  %v5697_v36 = vld [vmem:[%s9690_s14 + $0x90] sm:$0xff] }
0x144e   : > { %v9429_v43 = vpop.f32.mrf.mxu0 }
0x144f   : > { %v9437_v32 = vpop.xlane.xlu1 %5284 }
0x1450   : > { %6475 = vmatmul.msk.f32.gmra.mxu3 %vm1195_vm4, %v5401_v30  ;;  %7013 = vrcp.f32 %v9437_v32  ;;  %6502 = vmatpush.xpose.msk.msra.mxu0 %vm5703_vm9, %v5681_v41  ;;  %v5395_v31 = vand.u32 2147483648, %v9437_v32  ;;  %vm5389_vm15 = vweird.f32 %v9437_v32  ;;  %v5393_v33 = vand.u32 2147483647, %v9437_v32 }
0x1452   : > { %v5396_v29 = vor.u32 1.1754944e-38, %v5395_v31  ;;  %vm5394_vm5 = vcmp.eq.f32.partialorder %v5393_v33, 8.507059e+37 }
0x1454   : > { %6503 = vmatpush.xpose.msk.msra.mxu0 %vm5703_vm9, %v5680_v46 }
0x1456   : > { %v9446_v48 = vpop.f32.mrf.mxu0  ;;  %v9453_v12 = vpop.eup %7013 }
0x1457   : > { %v5385_v62 = vmul.f32 %v9453_v12, %v9437_v32  ;;  %vm5390_vm12 = vweird.f32 %v9453_v12  ;;  %v5700_v32 = vld [vmem:[%s9690_s14 + $0xa8] sm:$0xff] }
0x1458   : > { %6504 = vmatpush.xpose.msk.msra.mxu0 %vm5703_vm9, %v5679_v4  ;;  %vm9503_vm2 = vmor %vm5389_vm15, %vm5390_vm12 }
0x1459   : > { %v5386_v55 = vsub.f32 1.0, %v5385_v62 }
0x145a   : > { %v5282_v35 = vpop.xlane.xlu0 %5281 }
0x145b   : > { %7015 = vrcp.f32 %v5282_v35  ;;  %v5381_v26 = vand.u32 2147483648, %v5282_v35  ;;  %v5387_v1 = vmul.f32 %v9453_v12, %v5386_v55  ;;  %v5379_v23 = vand.u32 2147483647, %v5282_v35 }
0x145c   : > { %vm5375_vm11 = vweird.f32 %v5282_v35  ;;  %v4492_v55 = vadd.f32 %v9244_v9, %v9429_v43  ;;  %v5825_v9 = vld [vmem:[%s9889_s2 + $0x30] sm:$0xff]  ;;  %v5826_v43 = vld [vmem:[%s9889_s2 + $0x38] sm:$0xff] }
0x145d   : > { %v5382_v0 = vor.u32 1.1754944e-38, %v5381_v26  ;;  %v5388_v15 = vadd.f32 %v9453_v12, %v5387_v1  ;;  %vm5380_vm14 = vcmp.eq.f32.partialorder %v5379_v23, 8.507059e+37  ;;  %5855 = vmatpush.xpose.msra.mxu1 %v5825_v9  ;;  %v5823_v1 = vld [vmem:[%s9889_s2 + $0x20] sm:$0xff]  ;;  %v5821_v23 = vld [vmem:[%s9889_s2 + $0x10] sm:$0xff] }
0x145e   : > { %v5026_v2 = vpop.f32.mrf.mxu0  ;;  %v5676_v34 = vpop.f32.mrf.mxu1 }
0x145f   : > { %v9463_v63 = vadd.f32 %v5026_v2, %v4474_v42  ;;  %v5677_v25 = vadd.f32 %v6759_v49, %v5676_v34  ;;  %v5392_v3 = vsel %vm9503_vm2, %v9453_v12, %v5388_v15  ;;  %v5699_v12 = vld [vmem:[%s9690_s14 + $0xa0] sm:$0xff]  ;;  %v5696_v2 = vld [vmem:[%s9690_s14 + $0x88] sm:$0xff] }
0x1460   : > { %v5397_v24 = vsel %vm5394_vm5, %v5396_v29, %v5392_v3  ;;  %v5820_v49 = vld [vmem:[%s9889_s2 + $0x8] sm:$0xff]  ;;  %v9892_v3 = vld [vmem:[#allocation39_spill] sm:$0xff] }
0x1461   : > { %v7016_v56 = vpop.eup %7015  ;;  %6505 = vmatmul.msk.f32.vlgmr.msra.gmra.mxu0 %vm5703_vm9, %v5677_v25  ;;  %v5888_v21 = vmul.f32 %v6760_v6, %v5677_v25  ;;  %v5405_v28 = vmul.f32 %v9340_v61, %v5397_v24  ;;  %v5698_v61 = vld [vmem:[%s9690_s14 + $0x98] sm:$0xff]  ;;  %5856 = vmatpush.xpose.msra.mxu1 %v5823_v1 }
0x1462   : > { %v5371_v10 = vmul.f32 %v7016_v56, %v5282_v35  ;;  %vm5376_vm10 = vweird.f32 %v7016_v56 }
0x1463   : > { %vm5377_vm13 = vmor %vm5375_vm11, %vm5376_vm10  ;;  %v5890_v30 = vsel %vm5889_vm3, %v5888_v21, 0.0 }
0x1464   : > { %v5372_v8 = vsub.f32 1.0, %v5371_v10  ;;  %5891 = vadd.xlane.f32.xlu2 %v5890_v30 }
0x1465   : > { %5857 = vmatpush.xpose.msra.mxu1 %v5821_v23 }
0x1466   : > { %v5373_v19 = vmul.f32 %v7016_v56, %v5372_v8  ;;  %v5029_v18 = vpop.f32.mrf.mxu0 }
0x1467   : > { %v9478_v14 = vadd.f32 %v5029_v18, %v4477_v60  ;;  %v6754_v17 = vpop.permute.xlu1 %6753  ;;  %v5822_v18 = vld [vmem:[%s9889_s2 + $0x18] sm:$0xff] }
0x1468   : > { %v5374_v22 = vadd.f32 %v7016_v56, %v5373_v19  ;;  %v6755_v13 = vunpack.i.l.bf16 %v6754_v17  ;;  %v6756_v54 = vunpack.i.h.bf16 %v6754_v17  ;;  %v5824_v19 = vld [vmem:[%s9889_s2 + $0x28] sm:$0xff]  ;;  %v5819_v17 = vld [vmem:[%s9889_s2] sm:$0xff] }
0x1469   : > { %5858 = vmatpush.xpose.msra.mxu1 %v5819_v17 }
0x146a   : > { %v5378_v53 = vsel %vm5377_vm13, %v7016_v56, %v5374_v22  ;;  %5537 = vmatpush.msrb.mxu2 %v6755_v13  ;;  %v4489_v56 = vadd.f32 %v9241_v52, %v9418_v40  ;;  %v6359_v52 = vld [vmem:[%s9687_s11 + $0x38] sm:$0xff] }
0x146b   : > { %v5383_v50 = vsel %vm5380_vm14, %v5382_v0, %v5378_v53  ;;  %5585 = vmatpush.msrb.mxu3 %v6359_v52  ;;  %v9900_v52 = vld [vmem:[#allocation47_spill] sm:$0xff] }
0x146c   : > { %v5404_v47 = vmul.f32 %v9352_v57, %v5383_v50  ;;  %5538 = vmatpush.msrb.mxu2 %v6756_v54  ;;  %v5701_v57 = vld [vmem:[%s9690_s14 + $0xb0] sm:$0xff] }
0x146e   : > { %6506 = vmatpush.xpose.msk.msra.mxu2 %vm5703_vm9, %v5702_v5  ;;  %v5032_v38 = vpop.f32.mrf.mxu0 }
0x146f   : > { %6478 = vmatmul.msk.f32.vlgmr.msrb.gmra.mxu2 %vm1195_vm4, %v5404_v47  ;;  %v9516_v7 = vadd.f32 %v5032_v38, %v4480_v44  ;;  %v9891_v38 = vld [vmem:[#allocation45_spill] sm:$0xff] }
0x1472   : > { %6507 = vmatpush.xpose.msk.msra.mxu2 %vm5703_vm9, %v5701_v57 }
0x1476   : > { %6508 = vmatpush.xpose.msk.msra.mxu2 %vm5703_vm9, %v5700_v32  ;;  %v5035_v35 = vpop.f32.mrf.mxu0 }
0x1477   : > { %6479 = vmatmul.msk.f32.gmra.mxu2 %vm1195_vm4, %v5405_v28  ;;  %v9530_v42 = vadd.f32 %v5035_v35, %v4483_v58  ;;  %vm5827_vm4 = vcmask 523264   ;;  %v9893_v28 = vld [vmem:[#allocation12_spill] sm:$0xff]  ;;  %v9894_v58 = vld [vmem:[#allocation11_spill] sm:$0xff]  ;;  %v9895_v35 = vld [vmem:[#allocation46_spill] sm:$0xff] }
0x1478   : > { %6515 = vmatpush.xpose.msk.msrb.mxu0 %vm5827_vm4, %v5826_v43  ;;  %v9901_v43 = vld [vmem:[#allocation50_spill] sm:$0xff] }
0x147a   : > { %6509 = vmatpush.xpose.msk.msra.mxu2 %vm5703_vm9, %v5699_v12 }
0x147c   : > { %6516 = vmatpush.xpose.msk.msrb.mxu0 %vm5827_vm4, %v5824_v19  ;;  %v9902_v19 = vld [vmem:[#allocation49_spill] sm:$0xff] }
0x147e   : > { %6510 = vmatpush.xpose.msk.msra.mxu2 %vm5703_vm9, %v5698_v61  ;;  %v5038_v37 = vpop.f32.mrf.mxu0 }
0x147f   : > { %v9542_v62 = vadd.f32 %v5038_v37, %v4486_v16  ;;  %v9896_v16 = vld [vmem:[#allocation10_spill] sm:$0xff] }
0x1480   : > { %6517 = vmatpush.xpose.msk.msrb.mxu0 %vm5827_vm4, %v5822_v18  ;;  %v9903_v18 = vld [vmem:[#allocation16_spill] sm:$0xff] }
0x1482   : > { %6511 = vmatpush.xpose.msk.msra.mxu2 %vm5703_vm9, %v5697_v36 }
0x1484   : > { %6518 = vmatpush.xpose.msk.msrb.mxu0 %vm5827_vm4, %v5820_v49  ;;  %v9904_v49 = vld [vmem:[#allocation15_spill] sm:$0xff] }
0x1486   : > { %6512 = vmatpush.xpose.msk.msra.mxu2 %vm5703_vm9, %v5696_v2  ;;  %v5041_v51 = vpop.f32.mrf.mxu0 }
0x1487   : > { %v9554_v41 = vadd.f32 %v5041_v51, %v4489_v56  ;;  %v9897_v56 = vld [vmem:[#allocation48_spill] sm:$0xff]  ;;  %v9898_v51 = vld [vmem:[#allocation13_spill] sm:$0xff] }
0x148a   : > { %6513 = vmatpush.xpose.msk.msra.mxu2 %vm5703_vm9, %v5695_v45 }
0x148d   : > { %6514 = vmatmul.msk.f32.vlgmr.msra.gmra.mxu2 %vm5703_vm9, %v5677_v25  ;;  %vm5900_vm9 = vcmask 1043456  }
0x148e   : > { %v5044_v10 = vpop.f32.mrf.mxu0 }
0x148f   : > { %v9560_v8 = vadd.f32 %v5044_v10, %v4492_v55  ;;  %v9899_v55 = vld [vmem:[#allocation14_spill] sm:$0xff] }
0x14b5   : > { %v5435_v40 = vpop.f32.mrf.mxu2 }
0x14b6   : > { %6480 = vmatmul.msk.f32.vlgmr.msrb.gmra.mxu3 %vm662_vm0, %v5435_v40 }
0x14bd   : > { %v5438_v60 = vpop.f32.mrf.mxu2 }
0x14be   : > { %6481 = vmatmul.msk.f32.gmra.mxu3 %vm662_vm0, %v5438_v60 }
0x14cb   : > { %v5470_v26 = vpop.f32.mrf.mxu3 }
0x14cc   : > { %6482 = vmatmul.msk.f32.gmra.mxu3 %vm662_vm0, %v5470_v26  ;;  %v4495_v26 = vadd.f32 %v9250_v39, %v9446_v48 }
0x14d3   : > { %v5473_v46 = vpop.f32.mrf.mxu3 }
0x14d4   : > { %6483 = vmatmul.msk.f32.gmra.mxu3 %vm662_vm0, %v5473_v46 }
0x14dc   : > { %6484 = vmatmul.msk.f32.gmra.mxu3 %vm662_vm0, %v9444_v27  ;;  %v5047_v27 = vpop.f32.mrf.mxu0 }
0x14dd   : > { %v5057_v46 = vadd.f32 %v5047_v27, %v4495_v26 }
0x14e4   : > { %6485 = vmatmul.msk.f32.gmra.mxu3 %vm662_vm0, %v9465_v59  ;;  %v5796_v22 = vpop.f32.mrf.mxu0  ;;  %v5883_v59 = vld [vmem:[%s9689_s13] sm:$0x3] }
0x14e5   : > { %5859 = vmatmul.f32.vlgmr.msra.gmra.mxu1 %v5796_v22  ;;  %v5894_v0 = vperm.slane %v5883_v59, 0  ;;  %v5895_v25 = vperm.slane %v5883_v59, 1 }
0x14e7   : > { %v5898_v4 = vmul.f32 %v5894_v0, %v5796_v22 }
0x14e9   : > { %v5901_v54 = vsel %vm5900_vm9, %v5898_v4, 0.0 }
0x14f2   : > { %v5540_v13 = vpop.f32.mrf.mxu2 }
0x14f3   : > { %6486 = vmatmul.msk.f32.gmra.mxu3 %vm662_vm0, %v5540_v13 }
0x14fa   : > { %v5543_v34 = vpop.f32.mrf.mxu2 }
0x14fb   : > { %6487 = vmatmul.msk.f32.gmra.mxu3 %vm662_vm0, %v5543_v34  ;;  %vm6045_vm0 = vcmask 1041409  }
0x1510   : > { %v5816_v15 = vpop.f32.mrf.mxu2 }
0x1511   : > { %v5899_v53 = vmul.f32 %v5895_v25, %v5816_v15  ;;  %6519 = vmatmul.msk.f32.vlgmr.msrb.gmra.mxu0 %vm5827_vm4, %v5816_v15  ;;  %v5892_v25 = vpop.xlane.xlu2 %5891 }
0x1513   : > { %v5903_v5 = vsel %vm5902_vm6, %v5899_v53, 0.0 }
0x1514   : > { %v5904_v31 = vadd.f32 %v5903_v5, %v5901_v54 }
0x1516   : > { %5905 = vadd.xlane.f32.xlu1 %v5904_v31 }
0x1539   : > { %v5587_v50 = vpop.f32.mrf.mxu3 }
0x153a   : > { %v5611_v33 = vadd.f32 %v5587_v50, %v9463_v63 }
0x153c   : > { %v5619_v21 = vadd.f32 %v5611_v33, %v9890_v11 }
0x153e   : > { %v5627_v29 = vmul.f32 %v5619_v21, %v9892_v3 }
0x1541   : > { %v5590_v6 = vpop.f32.mrf.mxu3 }
0x1542   : > { %v5612_v47 = vadd.f32 %v5590_v6, %v9478_v14 }
0x1544   : > { %v5620_v44 = vadd.f32 %v5612_v47, %v8529_v20 }
0x1546   : > { %v5628_v57 = vmul.f32 %v5620_v44, %v9891_v38 }
0x1548   : > { %6520 = vmatpush.xpose.msk.msrb.mxu1 %vm736_vm1, %v5628_v57 }
0x154c   : > { %6521 = vmatpush.xpose.msk.msrb.mxu1 %vm736_vm1, %v5627_v29 }
0x154f   : > { %v5593_v30 = vpop.f32.mrf.mxu3 }
0x1550   : > { %v5613_v32 = vadd.f32 %v5593_v30, %v9516_v7 }
0x1552   : > { %v5621_v20 = vadd.f32 %v5613_v32, %v9894_v58 }
0x1554   : > { %v5629_v37 = vmul.f32 %v5621_v20, %v9896_v16 }
0x1557   : > { %v5596_v24 = vpop.f32.mrf.mxu3 }
0x1558   : > { %v5614_v63 = vadd.f32 %v5596_v24, %v9530_v42 }
0x155a   : > { %v5622_v14 = vadd.f32 %v5614_v63, %v9893_v28 }
0x155c   : > { %v5630_v12 = vmul.f32 %v5622_v14, %v9895_v35 }
0x155e   : > { %6523 = vmatpush.xpose.msk.msrb.mxu2 %vm736_vm1, %v5630_v12 }
0x155f   : > { %v5599_v61 = vpop.f32.mrf.mxu3 }
0x1560   : > { %v5615_v2 = vadd.f32 %v5599_v61, %v9542_v62 }
0x1562   : > { %6524 = vmatpush.xpose.msk.msrb.mxu2 %vm736_vm1, %v5629_v37  ;;  %v5623_v45 = vadd.f32 %v5615_v2, %v9898_v51  ;;  %v5860_v13 = vpop.f32.mrf.mxu1 }
0x1564   : > { %v5631_v40 = vmul.f32 %v5623_v45, %v9900_v52 }
0x1567   : > { %v5602_v36 = vpop.f32.mrf.mxu3 }
0x1568   : > { %v5616_v7 = vadd.f32 %v5602_v36, %v9554_v41 }
0x156a   : > { %v5624_v42 = vadd.f32 %v5616_v7, %v9897_v56 }
0x156c   : > { %v5632_v10 = vmul.f32 %v5624_v42, %v9899_v55 }
0x156e   : > { %6526 = vmatpush.xpose.msk.msra.mxu1 %vm736_vm1, %v5632_v10 }
0x1572   : > { %6527 = vmatpush.xpose.msk.msra.mxu1 %vm736_vm1, %v5631_v40 }
0x1576   : > { %v5605_v60 = vpop.f32.mrf.mxu3 }
0x1577   : > { %v5617_v41 = vadd.f32 %v5605_v60, %v9560_v8 }
0x1579   : > { %v5625_v23 = vadd.f32 %v5617_v41, %v9902_v19 }
0x157b   : > { %v5633_v22 = vmul.f32 %v5625_v23, %v9904_v49 }
0x157e   : > { %v5608_v62 = vpop.f32.mrf.mxu3 }
0x157f   : > { %v5618_v9 = vadd.f32 %v5608_v62, %v5057_v46 }
0x1581   : > { %v5626_v1 = vadd.f32 %v5618_v9, %v9901_v43 }
0x1583   : > { %v5634_v17 = vmul.f32 %v5626_v1, %v9903_v18 }
0x1585   : > { %6529 = vmatpush.xpose.msk.msra.mxu2 %vm736_vm1, %v5634_v17 }
0x1589   : > { %6530 = vmatpush.xpose.msk.msra.mxu2 %vm736_vm1, %v5633_v22  ;;  %v5906_v59 = vpop.xlane.xlu1 %5905 }
0x158a   : > { %v5907_v4 = vadd.f32 %v5906_v59, %v5892_v25 }
0x158c   : > { %v6025_v15 = vrot.slane %v5907_v4, 1  ;;  %v6026_v5 = vrot.slane %v5907_v4, 2  ;;  %v6027_v11 = vrot.slane %v5907_v4, 3 }
0x158e   : > { %v5880_v34 = vpop.f32.mrf.mxu0 }
0x158f   : > { %v5881_v39 = vadd.f32 %v5880_v34, %v5860_v13 }
0x1591   : > { %v5909_v48 = vrot.slane %v5881_v39, 1  ;;  %6522 = vmatmul.msk.f32.vlgmr.msrb.gmra.mxu1 %vm736_vm1, %v5881_v39  ;;  %v5910_v8 = vrot.slane %v5881_v39, 2  ;;  %v5911_v27 = vrot.slane %v5881_v39, 3 }
0x1593   : > { %6525 = vmatmul.msk.f32.vlgmr.msrb.gmra.mxu2 %vm736_vm1, %v5909_v48 }
0x1599   : > { %6528 = vmatmul.msk.f32.vlgmr.msra.gmra.mxu1 %vm736_vm1, %v5910_v8 }
0x159b   : > { %6531 = vmatmul.msk.f32.vlgmr.msra.gmra.mxu2 %vm736_vm1, %v5911_v27  ;;  %vm6048_vm1 = vcmask 1042434  }
0x160e   : > { %v5937_v0 = vpop.f32.mrf.mxu1 }
0x160f   : > { %v6032_v33 = vadd.f32 %v5937_v0, %v5907_v4 }
0x1611   : > { %v6036_v38 = vmax.f32 %v6032_v33, 0.0 }
0x1616   : > { %v5965_v53 = vpop.f32.mrf.mxu2  ;;  %v5993_v54 = vpop.f32.mrf.mxu1 }
0x1617   : > { %v6033_v31 = vadd.f32 %v6025_v15, %v5965_v53  ;;  %v6034_v50 = vadd.f32 %v6026_v5, %v5993_v54 }
0x1619   : > { %v6037_v6 = vmax.f32 %v6033_v31, 0.0  ;;  %v6038_v47 = vmax.f32 %v6034_v50, 0.0 }
0x161b   : > { %v6044_v44 = vrot.slane %v6037_v6, 7  ;;  %v6047_v3 = vrot.slane %v6038_v47, 6 }
0x161d   : > { %v6046_v29 = vsel %vm6045_vm0, %v6044_v44, %v6036_v38 }
0x161e   : > { %v6021_v21 = vpop.f32.mrf.mxu2  ;;  %v6049_v32 = vsel %vm6048_vm1, %v6047_v3, %v6046_v29 }
0x161f   : > { %v6035_v57 = vadd.f32 %v6027_v11, %v6021_v21 }
0x1621   : > { %v6039_v30 = vmax.f32 %v6035_v57, 0.0 }
0x1623   : > { %v6050_v24 = vrot.slane %v6039_v30, 5 }
0x1625   : > { %v6052_v63 = vsel %vm6051_vm7, %v6050_v24, %v6049_v32 }
0x1626   : > { %6055 = vst.msk [vmem:[%s617_s21] sm:$0xf] %vm6054_vm8, %v6052_v63 }
0x1627   : > { %7064 = shalt.err (!%p7061_p3)
}
0x1628   : > { %6541 = dma.vmem_to_hbm [thread:$0]  (%p7250_p5), %s6070_s12, 64, %s6072_s27, %s6057_s23  }
0x1629 PF: > { %p6547_p4 = scmp.ge.s32.totalorder %s7101_s20, 2  ;;  %s6083_s6 = sand.u32 1, %s7089_s0  }
0x162a   : > { %s6084_s21 = scalar_lea.sflag [#allocation5], %s6083_s6 }
0x162b   : > { %p6544_p7 = pnand %p6547_p4, %p7254_p6 }
0x162d   : > { %p6545_p8 = pneg %p6544_p7 }
0x162f   : > { %7084 = dma.done.wait (%p6545_p8), %s6084_s21, 64  }
0x1630   : > { %7086 = vsyncadd (%p6545_p8), %s6084_s21, 4294967232  ;;  %s9905_s3 = sld [smem:[#allocation8_spill]]  ;;  %p36_p9 = scmp.ge.s32.totalorder %s7238_s22, 6  }
0x1631   : > { %s9906_s0 = smov %s7093_s19  ;;  %s9907_s19 = smov %s7097_s1 }
0x1632   : > { %s9909_s20 = smov %s7238_s22  ;;  %38 = sbr.rel (!%p36_p9) target bundleno = 22 (0x16), region = 140 }
0x1636   : > { %s9908_s1 = smov %s9905_s3 }
0x1637   :  { %6090 = vsyncpa [#allocation5], 1 }
0x1638   :  { %6092 = vsyncpa [#allocation5 + $0x1], 1 }

</bundles_post_ra>
